<compile_context>
chip_gen: v7x
topology: tpu7x:2x2x1
jax: 0.10.0
libtpu: 0.0.40
codegen_flags: <defaults>
</compile_context>

<pallas_src>
from functools import partial

import jax
import jax.numpy as jnp
from jax.experimental import pallas as pl
from jax.experimental.pallas import tpu as pltpu


# ----------------------------------------------------------------------------
# Kernel
# ----------------------------------------------------------------------------
def _lstm_fc_kernel(x_ref,                       # (T*B, I)    bf16  time-major
                    wih0_ref, whh0_ref, b0_ref,  # (I,4Hp) bf16, (Hp,4Hp) bf16, (1,4Hp) f32
                    w1cat_ref, b1_ref,           # (2Hp,4Hp) bf16 [W_ih1;W_hh1], (1,4Hp) f32
                    fcw_ref, fcb_ref,            # (Hp,1) f32, (1,1) f32
                    out_ref,                     # (B, 1) f32
                    *, batch):
    B = batch
    TB, _ = x_ref.shape
    T = TB // B
    Hp = whh0_ref.shape[0]
    G = 4 * Hp
    bf16 = jnp.bfloat16

    # ---- Pre-pass: layer-0 input projection for every timestep at once. ----
    # One (T*B, I) @ (I, 4Hp) bf16 matmul (f32 accumulate); bias folded in.
    xproj = (jnp.dot(x_ref[...], wih0_ref[...],
                     preferred_element_type=jnp.float32)
             + b0_ref[...])                                  # (T*B, 4Hp) f32

    whh0 = whh0_ref[...]                                     # (Hp, 4Hp)  bf16
    w1cat = w1cat_ref[...]                                   # (2Hp, 4Hp) bf16
    # Hoisted: layer-1 bias broadcast (done once, not T times).
    b1b = jnp.broadcast_to(b1_ref[...], (B, G))              # (B, 4Hp)   f32

    def gates_to_hc(gates, c_prev=None):
        # PyTorch gate order i, f, g, o; every slice is 128-lane aligned.
        i = jax.nn.sigmoid(gates[:, 0 * Hp:1 * Hp])
        g = jnp.tanh(gates[:, 2 * Hp:3 * Hp])
        o = jax.nn.sigmoid(gates[:, 3 * Hp:4 * Hp])
        c_new = i * g
        if c_prev is not None:
            f = jax.nn.sigmoid(gates[:, 1 * Hp:2 * Hp])
            c_new = f * c_prev + c_new
        h_new = o * jnp.tanh(c_new)
        return h_new, c_new

    # ---- Peeled t = 0 (h = c = 0): no h-matmuls, no f*c terms. ----
    h0, c0 = gates_to_hc(xproj[0:B, :])
    g1 = jnp.dot(h0.astype(bf16), w1cat[:Hp, :],             # wih1 half only
                 preferred_element_type=jnp.float32) + b1b
    h1, c1 = gates_to_hc(g1)

    # ---- Remaining steps: fully unrolled (T is a static trace-time const). --
    for t in range(1, T):
        # Layer 0: x-projection already done; only the h-recurrence per step.
        g0 = xproj[t * B:(t + 1) * B, :] + jnp.dot(
            h0.astype(bf16), whh0, preferred_element_type=jnp.float32)
        h0, c0 = gates_to_hc(g0, c0)

        # Layer 1: single fused matmul on the concatenated [h0_t, h1_{t-1}].
        z1 = jnp.concatenate([h0, h1], axis=1).astype(bf16)  # (B, 2Hp)
        g1 = jnp.dot(z1, w1cat, preferred_element_type=jnp.float32) + b1b
        h1, c1 = gates_to_hc(g1, c1)

    # Final Linear on the last timestep's layer-1 hidden state (tiny, keep f32).
    out_ref[...] = (jnp.dot(h1, fcw_ref[...],
                            preferred_element_type=jnp.float32)
                    + fcb_ref[...])


# ----------------------------------------------------------------------------
# Wrapper
# ----------------------------------------------------------------------------
@jax.jit
def lstm_model_forward(x, params):
    """x: (B, T, I) float32 (batch_first, like the torch module). Returns (B,)."""
    B, T, I = x.shape
    # Time-major + bf16 LHS; a single cheap XLA transpose/cast outside the
    # serial-recurrence kernel.
    x_tm = jnp.transpose(x, (1, 0, 2)).reshape(T * B, I).astype(jnp.bfloat16)

    vmem = pl.BlockSpec(memory_space=pltpu.MemorySpace.VMEM)  # full array in VMEM

    out = pl.pallas_call(
        partial(_lstm_fc_kernel, batch=B),
        out_shape=jax.ShapeDtypeStruct((B, 1), jnp.float32),
        in_specs=[vmem] * 8,
        out_specs=vmem,
        # At these shapes everything trivially fits the default scoped VMEM.
        # For scaled-up H: raise vmem_limit_bytes (v6e/v5e) or tile the 4H dim
        # with a grid + BlockSpec (needed ~2x earlier on v7x, 64 MiB VMEM).
    )(x_tm,
      params["wih0"], params["whh0"], params["b0"],
      params["w1cat"], params["b1"],
      params["fcw"], params["fcb"])

    return out[:, 0]                                          # .squeeze(-1)


# ----------------------------------------------------------------------------
# Parameter init (PyTorch layout) + kernel-layout packing
# ----------------------------------------------------------------------------
def init_torch_params(key, input_size, hidden_size, output_size):
    """PyTorch-style uniform(-1/sqrt(H), 1/sqrt(H)) init, PyTorch layouts."""
    H = hidden_size
    bound = 1.0 / jnp.sqrt(jnp.float32(H))
    keys = jax.random.split(key, 10)
    u = lambda k, shape: jax.random.uniform(k, shape, jnp.float32, -bound, bound)
    return {
        "wih0": u(keys[0], (4 * H, input_size)),
        "whh0": u(keys[1], (4 * H, H)),
        "bih0": u(keys[2], (4 * H,)),
        "bhh0": u(keys[3], (4 * H,)),
        "wih1": u(keys[4], (4 * H, H)),
        "whh1": u(keys[5], (4 * H, H)),
        "bih1": u(keys[6], (4 * H,)),
        "bhh1": u(keys[7], (4 * H,)),
        "fcw": u(keys[8], (output_size, H)),
        "fcb": u(keys[9], (output_size,)),
    }


def pack_params(tp, hidden_size, lane=128):
    """Repack for the kernel: transpose to (in, 4H), fuse the two biases,
    zero-pad every gate block to a 128-lane boundary (Hp), stack layer-1's
    W_ih/W_hh into one (2Hp, 4Hp) matrix, cast matmul weights to bf16."""
    H = hidden_size
    Hp = -(-H // lane) * lane

    def gate_pad_cols(wT):                     # (rows, 4H) -> (rows, 4Hp)
        rows = wT.shape[0]
        out = jnp.zeros((rows, 4 * Hp), wT.dtype)
        for k in range(4):
            out = out.at[:, k * Hp:k * Hp + H].set(wT[:, k * H:(k + 1) * H])
        return out

    def pad_rows(w, nrows):                    # (H, cols) -> (nrows, cols)
        return jnp.zeros((nrows, w.shape[1]), w.dtype).at[:w.shape[0]].set(w)

    wih0 = gate_pad_cols(tp["wih0"].T)                        # (I,  4Hp)
    whh0 = pad_rows(gate_pad_cols(tp["whh0"].T), Hp)          # (Hp, 4Hp)
    b0 = gate_pad_cols((tp["bih0"] + tp["bhh0"])[None, :])    # (1,  4Hp)
    wih1 = pad_rows(gate_pad_cols(tp["wih1"].T), Hp)          # (Hp, 4Hp)
    whh1 = pad_rows(gate_pad_cols(tp["whh1"].T), Hp)          # (Hp, 4Hp)
    b1 = gate_pad_cols((tp["bih1"] + tp["bhh1"])[None, :])    # (1,  4Hp)
    fcw = pad_rows(tp["fcw"].T, Hp)                           # (Hp, O)
    fcb = tp["fcb"][None, :]                                  # (1,  O)

    bf16 = jnp.bfloat16
    return {
        "wih0": wih0.astype(bf16),
        "whh0": whh0.astype(bf16),
        "b0": b0.astype(jnp.float32),
        "w1cat": jnp.concatenate([wih1, whh1], axis=0).astype(bf16),  # (2Hp,4Hp)
        "b1": b1.astype(jnp.float32),
        "fcw": fcw.astype(jnp.float32),
        "fcb": fcb.astype(jnp.float32),
    }


# ----------------------------------------------------------------------------
# Pure-JAX f32 reference of the torch forward (for validation)
# ----------------------------------------------------------------------------
def reference_forward(x, p):
    B, T, _ = x.shape
    H = p["whh0"].shape[1]

    def cell(inp, h, c, wih, whh, bih, bhh):
        g = inp @ wih.T + h @ whh.T + bih + bhh
        i = jax.nn.sigmoid(g[:, 0 * H:1 * H])
        f = jax.nn.sigmoid(g[:, 1 * H:2 * H])
        gg = jnp.tanh(g[:, 2 * H:3 * H])
        o = jax.nn.sigmoid(g[:, 3 * H:4 * H])
        c = f * c + i * gg
        h = o * jnp.tanh(c)
        return h, c

    h0 = c0 = h1 = c1 = jnp.zeros((B, H), jnp.float32)
    for t in range(T):
        h0, c0 = cell(x[:, t, :], h0, c0,
                      p["wih0"], p["whh0"], p["bih0"], p["bhh0"])
        h1, c1 = cell(h0, h1, c1,
                      p["wih1"], p["whh1"], p["bih1"], p["bhh1"])
    return (h1 @ p["fcw"].T + p["fcb"])[:, 0]


if __name__ == "__main__":
    # Small shapes consistent with the module: batch=2, seq=8, features=8,
    # hidden_size=64, num_layers=2, output_size=1.
    B, T, INPUT_SIZE, HIDDEN_SIZE, OUTPUT_SIZE = 2, 8, 8, 64, 1

    key = jax.random.PRNGKey(0)
    kx, kp = jax.random.split(key)
    x = jax.random.normal(kx, (B, T, INPUT_SIZE), jnp.float32)

    torch_params = init_torch_params(kp, INPUT_SIZE, HIDDEN_SIZE, OUTPUT_SIZE)
    kernel_params = pack_params(torch_params, HIDDEN_SIZE)

    y = lstm_model_forward(x, kernel_params)
    y = jax.block_until_ready(y)

    y_ref = reference_forward(x, torch_params)
    assert y.shape == (B,), y.shape
    # bf16 MXU inputs (f32 accumulate) vs pure-f32 reference -> relaxed tolerance.
    assert jnp.allclose(y, y_ref, atol=2e-2, rtol=2e-2), (y, y_ref)

    print("KERNEL_OK")
</pallas_src>

<mosaic_0001>
module attributes {stable_mosaic.version = 11 : i64} {
  func.func @_lstm_fc_kernel(%arg0: memref<16x8xbf16, #tpu.memory_space<vmem>>, %arg1: memref<8x512xbf16, #tpu.memory_space<vmem>>, %arg2: memref<128x512xbf16, #tpu.memory_space<vmem>>, %arg3: memref<1x512xf32, #tpu.memory_space<vmem>>, %arg4: memref<256x512xbf16, #tpu.memory_space<vmem>>, %arg5: memref<1x512xf32, #tpu.memory_space<vmem>>, %arg6: memref<128x1xf32, #tpu.memory_space<vmem>>, %arg7: memref<1x1xf32, #tpu.memory_space<vmem>>, %arg8: memref<2x1xf32, #tpu.memory_space<vmem>>) attributes {dimension_semantics = [], scalar_prefetch = 0 : i64, scratch_operands = 0 : i64, tpu.core_type = #tpu.core_type<tc>} {
    %c0 = arith.constant 0 : index
    %c0_0 = arith.constant 0 : index
    %0 = vector.load %arg0[%c0, %c0_0] : memref<16x8xbf16, #tpu.memory_space<vmem>>, vector<16x8xbf16>
    %c0_1 = arith.constant 0 : index
    %c0_2 = arith.constant 0 : index
    %1 = vector.load %arg1[%c0_1, %c0_2] : memref<8x512xbf16, #tpu.memory_space<vmem>>, vector<8x512xbf16>
    %cst = arith.constant dense<0.000000e+00> : vector<16x512xf32>
    %2 = tpu.matmul %0, %1, %cst {dimension_numbers = #tpu.dot_dimension_numbers<[1], [0], [0], [1], [0, 0, 1, 1], [], []>} : vector<16x8xbf16>, vector<8x512xbf16>, vector<16x512xf32> -> vector<16x512xf32>
    %c0_3 = arith.constant 0 : index
    %c0_4 = arith.constant 0 : index
    %3 = vector.load %arg3[%c0_3, %c0_4] : memref<1x512xf32, #tpu.memory_space<vmem>>, vector<1x512xf32>
    %4 = vector.broadcast %3 : vector<1x512xf32> to vector<16x512xf32>
    %5 = arith.addf %2, %4 : vector<16x512xf32>
    %c0_5 = arith.constant 0 : index
    %c0_6 = arith.constant 0 : index
    %6 = vector.load %arg2[%c0_5, %c0_6] : memref<128x512xbf16, #tpu.memory_space<vmem>>, vector<128x512xbf16>
    %c0_7 = arith.constant 0 : index
    %c0_8 = arith.constant 0 : index
    %7 = vector.load %arg4[%c0_7, %c0_8] : memref<256x512xbf16, #tpu.memory_space<vmem>>, vector<256x512xbf16>
    %c0_9 = arith.constant 0 : index
    %c0_10 = arith.constant 0 : index
    %8 = vector.load %arg5[%c0_9, %c0_10] : memref<1x512xf32, #tpu.memory_space<vmem>>, vector<1x512xf32>
    %9 = vector.shape_cast %8 : vector<1x512xf32> to vector<1x512xf32>
    %10 = vector.broadcast %9 : vector<1x512xf32> to vector<2x512xf32>
    %11 = vector.extract_strided_slice %5 {offsets = [0, 0], sizes = [2, 512], strides = [1, 1]} : vector<16x512xf32> to vector<2x512xf32>
    %12 = vector.extract_strided_slice %11 {offsets = [0, 0], sizes = [2, 128], strides = [1, 1]} : vector<2x512xf32> to vector<2x128xf32>
    %13 = arith.negf %12 : vector<2x128xf32>
    %14 = math.exp %13 : vector<2x128xf32>
    %cst_11 = arith.constant 1.000000e+00 : f32
    %15 = vector.broadcast %cst_11 : f32 to vector<2x128xf32>
    %16 = arith.addf %15, %14 : vector<2x128xf32>
    %17 = arith.divf %15, %16 : vector<2x128xf32>
    %18 = vector.extract_strided_slice %11 {offsets = [0, 256], sizes = [2, 128], strides = [1, 1]} : vector<2x512xf32> to vector<2x128xf32>
    %19 = math.tanh %18 : vector<2x128xf32>
    %20 = vector.extract_strided_slice %11 {offsets = [0, 384], sizes = [2, 128], strides = [1, 1]} : vector<2x512xf32> to vector<2x128xf32>
    %21 = arith.negf %20 : vector<2x128xf32>
    %22 = math.exp %21 : vector<2x128xf32>
    %cst_12 = arith.constant 1.000000e+00 : f32
    %23 = vector.broadcast %cst_12 : f32 to vector<2x128xf32>
    %24 = arith.addf %23, %22 : vector<2x128xf32>
    %25 = arith.divf %23, %24 : vector<2x128xf32>
    %26 = arith.mulf %17, %19 : vector<2x128xf32>
    %27 = math.tanh %26 : vector<2x128xf32>
    %28 = arith.mulf %25, %27 : vector<2x128xf32>
    %29 = arith.truncf %28 : vector<2x128xf32> to vector<2x128xbf16>
    %30 = vector.extract_strided_slice %7 {offsets = [0, 0], sizes = [128, 512], strides = [1, 1]} : vector<256x512xbf16> to vector<128x512xbf16>
    %cst_13 = arith.constant dense<0.000000e+00> : vector<2x512xf32>
    %31 = tpu.matmul %29, %30, %cst_13 {dimension_numbers = #tpu.dot_dimension_numbers<[1], [0], [0], [1], [0, 0, 1, 1], [], []>} : vector<2x128xbf16>, vector<128x512xbf16>, vector<2x512xf32> -> vector<2x512xf32>
    %32 = arith.addf %31, %10 : vector<2x512xf32>
    %33 = vector.extract_strided_slice %32 {offsets = [0, 0], sizes = [2, 128], strides = [1, 1]} : vector<2x512xf32> to vector<2x128xf32>
    %34 = arith.negf %33 : vector<2x128xf32>
    %35 = math.exp %34 : vector<2x128xf32>
    %cst_14 = arith.constant 1.000000e+00 : f32
    %36 = vector.broadcast %cst_14 : f32 to vector<2x128xf32>
    %37 = arith.addf %36, %35 : vector<2x128xf32>
    %38 = arith.divf %36, %37 : vector<2x128xf32>
    %39 = vector.extract_strided_slice %32 {offsets = [0, 256], sizes = [2, 128], strides = [1, 1]} : vector<2x512xf32> to vector<2x128xf32>
    %40 = math.tanh %39 : vector<2x128xf32>
    %41 = vector.extract_strided_slice %32 {offsets = [0, 384], sizes = [2, 128], strides = [1, 1]} : vector<2x512xf32> to vector<2x128xf32>
    %42 = arith.negf %41 : vector<2x128xf32>
    %43 = math.exp %42 : vector<2x128xf32>
    %cst_15 = arith.constant 1.000000e+00 : f32
    %44 = vector.broadcast %cst_15 : f32 to vector<2x128xf32>
    %45 = arith.addf %44, %43 : vector<2x128xf32>
    %46 = arith.divf %44, %45 : vector<2x128xf32>
    %47 = arith.mulf %38, %40 : vector<2x128xf32>
    %48 = math.tanh %47 : vector<2x128xf32>
    %49 = arith.mulf %46, %48 : vector<2x128xf32>
    %50 = vector.extract_strided_slice %5 {offsets = [2, 0], sizes = [2, 512], strides = [1, 1]} : vector<16x512xf32> to vector<2x512xf32>
    %51 = arith.truncf %28 : vector<2x128xf32> to vector<2x128xbf16>
    %cst_16 = arith.constant dense<0.000000e+00> : vector<2x512xf32>
    %52 = tpu.matmul %51, %6, %cst_16 {dimension_numbers = #tpu.dot_dimension_numbers<[1], [0], [0], [1], [0, 0, 1, 1], [], []>} : vector<2x128xbf16>, vector<128x512xbf16>, vector<2x512xf32> -> vector<2x512xf32>
    %53 = arith.addf %50, %52 : vector<2x512xf32>
    %54 = vector.extract_strided_slice %53 {offsets = [0, 0], sizes = [2, 128], strides = [1, 1]} : vector<2x512xf32> to vector<2x128xf32>
    %55 = arith.negf %54 : vector<2x128xf32>
    %56 = math.exp %55 : vector<2x128xf32>
    %cst_17 = arith.constant 1.000000e+00 : f32
    %57 = vector.broadcast %cst_17 : f32 to vector<2x128xf32>
    %58 = arith.addf %57, %56 : vector<2x128xf32>
    %59 = arith.divf %57, %58 : vector<2x128xf32>
    %60 = vector.extract_strided_slice %53 {offsets = [0, 256], sizes = [2, 128], strides = [1, 1]} : vector<2x512xf32> to vector<2x128xf32>
    %61 = math.tanh %60 : vector<2x128xf32>
    %62 = vector.extract_strided_slice %53 {offsets = [0, 384], sizes = [2, 128], strides = [1, 1]} : vector<2x512xf32> to vector<2x128xf32>
    %63 = arith.negf %62 : vector<2x128xf32>
    %64 = math.exp %63 : vector<2x128xf32>
    %cst_18 = arith.constant 1.000000e+00 : f32
    %65 = vector.broadcast %cst_18 : f32 to vector<2x128xf32>
    %66 = arith.addf %65, %64 : vector<2x128xf32>
    %67 = arith.divf %65, %66 : vector<2x128xf32>
    %68 = arith.mulf %59, %61 : vector<2x128xf32>
    %69 = vector.extract_strided_slice %53 {offsets = [0, 128], sizes = [2, 128], strides = [1, 1]} : vector<2x512xf32> to vector<2x128xf32>
    %70 = arith.negf %69 : vector<2x128xf32>
    %71 = math.exp %70 : vector<2x128xf32>
    %cst_19 = arith.constant 1.000000e+00 : f32
    %72 = vector.broadcast %cst_19 : f32 to vector<2x128xf32>
    %73 = arith.addf %72, %71 : vector<2x128xf32>
    %74 = arith.divf %72, %73 : vector<2x128xf32>
    %75 = arith.mulf %74, %26 : vector<2x128xf32>
    %76 = arith.addf %75, %68 : vector<2x128xf32>
    %77 = math.tanh %76 : vector<2x128xf32>
    %78 = arith.mulf %67, %77 : vector<2x128xf32>
    %79 = tpu.concatenate %78, %49 in 1 : vector<2x128xf32>, vector<2x128xf32> -> vector<2x256xf32>
    %80 = arith.truncf %79 : vector<2x256xf32> to vector<2x256xbf16>
    %cst_20 = arith.constant dense<0.000000e+00> : vector<2x512xf32>
    %81 = tpu.matmul %80, %7, %cst_20 {dimension_numbers = #tpu.dot_dimension_numbers<[1], [0], [0], [1], [0, 0, 1, 1], [], []>} : vector<2x256xbf16>, vector<256x512xbf16>, vector<2x512xf32> -> vector<2x512xf32>
    %82 = arith.addf %81, %10 : vector<2x512xf32>
    %83 = vector.extract_strided_slice %82 {offsets = [0, 0], sizes = [2, 128], strides = [1, 1]} : vector<2x512xf32> to vector<2x128xf32>
    %84 = arith.negf %83 : vector<2x128xf32>
    %85 = math.exp %84 : vector<2x128xf32>
    %cst_21 = arith.constant 1.000000e+00 : f32
    %86 = vector.broadcast %cst_21 : f32 to vector<2x128xf32>
    %87 = arith.addf %86, %85 : vector<2x128xf32>
    %88 = arith.divf %86, %87 : vector<2x128xf32>
    %89 = vector.extract_strided_slice %82 {offsets = [0, 256], sizes = [2, 128], strides = [1, 1]} : vector<2x512xf32> to vector<2x128xf32>
    %90 = math.tanh %89 : vector<2x128xf32>
    %91 = vector.extract_strided_slice %82 {offsets = [0, 384], sizes = [2, 128], strides = [1, 1]} : vector<2x512xf32> to vector<2x128xf32>
    %92 = arith.negf %91 : vector<2x128xf32>
    %93 = math.exp %92 : vector<2x128xf32>
    %cst_22 = arith.constant 1.000000e+00 : f32
    %94 = vector.broadcast %cst_22 : f32 to vector<2x128xf32>
    %95 = arith.addf %94, %93 : vector<2x128xf32>
    %96 = arith.divf %94, %95 : vector<2x128xf32>
    %97 = arith.mulf %88, %90 : vector<2x128xf32>
    %98 = vector.extract_strided_slice %82 {offsets = [0, 128], sizes = [2, 128], strides = [1, 1]} : vector<2x512xf32> to vector<2x128xf32>
    %99 = arith.negf %98 : vector<2x128xf32>
    %100 = math.exp %99 : vector<2x128xf32>
    %cst_23 = arith.constant 1.000000e+00 : f32
    %101 = vector.broadcast %cst_23 : f32 to vector<2x128xf32>
    %102 = arith.addf %101, %100 : vector<2x128xf32>
    %103 = arith.divf %101, %102 : vector<2x128xf32>
    %104 = arith.mulf %103, %47 : vector<2x128xf32>
    %105 = arith.addf %104, %97 : vector<2x128xf32>
    %106 = math.tanh %105 : vector<2x128xf32>
    %107 = arith.mulf %96, %106 : vector<2x128xf32>
    %108 = vector.extract_strided_slice %5 {offsets = [4, 0], sizes = [2, 512], strides = [1, 1]} : vector<16x512xf32> to vector<2x512xf32>
    %109 = arith.truncf %78 : vector<2x128xf32> to vector<2x128xbf16>
    %cst_24 = arith.constant dense<0.000000e+00> : vector<2x512xf32>
    %110 = tpu.matmul %109, %6, %cst_24 {dimension_numbers = #tpu.dot_dimension_numbers<[1], [0], [0], [1], [0, 0, 1, 1], [], []>} : vector<2x128xbf16>, vector<128x512xbf16>, vector<2x512xf32> -> vector<2x512xf32>
    %111 = arith.addf %108, %110 : vector<2x512xf32>
    %112 = vector.extract_strided_slice %111 {offsets = [0, 0], sizes = [2, 128], strides = [1, 1]} : vector<2x512xf32> to vector<2x128xf32>
    %113 = arith.negf %112 : vector<2x128xf32>
    %114 = math.exp %113 : vector<2x128xf32>
    %cst_25 = arith.constant 1.000000e+00 : f32
    %115 = vector.broadcast %cst_25 : f32 to vector<2x128xf32>
    %116 = arith.addf %115, %114 : vector<2x128xf32>
    %117 = arith.divf %115, %116 : vector<2x128xf32>
    %118 = vector.extract_strided_slice %111 {offsets = [0, 256], sizes = [2, 128], strides = [1, 1]} : vector<2x512xf32> to vector<2x128xf32>
    %119 = math.tanh %118 : vector<2x128xf32>
    %120 = vector.extract_strided_slice %111 {offsets = [0, 384], sizes = [2, 128], strides = [1, 1]} : vector<2x512xf32> to vector<2x128xf32>
    %121 = arith.negf %120 : vector<2x128xf32>
    %122 = math.exp %121 : vector<2x128xf32>
    %cst_26 = arith.constant 1.000000e+00 : f32
    %123 = vector.broadcast %cst_26 : f32 to vector<2x128xf32>
    %124 = arith.addf %123, %122 : vector<2x128xf32>
    %125 = arith.divf %123, %124 : vector<2x128xf32>
    %126 = arith.mulf %117, %119 : vector<2x128xf32>
    %127 = vector.extract_strided_slice %111 {offsets = [0, 128], sizes = [2, 128], strides = [1, 1]} : vector<2x512xf32> to vector<2x128xf32>
    %128 = arith.negf %127 : vector<2x128xf32>
    %129 = math.exp %128 : vector<2x128xf32>
    %cst_27 = arith.constant 1.000000e+00 : f32
    %130 = vector.broadcast %cst_27 : f32 to vector<2x128xf32>
    %131 = arith.addf %130, %129 : vector<2x128xf32>
    %132 = arith.divf %130, %131 : vector<2x128xf32>
    %133 = arith.mulf %132, %76 : vector<2x128xf32>
    %134 = arith.addf %133, %126 : vector<2x128xf32>
    %135 = math.tanh %134 : vector<2x128xf32>
    %136 = arith.mulf %125, %135 : vector<2x128xf32>
    %137 = tpu.concatenate %136, %107 in 1 : vector<2x128xf32>, vector<2x128xf32> -> vector<2x256xf32>
    %138 = arith.truncf %137 : vector<2x256xf32> to vector<2x256xbf16>
    %cst_28 = arith.constant dense<0.000000e+00> : vector<2x512xf32>
    %139 = tpu.matmul %138, %7, %cst_28 {dimension_numbers = #tpu.dot_dimension_numbers<[1], [0], [0], [1], [0, 0, 1, 1], [], []>} : vector<2x256xbf16>, vector<256x512xbf16>, vector<2x512xf32> -> vector<2x512xf32>
    %140 = arith.addf %139, %10 : vector<2x512xf32>
    %141 = vector.extract_strided_slice %140 {offsets = [0, 0], sizes = [2, 128], strides = [1, 1]} : vector<2x512xf32> to vector<2x128xf32>
    %142 = arith.negf %141 : vector<2x128xf32>
    %143 = math.exp %142 : vector<2x128xf32>
    %cst_29 = arith.constant 1.000000e+00 : f32
    %144 = vector.broadcast %cst_29 : f32 to vector<2x128xf32>
    %145 = arith.addf %144, %143 : vector<2x128xf32>
    %146 = arith.divf %144, %145 : vector<2x128xf32>
    %147 = vector.extract_strided_slice %140 {offsets = [0, 256], sizes = [2, 128], strides = [1, 1]} : vector<2x512xf32> to vector<2x128xf32>
    %148 = math.tanh %147 : vector<2x128xf32>
    %149 = vector.extract_strided_slice %140 {offsets = [0, 384], sizes = [2, 128], strides = [1, 1]} : vector<2x512xf32> to vector<2x128xf32>
    %150 = arith.negf %149 : vector<2x128xf32>
    %151 = math.exp %150 : vector<2x128xf32>
    %cst_30 = arith.constant 1.000000e+00 : f32
    %152 = vector.broadcast %cst_30 : f32 to vector<2x128xf32>
    %153 = arith.addf %152, %151 : vector<2x128xf32>
    %154 = arith.divf %152, %153 : vector<2x128xf32>
    %155 = arith.mulf %146, %148 : vector<2x128xf32>
    %156 = vector.extract_strided_slice %140 {offsets = [0, 128], sizes = [2, 128], strides = [1, 1]} : vector<2x512xf32> to vector<2x128xf32>
    %157 = arith.negf %156 : vector<2x128xf32>
    %158 = math.exp %157 : vector<2x128xf32>
    %cst_31 = arith.constant 1.000000e+00 : f32
    %159 = vector.broadcast %cst_31 : f32 to vector<2x128xf32>
    %160 = arith.addf %159, %158 : vector<2x128xf32>
    %161 = arith.divf %159, %160 : vector<2x128xf32>
    %162 = arith.mulf %161, %105 : vector<2x128xf32>
    %163 = arith.addf %162, %155 : vector<2x128xf32>
    %164 = math.tanh %163 : vector<2x128xf32>
    %165 = arith.mulf %154, %164 : vector<2x128xf32>
    %166 = vector.extract_strided_slice %5 {offsets = [6, 0], sizes = [2, 512], strides = [1, 1]} : vector<16x512xf32> to vector<2x512xf32>
    %167 = arith.truncf %136 : vector<2x128xf32> to vector<2x128xbf16>
    %cst_32 = arith.constant dense<0.000000e+00> : vector<2x512xf32>
    %168 = tpu.matmul %167, %6, %cst_32 {dimension_numbers = #tpu.dot_dimension_numbers<[1], [0], [0], [1], [0, 0, 1, 1], [], []>} : vector<2x128xbf16>, vector<128x512xbf16>, vector<2x512xf32> -> vector<2x512xf32>
    %169 = arith.addf %166, %168 : vector<2x512xf32>
    %170 = vector.extract_strided_slice %169 {offsets = [0, 0], sizes = [2, 128], strides = [1, 1]} : vector<2x512xf32> to vector<2x128xf32>
    %171 = arith.negf %170 : vector<2x128xf32>
    %172 = math.exp %171 : vector<2x128xf32>
    %cst_33 = arith.constant 1.000000e+00 : f32
    %173 = vector.broadcast %cst_33 : f32 to vector<2x128xf32>
    %174 = arith.addf %173, %172 : vector<2x128xf32>
    %175 = arith.divf %173, %174 : vector<2x128xf32>
    %176 = vector.extract_strided_slice %169 {offsets = [0, 256], sizes = [2, 128], strides = [1, 1]} : vector<2x512xf32> to vector<2x128xf32>
    %177 = math.tanh %176 : vector<2x128xf32>
    %178 = vector.extract_strided_slice %169 {offsets = [0, 384], sizes = [2, 128], strides = [1, 1]} : vector<2x512xf32> to vector<2x128xf32>
    %179 = arith.negf %178 : vector<2x128xf32>
    %180 = math.exp %179 : vector<2x128xf32>
    %cst_34 = arith.constant 1.000000e+00 : f32
    %181 = vector.broadcast %cst_34 : f32 to vector<2x128xf32>
    %182 = arith.addf %181, %180 : vector<2x128xf32>
    %183 = arith.divf %181, %182 : vector<2x128xf32>
    %184 = arith.mulf %175, %177 : vector<2x128xf32>
    %185 = vector.extract_strided_slice %169 {offsets = [0, 128], sizes = [2, 128], strides = [1, 1]} : vector<2x512xf32> to vector<2x128xf32>
    %186 = arith.negf %185 : vector<2x128xf32>
    %187 = math.exp %186 : vector<2x128xf32>
    %cst_35 = arith.constant 1.000000e+00 : f32
    %188 = vector.broadcast %cst_35 : f32 to vector<2x128xf32>
    %189 = arith.addf %188, %187 : vector<2x128xf32>
    %190 = arith.divf %188, %189 : vector<2x128xf32>
    %191 = arith.mulf %190, %134 : vector<2x128xf32>
    %192 = arith.addf %191, %184 : vector<2x128xf32>
    %193 = math.tanh %192 : vector<2x128xf32>
    %194 = arith.mulf %183, %193 : vector<2x128xf32>
    %195 = tpu.concatenate %194, %165 in 1 : vector<2x128xf32>, vector<2x128xf32> -> vector<2x256xf32>
    %196 = arith.truncf %195 : vector<2x256xf32> to vector<2x256xbf16>
    %cst_36 = arith.constant dense<0.000000e+00> : vector<2x512xf32>
    %197 = tpu.matmul %196, %7, %cst_36 {dimension_numbers = #tpu.dot_dimension_numbers<[1], [0], [0], [1], [0, 0, 1, 1], [], []>} : vector<2x256xbf16>, vector<256x512xbf16>, vector<2x512xf32> -> vector<2x512xf32>
    %198 = arith.addf %197, %10 : vector<2x512xf32>
    %199 = vector.extract_strided_slice %198 {offsets = [0, 0], sizes = [2, 128], strides = [1, 1]} : vector<2x512xf32> to vector<2x128xf32>
    %200 = arith.negf %199 : vector<2x128xf32>
    %201 = math.exp %200 : vector<2x128xf32>
    %cst_37 = arith.constant 1.000000e+00 : f32
    %202 = vector.broadcast %cst_37 : f32 to vector<2x128xf32>
    %203 = arith.addf %202, %201 : vector<2x128xf32>
    %204 = arith.divf %202, %203 : vector<2x128xf32>
    %205 = vector.extract_strided_slice %198 {offsets = [0, 256], sizes = [2, 128], strides = [1, 1]} : vector<2x512xf32> to vector<2x128xf32>
    %206 = math.tanh %205 : vector<2x128xf32>
    %207 = vector.extract_strided_slice %198 {offsets = [0, 384], sizes = [2, 128], strides = [1, 1]} : vector<2x512xf32> to vector<2x128xf32>
    %208 = arith.negf %207 : vector<2x128xf32>
    %209 = math.exp %208 : vector<2x128xf32>
    %cst_38 = arith.constant 1.000000e+00 : f32
    %210 = vector.broadcast %cst_38 : f32 to vector<2x128xf32>
    %211 = arith.addf %210, %209 : vector<2x128xf32>
    %212 = arith.divf %210, %211 : vector<2x128xf32>
    %213 = arith.mulf %204, %206 : vector<2x128xf32>
    %214 = vector.extract_strided_slice %198 {offsets = [0, 128], sizes = [2, 128], strides = [1, 1]} : vector<2x512xf32> to vector<2x128xf32>
    %215 = arith.negf %214 : vector<2x128xf32>
    %216 = math.exp %215 : vector<2x128xf32>
    %cst_39 = arith.constant 1.000000e+00 : f32
    %217 = vector.broadcast %cst_39 : f32 to vector<2x128xf32>
    %218 = arith.addf %217, %216 : vector<2x128xf32>
    %219 = arith.divf %217, %218 : vector<2x128xf32>
    %220 = arith.mulf %219, %163 : vector<2x128xf32>
    %221 = arith.addf %220, %213 : vector<2x128xf32>
    %222 = math.tanh %221 : vector<2x128xf32>
    %223 = arith.mulf %212, %222 : vector<2x128xf32>
    %224 = vector.extract_strided_slice %5 {offsets = [8, 0], sizes = [2, 512], strides = [1, 1]} : vector<16x512xf32> to vector<2x512xf32>
    %225 = arith.truncf %194 : vector<2x128xf32> to vector<2x128xbf16>
    %cst_40 = arith.constant dense<0.000000e+00> : vector<2x512xf32>
    %226 = tpu.matmul %225, %6, %cst_40 {dimension_numbers = #tpu.dot_dimension_numbers<[1], [0], [0], [1], [0, 0, 1, 1], [], []>} : vector<2x128xbf16>, vector<128x512xbf16>, vector<2x512xf32> -> vector<2x512xf32>
    %227 = arith.addf %224, %226 : vector<2x512xf32>
    %228 = vector.extract_strided_slice %227 {offsets = [0, 0], sizes = [2, 128], strides = [1, 1]} : vector<2x512xf32> to vector<2x128xf32>
    %229 = arith.negf %228 : vector<2x128xf32>
    %230 = math.exp %229 : vector<2x128xf32>
    %cst_41 = arith.constant 1.000000e+00 : f32
    %231 = vector.broadcast %cst_41 : f32 to vector<2x128xf32>
    %232 = arith.addf %231, %230 : vector<2x128xf32>
    %233 = arith.divf %231, %232 : vector<2x128xf32>
    %234 = vector.extract_strided_slice %227 {offsets = [0, 256], sizes = [2, 128], strides = [1, 1]} : vector<2x512xf32> to vector<2x128xf32>
    %235 = math.tanh %234 : vector<2x128xf32>
    %236 = vector.extract_strided_slice %227 {offsets = [0, 384], sizes = [2, 128], strides = [1, 1]} : vector<2x512xf32> to vector<2x128xf32>
    %237 = arith.negf %236 : vector<2x128xf32>
    %238 = math.exp %237 : vector<2x128xf32>
    %cst_42 = arith.constant 1.000000e+00 : f32
    %239 = vector.broadcast %cst_42 : f32 to vector<2x128xf32>
    %240 = arith.addf %239, %238 : vector<2x128xf32>
    %241 = arith.divf %239, %240 : vector<2x128xf32>
    %242 = arith.mulf %233, %235 : vector<2x128xf32>
    %243 = vector.extract_strided_slice %227 {offsets = [0, 128], sizes = [2, 128], strides = [1, 1]} : vector<2x512xf32> to vector<2x128xf32>
    %244 = arith.negf %243 : vector<2x128xf32>
    %245 = math.exp %244 : vector<2x128xf32>
    %cst_43 = arith.constant 1.000000e+00 : f32
    %246 = vector.broadcast %cst_43 : f32 to vector<2x128xf32>
    %247 = arith.addf %246, %245 : vector<2x128xf32>
    %248 = arith.divf %246, %247 : vector<2x128xf32>
    %249 = arith.mulf %248, %192 : vector<2x128xf32>
    %250 = arith.addf %249, %242 : vector<2x128xf32>
    %251 = math.tanh %250 : vector<2x128xf32>
    %252 = arith.mulf %241, %251 : vector<2x128xf32>
    %253 = tpu.concatenate %252, %223 in 1 : vector<2x128xf32>, vector<2x128xf32> -> vector<2x256xf32>
    %254 = arith.truncf %253 : vector<2x256xf32> to vector<2x256xbf16>
    %cst_44 = arith.constant dense<0.000000e+00> : vector<2x512xf32>
    %255 = tpu.matmul %254, %7, %cst_44 {dimension_numbers = #tpu.dot_dimension_numbers<[1], [0], [0], [1], [0, 0, 1, 1], [], []>} : vector<2x256xbf16>, vector<256x512xbf16>, vector<2x512xf32> -> vector<2x512xf32>
    %256 = arith.addf %255, %10 : vector<2x512xf32>
    %257 = vector.extract_strided_slice %256 {offsets = [0, 0], sizes = [2, 128], strides = [1, 1]} : vector<2x512xf32> to vector<2x128xf32>
    %258 = arith.negf %257 : vector<2x128xf32>
    %259 = math.exp %258 : vector<2x128xf32>
    %cst_45 = arith.constant 1.000000e+00 : f32
    %260 = vector.broadcast %cst_45 : f32 to vector<2x128xf32>
    %261 = arith.addf %260, %259 : vector<2x128xf32>
    %262 = arith.divf %260, %261 : vector<2x128xf32>
    %263 = vector.extract_strided_slice %256 {offsets = [0, 256], sizes = [2, 128], strides = [1, 1]} : vector<2x512xf32> to vector<2x128xf32>
    %264 = math.tanh %263 : vector<2x128xf32>
    %265 = vector.extract_strided_slice %256 {offsets = [0, 384], sizes = [2, 128], strides = [1, 1]} : vector<2x512xf32> to vector<2x128xf32>
    %266 = arith.negf %265 : vector<2x128xf32>
    %267 = math.exp %266 : vector<2x128xf32>
    %cst_46 = arith.constant 1.000000e+00 : f32
    %268 = vector.broadcast %cst_46 : f32 to vector<2x128xf32>
    %269 = arith.addf %268, %267 : vector<2x128xf32>
    %270 = arith.divf %268, %269 : vector<2x128xf32>
    %271 = arith.mulf %262, %264 : vector<2x128xf32>
    %272 = vector.extract_strided_slice %256 {offsets = [0, 128], sizes = [2, 128], strides = [1, 1]} : vector<2x512xf32> to vector<2x128xf32>
    %273 = arith.negf %272 : vector<2x128xf32>
    %274 = math.exp %273 : vector<2x128xf32>
    %cst_47 = arith.constant 1.000000e+00 : f32
    %275 = vector.broadcast %cst_47 : f32 to vector<2x128xf32>
    %276 = arith.addf %275, %274 : vector<2x128xf32>
    %277 = arith.divf %275, %276 : vector<2x128xf32>
    %278 = arith.mulf %277, %221 : vector<2x128xf32>
    %279 = arith.addf %278, %271 : vector<2x128xf32>
    %280 = math.tanh %279 : vector<2x128xf32>
    %281 = arith.mulf %270, %280 : vector<2x128xf32>
    %282 = vector.extract_strided_slice %5 {offsets = [10, 0], sizes = [2, 512], strides = [1, 1]} : vector<16x512xf32> to vector<2x512xf32>
    %283 = arith.truncf %252 : vector<2x128xf32> to vector<2x128xbf16>
    %cst_48 = arith.constant dense<0.000000e+00> : vector<2x512xf32>
    %284 = tpu.matmul %283, %6, %cst_48 {dimension_numbers = #tpu.dot_dimension_numbers<[1], [0], [0], [1], [0, 0, 1, 1], [], []>} : vector<2x128xbf16>, vector<128x512xbf16>, vector<2x512xf32> -> vector<2x512xf32>
    %285 = arith.addf %282, %284 : vector<2x512xf32>
    %286 = vector.extract_strided_slice %285 {offsets = [0, 0], sizes = [2, 128], strides = [1, 1]} : vector<2x512xf32> to vector<2x128xf32>
    %287 = arith.negf %286 : vector<2x128xf32>
    %288 = math.exp %287 : vector<2x128xf32>
    %cst_49 = arith.constant 1.000000e+00 : f32
    %289 = vector.broadcast %cst_49 : f32 to vector<2x128xf32>
    %290 = arith.addf %289, %288 : vector<2x128xf32>
    %291 = arith.divf %289, %290 : vector<2x128xf32>
    %292 = vector.extract_strided_slice %285 {offsets = [0, 256], sizes = [2, 128], strides = [1, 1]} : vector<2x512xf32> to vector<2x128xf32>
    %293 = math.tanh %292 : vector<2x128xf32>
    %294 = vector.extract_strided_slice %285 {offsets = [0, 384], sizes = [2, 128], strides = [1, 1]} : vector<2x512xf32> to vector<2x128xf32>
    %295 = arith.negf %294 : vector<2x128xf32>
    %296 = math.exp %295 : vector<2x128xf32>
    %cst_50 = arith.constant 1.000000e+00 : f32
    %297 = vector.broadcast %cst_50 : f32 to vector<2x128xf32>
    %298 = arith.addf %297, %296 : vector<2x128xf32>
    %299 = arith.divf %297, %298 : vector<2x128xf32>
    %300 = arith.mulf %291, %293 : vector<2x128xf32>
    %301 = vector.extract_strided_slice %285 {offsets = [0, 128], sizes = [2, 128], strides = [1, 1]} : vector<2x512xf32> to vector<2x128xf32>
    %302 = arith.negf %301 : vector<2x128xf32>
    %303 = math.exp %302 : vector<2x128xf32>
    %cst_51 = arith.constant 1.000000e+00 : f32
    %304 = vector.broadcast %cst_51 : f32 to vector<2x128xf32>
    %305 = arith.addf %304, %303 : vector<2x128xf32>
    %306 = arith.divf %304, %305 : vector<2x128xf32>
    %307 = arith.mulf %306, %250 : vector<2x128xf32>
    %308 = arith.addf %307, %300 : vector<2x128xf32>
    %309 = math.tanh %308 : vector<2x128xf32>
    %310 = arith.mulf %299, %309 : vector<2x128xf32>
    %311 = tpu.concatenate %310, %281 in 1 : vector<2x128xf32>, vector<2x128xf32> -> vector<2x256xf32>
    %312 = arith.truncf %311 : vector<2x256xf32> to vector<2x256xbf16>
    %cst_52 = arith.constant dense<0.000000e+00> : vector<2x512xf32>
    %313 = tpu.matmul %312, %7, %cst_52 {dimension_numbers = #tpu.dot_dimension_numbers<[1], [0], [0], [1], [0, 0, 1, 1], [], []>} : vector<2x256xbf16>, vector<256x512xbf16>, vector<2x512xf32> -> vector<2x512xf32>
    %314 = arith.addf %313, %10 : vector<2x512xf32>
    %315 = vector.extract_strided_slice %314 {offsets = [0, 0], sizes = [2, 128], strides = [1, 1]} : vector<2x512xf32> to vector<2x128xf32>
    %316 = arith.negf %315 : vector<2x128xf32>
    %317 = math.exp %316 : vector<2x128xf32>
    %cst_53 = arith.constant 1.000000e+00 : f32
    %318 = vector.broadcast %cst_53 : f32 to vector<2x128xf32>
    %319 = arith.addf %318, %317 : vector<2x128xf32>
    %320 = arith.divf %318, %319 : vector<2x128xf32>
    %321 = vector.extract_strided_slice %314 {offsets = [0, 256], sizes = [2, 128], strides = [1, 1]} : vector<2x512xf32> to vector<2x128xf32>
    %322 = math.tanh %321 : vector<2x128xf32>
    %323 = vector.extract_strided_slice %314 {offsets = [0, 384], sizes = [2, 128], strides = [1, 1]} : vector<2x512xf32> to vector<2x128xf32>
    %324 = arith.negf %323 : vector<2x128xf32>
    %325 = math.exp %324 : vector<2x128xf32>
    %cst_54 = arith.constant 1.000000e+00 : f32
    %326 = vector.broadcast %cst_54 : f32 to vector<2x128xf32>
    %327 = arith.addf %326, %325 : vector<2x128xf32>
    %328 = arith.divf %326, %327 : vector<2x128xf32>
    %329 = arith.mulf %320, %322 : vector<2x128xf32>
    %330 = vector.extract_strided_slice %314 {offsets = [0, 128], sizes = [2, 128], strides = [1, 1]} : vector<2x512xf32> to vector<2x128xf32>
    %331 = arith.negf %330 : vector<2x128xf32>
    %332 = math.exp %331 : vector<2x128xf32>
    %cst_55 = arith.constant 1.000000e+00 : f32
    %333 = vector.broadcast %cst_55 : f32 to vector<2x128xf32>
    %334 = arith.addf %333, %332 : vector<2x128xf32>
    %335 = arith.divf %333, %334 : vector<2x128xf32>
    %336 = arith.mulf %335, %279 : vector<2x128xf32>
    %337 = arith.addf %336, %329 : vector<2x128xf32>
    %338 = math.tanh %337 : vector<2x128xf32>
    %339 = arith.mulf %328, %338 : vector<2x128xf32>
    %340 = vector.extract_strided_slice %5 {offsets = [12, 0], sizes = [2, 512], strides = [1, 1]} : vector<16x512xf32> to vector<2x512xf32>
    %341 = arith.truncf %310 : vector<2x128xf32> to vector<2x128xbf16>
    %cst_56 = arith.constant dense<0.000000e+00> : vector<2x512xf32>
    %342 = tpu.matmul %341, %6, %cst_56 {dimension_numbers = #tpu.dot_dimension_numbers<[1], [0], [0], [1], [0, 0, 1, 1], [], []>} : vector<2x128xbf16>, vector<128x512xbf16>, vector<2x512xf32> -> vector<2x512xf32>
    %343 = arith.addf %340, %342 : vector<2x512xf32>
    %344 = vector.extract_strided_slice %343 {offsets = [0, 0], sizes = [2, 128], strides = [1, 1]} : vector<2x512xf32> to vector<2x128xf32>
    %345 = arith.negf %344 : vector<2x128xf32>
    %346 = math.exp %345 : vector<2x128xf32>
    %cst_57 = arith.constant 1.000000e+00 : f32
    %347 = vector.broadcast %cst_57 : f32 to vector<2x128xf32>
    %348 = arith.addf %347, %346 : vector<2x128xf32>
    %349 = arith.divf %347, %348 : vector<2x128xf32>
    %350 = vector.extract_strided_slice %343 {offsets = [0, 256], sizes = [2, 128], strides = [1, 1]} : vector<2x512xf32> to vector<2x128xf32>
    %351 = math.tanh %350 : vector<2x128xf32>
    %352 = vector.extract_strided_slice %343 {offsets = [0, 384], sizes = [2, 128], strides = [1, 1]} : vector<2x512xf32> to vector<2x128xf32>
    %353 = arith.negf %352 : vector<2x128xf32>
    %354 = math.exp %353 : vector<2x128xf32>
    %cst_58 = arith.constant 1.000000e+00 : f32
    %355 = vector.broadcast %cst_58 : f32 to vector<2x128xf32>
    %356 = arith.addf %355, %354 : vector<2x128xf32>
    %357 = arith.divf %355, %356 : vector<2x128xf32>
    %358 = arith.mulf %349, %351 : vector<2x128xf32>
    %359 = vector.extract_strided_slice %343 {offsets = [0, 128], sizes = [2, 128], strides = [1, 1]} : vector<2x512xf32> to vector<2x128xf32>
    %360 = arith.negf %359 : vector<2x128xf32>
    %361 = math.exp %360 : vector<2x128xf32>
    %cst_59 = arith.constant 1.000000e+00 : f32
    %362 = vector.broadcast %cst_59 : f32 to vector<2x128xf32>
    %363 = arith.addf %362, %361 : vector<2x128xf32>
    %364 = arith.divf %362, %363 : vector<2x128xf32>
    %365 = arith.mulf %364, %308 : vector<2x128xf32>
    %366 = arith.addf %365, %358 : vector<2x128xf32>
    %367 = math.tanh %366 : vector<2x128xf32>
    %368 = arith.mulf %357, %367 : vector<2x128xf32>
    %369 = tpu.concatenate %368, %339 in 1 : vector<2x128xf32>, vector<2x128xf32> -> vector<2x256xf32>
    %370 = arith.truncf %369 : vector<2x256xf32> to vector<2x256xbf16>
    %cst_60 = arith.constant dense<0.000000e+00> : vector<2x512xf32>
    %371 = tpu.matmul %370, %7, %cst_60 {dimension_numbers = #tpu.dot_dimension_numbers<[1], [0], [0], [1], [0, 0, 1, 1], [], []>} : vector<2x256xbf16>, vector<256x512xbf16>, vector<2x512xf32> -> vector<2x512xf32>
    %372 = arith.addf %371, %10 : vector<2x512xf32>
    %373 = vector.extract_strided_slice %372 {offsets = [0, 0], sizes = [2, 128], strides = [1, 1]} : vector<2x512xf32> to vector<2x128xf32>
    %374 = arith.negf %373 : vector<2x128xf32>
    %375 = math.exp %374 : vector<2x128xf32>
    %cst_61 = arith.constant 1.000000e+00 : f32
    %376 = vector.broadcast %cst_61 : f32 to vector<2x128xf32>
    %377 = arith.addf %376, %375 : vector<2x128xf32>
    %378 = arith.divf %376, %377 : vector<2x128xf32>
    %379 = vector.extract_strided_slice %372 {offsets = [0, 256], sizes = [2, 128], strides = [1, 1]} : vector<2x512xf32> to vector<2x128xf32>
    %380 = math.tanh %379 : vector<2x128xf32>
    %381 = vector.extract_strided_slice %372 {offsets = [0, 384], sizes = [2, 128], strides = [1, 1]} : vector<2x512xf32> to vector<2x128xf32>
    %382 = arith.negf %381 : vector<2x128xf32>
    %383 = math.exp %382 : vector<2x128xf32>
    %cst_62 = arith.constant 1.000000e+00 : f32
    %384 = vector.broadcast %cst_62 : f32 to vector<2x128xf32>
    %385 = arith.addf %384, %383 : vector<2x128xf32>
    %386 = arith.divf %384, %385 : vector<2x128xf32>
    %387 = arith.mulf %378, %380 : vector<2x128xf32>
    %388 = vector.extract_strided_slice %372 {offsets = [0, 128], sizes = [2, 128], strides = [1, 1]} : vector<2x512xf32> to vector<2x128xf32>
    %389 = arith.negf %388 : vector<2x128xf32>
    %390 = math.exp %389 : vector<2x128xf32>
    %cst_63 = arith.constant 1.000000e+00 : f32
    %391 = vector.broadcast %cst_63 : f32 to vector<2x128xf32>
    %392 = arith.addf %391, %390 : vector<2x128xf32>
    %393 = arith.divf %391, %392 : vector<2x128xf32>
    %394 = arith.mulf %393, %337 : vector<2x128xf32>
    %395 = arith.addf %394, %387 : vector<2x128xf32>
    %396 = math.tanh %395 : vector<2x128xf32>
    %397 = arith.mulf %386, %396 : vector<2x128xf32>
    %398 = vector.extract_strided_slice %5 {offsets = [14, 0], sizes = [2, 512], strides = [1, 1]} : vector<16x512xf32> to vector<2x512xf32>
    %399 = arith.truncf %368 : vector<2x128xf32> to vector<2x128xbf16>
    %cst_64 = arith.constant dense<0.000000e+00> : vector<2x512xf32>
    %400 = tpu.matmul %399, %6, %cst_64 {dimension_numbers = #tpu.dot_dimension_numbers<[1], [0], [0], [1], [0, 0, 1, 1], [], []>} : vector<2x128xbf16>, vector<128x512xbf16>, vector<2x512xf32> -> vector<2x512xf32>
    %401 = arith.addf %398, %400 : vector<2x512xf32>
    %402 = vector.extract_strided_slice %401 {offsets = [0, 0], sizes = [2, 128], strides = [1, 1]} : vector<2x512xf32> to vector<2x128xf32>
    %403 = arith.negf %402 : vector<2x128xf32>
    %404 = math.exp %403 : vector<2x128xf32>
    %cst_65 = arith.constant 1.000000e+00 : f32
    %405 = vector.broadcast %cst_65 : f32 to vector<2x128xf32>
    %406 = arith.addf %405, %404 : vector<2x128xf32>
    %407 = arith.divf %405, %406 : vector<2x128xf32>
    %408 = vector.extract_strided_slice %401 {offsets = [0, 256], sizes = [2, 128], strides = [1, 1]} : vector<2x512xf32> to vector<2x128xf32>
    %409 = math.tanh %408 : vector<2x128xf32>
    %410 = vector.extract_strided_slice %401 {offsets = [0, 384], sizes = [2, 128], strides = [1, 1]} : vector<2x512xf32> to vector<2x128xf32>
    %411 = arith.negf %410 : vector<2x128xf32>
    %412 = math.exp %411 : vector<2x128xf32>
    %cst_66 = arith.constant 1.000000e+00 : f32
    %413 = vector.broadcast %cst_66 : f32 to vector<2x128xf32>
    %414 = arith.addf %413, %412 : vector<2x128xf32>
    %415 = arith.divf %413, %414 : vector<2x128xf32>
    %416 = arith.mulf %407, %409 : vector<2x128xf32>
    %417 = vector.extract_strided_slice %401 {offsets = [0, 128], sizes = [2, 128], strides = [1, 1]} : vector<2x512xf32> to vector<2x128xf32>
    %418 = arith.negf %417 : vector<2x128xf32>
    %419 = math.exp %418 : vector<2x128xf32>
    %cst_67 = arith.constant 1.000000e+00 : f32
    %420 = vector.broadcast %cst_67 : f32 to vector<2x128xf32>
    %421 = arith.addf %420, %419 : vector<2x128xf32>
    %422 = arith.divf %420, %421 : vector<2x128xf32>
    %423 = arith.mulf %422, %366 : vector<2x128xf32>
    %424 = arith.addf %423, %416 : vector<2x128xf32>
    %425 = math.tanh %424 : vector<2x128xf32>
    %426 = arith.mulf %415, %425 : vector<2x128xf32>
    %427 = tpu.concatenate %426, %397 in 1 : vector<2x128xf32>, vector<2x128xf32> -> vector<2x256xf32>
    %428 = arith.truncf %427 : vector<2x256xf32> to vector<2x256xbf16>
    %cst_68 = arith.constant dense<0.000000e+00> : vector<2x512xf32>
    %429 = tpu.matmul %428, %7, %cst_68 {dimension_numbers = #tpu.dot_dimension_numbers<[1], [0], [0], [1], [0, 0, 1, 1], [], []>} : vector<2x256xbf16>, vector<256x512xbf16>, vector<2x512xf32> -> vector<2x512xf32>
    %430 = arith.addf %429, %10 : vector<2x512xf32>
    %431 = vector.extract_strided_slice %430 {offsets = [0, 0], sizes = [2, 128], strides = [1, 1]} : vector<2x512xf32> to vector<2x128xf32>
    %432 = arith.negf %431 : vector<2x128xf32>
    %433 = math.exp %432 : vector<2x128xf32>
    %cst_69 = arith.constant 1.000000e+00 : f32
    %434 = vector.broadcast %cst_69 : f32 to vector<2x128xf32>
    %435 = arith.addf %434, %433 : vector<2x128xf32>
    %436 = arith.divf %434, %435 : vector<2x128xf32>
    %437 = vector.extract_strided_slice %430 {offsets = [0, 256], sizes = [2, 128], strides = [1, 1]} : vector<2x512xf32> to vector<2x128xf32>
    %438 = math.tanh %437 : vector<2x128xf32>
    %439 = vector.extract_strided_slice %430 {offsets = [0, 384], sizes = [2, 128], strides = [1, 1]} : vector<2x512xf32> to vector<2x128xf32>
    %440 = arith.negf %439 : vector<2x128xf32>
    %441 = math.exp %440 : vector<2x128xf32>
    %cst_70 = arith.constant 1.000000e+00 : f32
    %442 = vector.broadcast %cst_70 : f32 to vector<2x128xf32>
    %443 = arith.addf %442, %441 : vector<2x128xf32>
    %444 = arith.divf %442, %443 : vector<2x128xf32>
    %445 = arith.mulf %436, %438 : vector<2x128xf32>
    %446 = vector.extract_strided_slice %430 {offsets = [0, 128], sizes = [2, 128], strides = [1, 1]} : vector<2x512xf32> to vector<2x128xf32>
    %447 = arith.negf %446 : vector<2x128xf32>
    %448 = math.exp %447 : vector<2x128xf32>
    %cst_71 = arith.constant 1.000000e+00 : f32
    %449 = vector.broadcast %cst_71 : f32 to vector<2x128xf32>
    %450 = arith.addf %449, %448 : vector<2x128xf32>
    %451 = arith.divf %449, %450 : vector<2x128xf32>
    %452 = arith.mulf %451, %395 : vector<2x128xf32>
    %453 = arith.addf %452, %445 : vector<2x128xf32>
    %454 = math.tanh %453 : vector<2x128xf32>
    %455 = arith.mulf %444, %454 : vector<2x128xf32>
    %c0_72 = arith.constant 0 : index
    %c0_73 = arith.constant 0 : index
    %456 = vector.load %arg6[%c0_72, %c0_73] : memref<128x1xf32, #tpu.memory_space<vmem>>, vector<128x1xf32>
    %cst_74 = arith.constant dense<0.000000e+00> : vector<2x1xf32>
    %457 = tpu.matmul %455, %456, %cst_74 {dimension_numbers = #tpu.dot_dimension_numbers<[1], [0], [0], [1], [0, 0, 1, 1], [], []>} : vector<2x128xf32>, vector<128x1xf32>, vector<2x1xf32> -> vector<2x1xf32>
    %c0_75 = arith.constant 0 : index
    %c0_76 = arith.constant 0 : index
    %458 = vector.load %arg7[%c0_75, %c0_76] : memref<1x1xf32, #tpu.memory_space<vmem>>, vector<1x1xf32>
    %459 = vector.broadcast %458 : vector<1x1xf32> to vector<2x1xf32>
    %460 = arith.addf %457, %459 : vector<2x1xf32>
    %c0_77 = arith.constant 0 : index
    %c0_78 = arith.constant 0 : index
    %461 = vector.load %arg8[%c0_77, %c0_78] : memref<2x1xf32, #tpu.memory_space<vmem>>, vector<2x1xf32>
    tpu.vector_store %arg8[%c0_77, %c0_78], %460 {strides = array<i32>} : memref<2x1xf32, #tpu.memory_space<vmem>>, vector<2x1xf32>,
    return
  }
}

</mosaic_0001>

<bundles_post_ra>
// kernel: lstm_model_forward.1
= control target key start
LH: loop header
LB: loop body
LE: loop exit
PB: predicated region body
PF: predicated region fallthrough
CT: control target
= control target key end

     0   :  { %s5010_s0 = inlined_call_operand.vmem [shape: bf16[16,8], index: 0, kind: input, shape index: {}]   ;;  %s5011_s1 = inlined_call_operand.vmem [shape: bf16[8,512], index: 1, kind: input, shape index: {}]   ;;  %s5012_s2 = inlined_call_operand.hbm [shape: bf16[128,512], index: 2, kind: input, shape index: {}]   ;;  %s5013_s3 = inlined_call_operand.vmem [shape: f32[1,512], index: 3, kind: input, shape index: {}]   ;;  %s5014_s4 = inlined_call_operand.hbm [shape: bf16[256,512], index: 4, kind: input, shape index: {}]   ;;  %s5015_s5 = inlined_call_operand.vmem [shape: f32[1,512], index: 5, kind: input, shape index: {}]   ;;  %s5016_s6 = inlined_call_operand.vmem [shape: f32[128,1], index: 6, kind: input, shape index: {}]   ;;  %s5017_s7 = inlined_call_operand.<no memory space> [shape: f32[1,1], index: 7, kind: input, shape index: {}]   ;;  %s5018_s8 = inlined_call_operand.vmem [shape: f32[2,1], index: 8, kind: output, shape index: {}]  }
   0x1   :  { %v13_v0 = vstv %s5017_s7 }
   0x2   :  { %14 = vst [vmem:[#allocation2] sm:$0x1] %v13_v0 }
   0x3   :  { %15 = vsyncpa [#allocation4], 0 }
   0x4   :  { %16 = vsyncpa [#allocation6], 0  ;;  %s3563_s29 = smov [#allocation3]   ;;  %s3515_s11 = scalar_lea.hbm %s5012_s2, 4096 }
   0x5   :  { %s26_s30 = sshll.u32 %s3563_s29, 4  ;;  %p3516_p0 = scmp.ne.s32.totalorder %s5012_s2, %s3515_s11  ;;  %s27_s30 = int_to_ptr.vmem [resolvable:$true] %s26_s30 }
   0x6   :  { %p3519_p1 = scmp.lt.u32.totalorder %s3515_s11, %s5012_s2 }
   0x8   :  { %p3521_p2 = pnand %p3519_p1, %p3516_p0 }
   0xa   :  { %3524 = shalt.err (!%p3521_p2)
}
   0xb   :  { %s3525_s7 = scalar_lea.vmem %s27_s30, 4096  ;;  %p3530_p4 = scmp.lt.s32.totalorder %s27_s30, %s27_s30 }
   0xc   :  { %p3526_p3 = scmp.ne.s32.totalorder %s27_s30, %s3525_s7  ;;  %p3531_p5 = scmp.lt.s32.totalorder %s3525_s7, %s3525_s7 }
   0xe   :  { %p3532_p6 = por %p3531_p5, %p3530_p4 }
  0x10   :  { %p3533_p7 = pnand %p3532_p6, %p3526_p3 }
  0x12   :  { %3536 = shalt.err (!%p3533_p7)
}
  0x13   :  { %s3564_s16 = smov 256   ;;  %s3565_s17 = smov 16  }
  0x14   :  { %32 = dma.hbm_to_vmem [thread:$0]  %s5012_s2, 4096, %s27_s30, [#allocation4], %s3564_s16, %s3564_s16, %s3565_s17  }
  0x15   :  { %s3566_s20 = smov [#allocation5]   ;;  %s3537_s24 = scalar_lea.hbm %s5014_s4, 8192 }
  0x16   :  { %s40_s21 = sshll.u32 %s3566_s20, 4  ;;  %p3538_p8 = scmp.ne.s32.totalorder %s5014_s4, %s3537_s24  ;;  %s41_s21 = int_to_ptr.vmem [resolvable:$true] %s40_s21 }
  0x17   :  { %p3541_p9 = scmp.lt.u32.totalorder %s3537_s24, %s5014_s4 }
  0x19   :  { %p3543_p10 = pnand %p3541_p9, %p3538_p8 }
  0x1b   :  { %3546 = shalt.err (!%p3543_p10)
}
  0x1c   :  { %s3547_s29 = scalar_lea.vmem %s41_s21, 8192  ;;  %p3552_p12 = scmp.lt.s32.totalorder %s41_s21, %s41_s21 }
  0x1d   :  { %p3548_p11 = scmp.ne.s32.totalorder %s41_s21, %s3547_s29  ;;  %p3553_p13 = scmp.lt.s32.totalorder %s3547_s29, %s3547_s29 }
  0x1f   :  { %p3554_p0 = por %p3553_p13, %p3552_p12 }
  0x21   :  { %p3555_p1 = pnand %p3554_p0, %p3548_p11 }
  0x23   :  { %3558 = shalt.err (!%p3555_p1)
}
  0x24   :  { %46 = dma.hbm_to_vmem [thread:$0]  %s5014_s4, 8192, %s41_s21, [#allocation6], %s3564_s16, %s3564_s16, %s3565_s17  }
  0x25   :  { %3559 = dma.done.wait [#allocation4], 4096  }
  0x26   :  { %3560 = vsyncadd [#allocation4], 4294963200 }
  0x27   :  { %3561 = dma.done.wait [#allocation6], 8192  }
  0x28   :  { %3562 = vsyncadd [#allocation6], 4294959104  ;;  %v5019_v1 = vmov 0   ;;  %v62_v2 = vld [vmem:[%s5011_s1] sm:$0xff]  ;;  %vm105_vm0 = vcmask 1043456   ;;  %v63_v6 = vld [vmem:[%s5011_s1 + $0x8] sm:$0xff]  ;;  %v66_v11 = vlaneseq }
  0x29   :  { %150 = vmatprep.mubr.bf16.mxu1 %v5019_v1  ;;  %531 = vmatprep.mubr.bf16.mxu0 %v5019_v1  ;;  %v2692_v3 = vcombine.high %v62_v2, %v62_v2  ;;  %v2691_v4 = vcombine.low %v62_v2, %v62_v2  ;;  %v2928_v5 = vld [vmem:[%s5010_s0] sm:$0xff]   ;;  %v2694_v7 = vcombine.high %v63_v6, %v63_v6  ;;  %vm101_vm1 = vcmask 64512   ;;  %v3664_v16 = vld [vmem:[#allocation5 + $0x8] ss:$16 sps:$4 sm:$0xff]  }
  0x2a   :  { %v2693_v8 = vcombine.low %v63_v6, %v63_v6  ;;  %v3656_v12 = vld [vmem:[#allocation5 + $0x4] ss:$16 sps:$4 sm:$0xff]   ;;  %v3658_v13 = vld [vmem:[#allocation5 + $0xc] ss:$16 sps:$4 sm:$0xff]   ;;  %v3660_v14 = vshrl.u32 %v66_v11, 7  ;;  %vm3569_vm2 = vmmov 0  }
  0x2b   :  { %2695 = vmatprep.subr.msk.bf16.mxu1 %vm105_vm0, %v2692_v3  ;;  %v107_v9 = vsel %vm105_vm0, %v2691_v4, 0  ;;  %v3662_v15 = vld [vmem:[#allocation5] ss:$16 sps:$4 sm:$0xff]   ;;  %499 = vmatprep.subr.bf16.mxu0 %v3656_v12  ;;  %v3670_v17 = vld [vmem:[#allocation5 + $0x24] ss:$16 sps:$4 sm:$0xff]   ;;  %vm2682_vm3 = vcmask 1024  }
  0x2c   :  { %119 = vmatpush1.bf16.msra.mxu1 %v107_v9  ;;  %v113_v10 = vsel %vm105_vm0, %v2693_v8, 0  ;;  %500 = vmatpush1.bf16.msra.mxu0 %v3662_v15  ;;  %v3672_v18 = vld [vmem:[#allocation5 + $0x2c] ss:$16 sps:$4 sm:$0xff]   ;;  %v72_v19 = vsub.s32 1, %v3660_v14  ;;  %v3675_v20 = vld [vmem:[#allocation5 + $0x20] ss:$16 sps:$4 sm:$0xff]  }
  0x2d   :  { %2697 = vmatprep.subr.msk.bf16.mxu1 %vm105_vm0, %v2694_v7  ;;  %v3677_v21 = vld [vmem:[#allocation5 + $0x28] ss:$16 sps:$4 sm:$0xff]   ;;  %v3682_v22 = vld [vmem:[%s5015_s5] sm:$0xf]  ;;  %501 = vmatprep.subr.bf16.mxu0 %v3670_v17  ;;  %v3693_v24 = vld [vmem:[#allocation5 + $0x44] ss:$16 sps:$4 sm:$0xff]  }
  0x2e   :  { %v3689_v23 = vrot.slane %v3682_v22, %v72_v19  ;;  %v3695_v25 = vld [vmem:[#allocation5 + $0x4c] ss:$16 sps:$4 sm:$0xff]   ;;  %v3697_v26 = vld [vmem:[#allocation5 + $0x40] ss:$16 sps:$4 sm:$0xff]   ;;  %v3699_v27 = vld [vmem:[#allocation5 + $0x48] ss:$16 sps:$4 sm:$0xff]  }
  0x2f   :  { %2696 = vmatmul.mubr.msk.bf16.vlgmr.msra.gmra.mrb[0].mxu1 %vm101_vm1, %v2928_v5  ;;  %v3705_v28 = vld [vmem:[#allocation5 + $0x64] ss:$16 sps:$4 sm:$0xff]   ;;  %v3707_v29 = vld [vmem:[#allocation5 + $0x6c] ss:$16 sps:$4 sm:$0xff]   ;;  %v3709_v30 = vld [vmem:[#allocation5 + $0x60] ss:$16 sps:$4 sm:$0xff]  }
  0x30   :  { %162 = vmatpush1.bf16.msra.mxu1 %v113_v10  ;;  %193 = vmatprep.mubr.bf16.mxu1 %v5019_v1  ;;  %5238 = vst [vmem:[#allocation9_spill] sm:$0xff] %v3689_v23  ;;  %v3711_v31 = vld [vmem:[#allocation5 + $0x68] ss:$16 sps:$4 sm:$0xff]   ;;  %v3717_v32 = vld [vmem:[#allocation5 + $0x84] ss:$16 sps:$4 sm:$0xff]   ;;  %v5023_v50 = vsub.s32 0, %v3660_v14 }
  0x31   :  { %539 = vmatprep.subr.bf16.mxu1 %v3658_v13  ;;  %502 = vmatpush1.bf16.msra.mxu0 %v3675_v20  ;;  %v3719_v33 = vld [vmem:[#allocation5 + $0x8c] ss:$16 sps:$4 sm:$0xff]   ;;  %v3721_v34 = vld [vmem:[#allocation5 + $0x80] ss:$16 sps:$4 sm:$0xff]   ;;  %v3723_v35 = vld [vmem:[#allocation5 + $0x88] ss:$16 sps:$4 sm:$0xff]  }
  0x32   :  { %503 = vmatprep.subr.bf16.mxu0 %v3693_v24  ;;  %5239 = vst [vmem:[#allocation10_spill] sm:$0xff] %v3721_v34  ;;  %5240 = vst [vmem:[#allocation11_spill] sm:$0xff] %v3723_v35  ;;  %v3727_v36 = vld [vmem:[#allocation5 + $0xa4] ss:$16 sps:$4 sm:$0xff]   ;;  %v3729_v37 = vld [vmem:[#allocation5 + $0xac] ss:$16 sps:$4 sm:$0xff]  }
  0x33   :  { %5241 = vst [vmem:[#allocation12_spill] sm:$0xff] %v3727_v36  ;;  %5242 = vst [vmem:[#allocation13_spill] sm:$0xff] %v3729_v37  ;;  %v3733_v38 = vld [vmem:[#allocation5 + $0xa0] ss:$16 sps:$4 sm:$0xff]   ;;  %v3735_v39 = vld [vmem:[#allocation5 + $0xa8] ss:$16 sps:$4 sm:$0xff]  }
  0x34   :  { %5243 = vst [vmem:[#allocation14_spill] sm:$0xff] %v3733_v38  ;;  %5244 = vst [vmem:[#allocation15_spill] sm:$0xff] %v3735_v39  ;;  %v3739_v40 = vld [vmem:[#allocation5 + $0xc4] ss:$16 sps:$4 sm:$0xff]   ;;  %v3741_v41 = vld [vmem:[#allocation5 + $0xcc] ss:$16 sps:$4 sm:$0xff]  }
  0x35   :  { %504 = vmatpush1.bf16.msra.mxu0 %v3697_v26  ;;  %5245 = vst [vmem:[#allocation16_spill] sm:$0xff] %v3739_v40  ;;  %5246 = vst [vmem:[#allocation17_spill] sm:$0xff] %v3741_v41  ;;  %v3745_v42 = vld [vmem:[#allocation5 + $0xc0] ss:$16 sps:$4 sm:$0xff]   ;;  %v3747_v43 = vld [vmem:[#allocation5 + $0xc8] ss:$16 sps:$4 sm:$0xff]  }
  0x36   :  { %505 = vmatprep.subr.bf16.mxu0 %v3705_v28  ;;  %5247 = vst [vmem:[#allocation18_spill] sm:$0xff] %v3745_v42  ;;  %5248 = vst [vmem:[#allocation19_spill] sm:$0xff] %v3747_v43  ;;  %v3751_v44 = vld [vmem:[#allocation5 + $0xe4] ss:$16 sps:$4 sm:$0xff]   ;;  %v3753_v45 = vld [vmem:[#allocation5 + $0xec] ss:$16 sps:$4 sm:$0xff]  }
  0x37   :  { %2698 = vmatmul.mubr.msk.bf16.vlgmr.msra.gmra.mrb[4].mxu1 %vm101_vm1, %v2928_v5  ;;  %5249 = vst [vmem:[#allocation20_spill] sm:$0xff] %v3751_v44  ;;  %5250 = vst [vmem:[#allocation21_spill] sm:$0xff] %v3753_v45  ;;  %v3757_v46 = vld [vmem:[#allocation5 + $0xe0] ss:$16 sps:$4 sm:$0xff]   ;;  %v3759_v47 = vld [vmem:[#allocation5 + $0xe8] ss:$16 sps:$4 sm:$0xff]  }
  0x38   :  { %571 = vmatprep.mubr.bf16.mxu1 %v5019_v1  ;;  %540 = vmatpush1.bf16.msra.mxu1 %v3664_v16  ;;  %5251 = vst [vmem:[#allocation22_spill] sm:$0xff] %v3757_v46  ;;  %5252 = vst [vmem:[#allocation23_spill] sm:$0xff] %v3759_v47  ;;  %v3763_v48 = vld [vmem:[#allocation3 + $0x4] ss:$16 sps:$4 sm:$0xff]   ;;  %v3765_v49 = vld [vmem:[#allocation3 + $0xc] ss:$16 sps:$4 sm:$0xff]  }
  0x39   :  { %541 = vmatprep.subr.bf16.mxu1 %v3672_v18  ;;  %506 = vmatpush1.bf16.msra.mxu0 %v3709_v30  ;;  %5253 = vst [vmem:[#allocation24_spill] sm:$0xff] %v3763_v48  ;;  %5254 = vst [vmem:[#allocation25_spill] sm:$0xff] %v3765_v49  ;;  %v64_v51 = vld [vmem:[%s5013_s3] sm:$0xf]  ;;  %v5022_v58 = vsub.s32 3, %v3660_v14  ;;  %v5021_v62 = vsub.s32 2, %v3660_v14 }
  0x3a   :  { %507 = vmatprep.subr.bf16.mxu0 %v3717_v32  ;;  %v69_v52 = vrot.slane %v64_v51, %v5023_v50  ;;  %v3783_v56 = vrot.slane %v64_v51, %v72_v19  ;;  %v3858_v50 = vld [vmem:[#allocation3 + $0x8c] ss:$16 sps:$4 sm:$0xff]   ;;  %v3874_v23 = vld [vmem:[#allocation3 + $0xa0] ss:$16 sps:$4 sm:$0xff]  }
  0x3b   :  { %v81_v0 = vrot.slane %v64_v51, %v5022_v58  ;;  %v77_v2 = vrot.slane %v64_v51, %v5021_v62  ;;  %v3852_v62 = vld [vmem:[#allocation3 + $0x68] ss:$16 sps:$4 sm:$0xff]   ;;  %v3856_v58 = vld [vmem:[#allocation3 + $0x84] ss:$16 sps:$4 sm:$0xff]   ;;  %5263 = vst [vmem:[#allocation34_spill] sm:$0xff] %v3858_v50  ;;  %5268 = vst [vmem:[#allocation39_spill] sm:$0xff] %v3874_v23 }
  0x3c   :  { %542 = vmatpush1.bf16.msra.mxu1 %v3677_v21  ;;  %5261 = vst [vmem:[#allocation32_spill] sm:$0xff] %v3852_v62  ;;  %5262 = vst [vmem:[#allocation33_spill] sm:$0xff] %v3856_v58 }
  0x3d   :  { %543 = vmatprep.subr.bf16.mxu1 %v3695_v25  ;;  %508 = vmatpush1.bf16.msra.mxu0 %v3721_v34 }
  0x3e   :  { %509 = vmatprep.subr.bf16.mxu0 %v3727_v36 }
  0x40   :  { %544 = vmatpush1.bf16.msra.mxu1 %v3699_v27 }
  0x41   :  { %545 = vmatprep.subr.bf16.mxu1 %v3707_v29  ;;  %510 = vmatpush1.bf16.msra.mxu0 %v3733_v38 }
  0x42   :  { %511 = vmatprep.subr.bf16.mxu0 %v3739_v40 }
  0x44   :  { %546 = vmatpush1.bf16.msra.mxu1 %v3711_v31 }
  0x45   :  { %547 = vmatprep.subr.bf16.mxu1 %v3719_v33  ;;  %512 = vmatpush1.bf16.msra.mxu0 %v3745_v42 }
  0x46   :  { %513 = vmatprep.subr.bf16.mxu0 %v3751_v44 }
  0x48   :  { %548 = vmatpush1.bf16.msra.mxu1 %v3723_v35 }
  0x49   :  { %549 = vmatprep.subr.bf16.mxu1 %v3729_v37  ;;  %514 = vmatpush1.bf16.msra.mxu0 %v3757_v46 }
  0x4a   :  { %756 = vmatprep.subr.bf16.mxu0 %v3763_v48 }
  0x4c   :  { %550 = vmatpush1.bf16.msra.mxu1 %v3735_v39 }
  0x4d   :  { %551 = vmatprep.subr.bf16.mxu1 %v3741_v41 }
  0x50   :  { %552 = vmatpush1.bf16.msra.mxu1 %v3747_v43 }
  0x51   :  { %553 = vmatprep.subr.bf16.mxu1 %v3753_v45 }
  0x54   :  { %554 = vmatpush1.bf16.msra.mxu1 %v3759_v47 }
  0x55   :  { %797 = vmatprep.subr.bf16.mxu1 %v3765_v49 }
 0x102   :  { %v152_v53 = vpop.f32.mrb[0].mxu1 }
 0x103   :  { %v3777_v54 = vadd.f32 %v152_v53, %v69_v52  ;;  %v3779_v55 = vpop.f32.mrb[1].mxu1 }
 0x104   :  { %v156_v57 = vpop.f32.mrb[2].mxu1 }
 0x105   :  { %5255 = vst [vmem:[#allocation26_spill] sm:$0xff] %v3777_v54  ;;  %v2699_v59 = vmul.f32 -1.442695, %v3777_v54  ;;  %v3787_v60 = vadd.f32 %v156_v57, %v69_v52  ;;  %v158_v61 = vpop.f32.mrb[3].mxu1 }
 0x106   :  { %v3791_v63 = vadd.f32 %v158_v61, %v3783_v56 }
 0x107   :  { %5256 = vst [vmem:[#allocation27_spill] sm:$0xff] %v3787_v60  ;;  %3075 = vpow2.f32 %v2699_v59  ;;  %v3870_v60 = vld [vmem:[#allocation3 + $0xac] ss:$16 sps:$4 sm:$0xff]  }
 0x108   :  { %5257 = vst [vmem:[#allocation28_spill] sm:$0xff] %v3791_v63  ;;  %v3868_v63 = vld [vmem:[#allocation3 + $0xa4] ss:$16 sps:$4 sm:$0xff]   ;;  %5267 = vst [vmem:[#allocation38_spill] sm:$0xff] %v3870_v60 }
 0x109   :  { %5266 = vst [vmem:[#allocation37_spill] sm:$0xff] %v3868_v63 }
 0x10a   :  { %v195_v3 = vpop.f32.mrb[4].mxu1 }
 0x10b   :  { %v197_v4 = vpop.f32.mrb[5].mxu1  ;;  %v3804_v11 = vadd.f32 %v195_v3, %v77_v2  ;;  %v3812_v3 = vld [vmem:[#allocation3 + $0x8] ss:$16 sps:$4 sm:$0xff]  }
 0x10c   :  { %v3797_v5 = vadd.f32 %v197_v4, %v81_v0  ;;  %v199_v6 = vpop.f32.mrb[6].mxu1 }
 0x10d   :  { %v3799_v7 = vadd.f32 %v199_v6, %v77_v2  ;;  %v201_v8 = vpop.f32.mrb[7].mxu1  ;;  %v3810_v2 = vld [vmem:[#allocation3] ss:$16 sps:$4 sm:$0xff]  }
 0x10e   :  { %v2700_v9 = vmul.f32 -1.442695, %v3797_v5  ;;  %v3802_v10 = vadd.f32 %v201_v8, %v81_v0 }
 0x10f   :  { %5258 = vst [vmem:[#allocation29_spill] sm:$0xff] %v3799_v7  ;;  %v3862_v7 = vld [vmem:[#allocation3 + $0x80] ss:$16 sps:$4 sm:$0xff]  }
 0x110   :  { %5259 = vst [vmem:[#allocation30_spill] sm:$0xff] %v3802_v10  ;;  %3077 = vpow2.f32 %v2700_v9  ;;  %v3816_v9 = vld [vmem:[#allocation3 + $0x24] ss:$16 sps:$4 sm:$0xff]   ;;  %5264 = vst [vmem:[#allocation35_spill] sm:$0xff] %v3862_v7  ;;  %v3864_v10 = vld [vmem:[#allocation3 + $0x88] ss:$16 sps:$4 sm:$0xff]  }
 0x111   :  { %v3076_v19 = vpop.eup %3075  ;;  %3079 = vtanh.f32 %v3804_v11  ;;  %5265 = vst [vmem:[#allocation36_spill] sm:$0xff] %v3864_v10 }
 0x112   :  { %v325_v52 = vadd.f32 1.0, %v3076_v19  ;;  %v3818_v19 = vld [vmem:[#allocation3 + $0x2c] ss:$16 sps:$4 sm:$0xff]  }
 0x114   :  { %3081 = vrcp.f32 %v325_v52  ;;  %v3824_v52 = vld [vmem:[#allocation3 + $0x20] ss:$16 sps:$4 sm:$0xff]  }
 0x11a   :  { %v3078_v51 = vpop.eup %3077 }
 0x11b   :  { %v332_v53 = vadd.f32 1.0, %v3078_v51  ;;  %v3080_v57 = vpop.eup %3079  ;;  %v3826_v51 = vld [vmem:[#allocation3 + $0x28] ss:$16 sps:$4 sm:$0xff]  }
 0x11d   :  { %3083 = vrcp.f32 %v332_v53  ;;  %v3830_v53 = vld [vmem:[#allocation3 + $0x44] ss:$16 sps:$4 sm:$0xff]  }
 0x11e   :  { %v3082_v59 = vpop.eup %3081 }
 0x11f   :  { %v3807_v61 = vmul.f32 %v3082_v59, %v3080_v57  ;;  %v3832_v57 = vld [vmem:[#allocation3 + $0x4c] ss:$16 sps:$4 sm:$0xff]   ;;  %v3838_v59 = vld [vmem:[#allocation3 + $0x40] ss:$16 sps:$4 sm:$0xff]  }
 0x121   :  { %3085 = vtanh.f32 %v3807_v61 }
 0x127   :  { %v3084_v4 = vpop.eup %3083 }
 0x12b   :  { %v3086_v0 = vpop.eup %3085 }
 0x12c   :  { %v337_v6 = vmul.f32 %v3086_v0, %v3084_v4  ;;  %v3840_v4 = vld [vmem:[#allocation3 + $0x48] ss:$16 sps:$4 sm:$0xff]   ;;  %v3844_v0 = vld [vmem:[#allocation3 + $0x64] ss:$16 sps:$4 sm:$0xff]  }
 0x12e   :  { %v3814_v8 = vpack.c.bf16 %v337_v6, %v337_v6  ;;  %v3846_v6 = vld [vmem:[#allocation3 + $0x6c] ss:$16 sps:$4 sm:$0xff]  }
 0x130   :  { %532 = vmatmul.mubr.bf16.vlgmr.msra.gmra.mrb[0].mxu0 %v3814_v8  ;;  %572 = vmatmul.mubr.bf16.vlgmr.msra.gmra.mrb[8].mxu1 %v3814_v8 }
 0x131   :  { %757 = vmatpush1.bf16.msra.mxu0 %v3810_v2  ;;  %798 = vmatpush1.bf16.msra.mxu1 %v3812_v3 }
 0x132   :  { %758 = vmatprep.subr.bf16.mxu0 %v3816_v9  ;;  %799 = vmatprep.subr.bf16.mxu1 %v3818_v19 }
 0x133   :  { %788 = vmatprep.mubr.bf16.mxu0 %v5019_v1  ;;  %829 = vmatprep.mubr.bf16.mxu1 %v5019_v1  ;;  %v3850_v1 = vld [vmem:[#allocation3 + $0x60] ss:$16 sps:$4 sm:$0xff]  }
 0x134   :  { %5260 = vst [vmem:[#allocation31_spill] sm:$0xff] %v3850_v1 }
 0x135   :  { %759 = vmatpush1.bf16.msra.mxu0 %v3824_v52  ;;  %800 = vmatpush1.bf16.msra.mxu1 %v3826_v51 }
 0x136   :  { %760 = vmatprep.subr.bf16.mxu0 %v3830_v53  ;;  %801 = vmatprep.subr.bf16.mxu1 %v3832_v57 }
 0x139   :  { %761 = vmatpush1.bf16.msra.mxu0 %v3838_v59  ;;  %802 = vmatpush1.bf16.msra.mxu1 %v3840_v4 }
 0x13a   :  { %762 = vmatprep.subr.bf16.mxu0 %v3844_v0  ;;  %803 = vmatprep.subr.bf16.mxu1 %v3846_v6 }
 0x13d   :  { %763 = vmatpush1.bf16.msra.mxu0 %v3850_v1  ;;  %804 = vmatpush1.bf16.msra.mxu1 %v3852_v62  ;;  %v3876_v1 = vld [vmem:[#allocation3 + $0xa8] ss:$16 sps:$4 sm:$0xff]   ;;  %v3880_v62 = vld [vmem:[#allocation3 + $0xc4] ss:$16 sps:$4 sm:$0xff]  }
 0x13e   :  { %764 = vmatprep.subr.bf16.mxu0 %v3856_v58  ;;  %805 = vmatprep.subr.bf16.mxu1 %v3858_v50  ;;  %v3882_v58 = vld [vmem:[#allocation3 + $0xcc] ss:$16 sps:$4 sm:$0xff]   ;;  %v3886_v50 = vld [vmem:[#allocation3 + $0xc0] ss:$16 sps:$4 sm:$0xff]  }
 0x141   :  { %765 = vmatpush1.bf16.msra.mxu0 %v3862_v7  ;;  %806 = vmatpush1.bf16.msra.mxu1 %v3864_v10  ;;  %v3888_v7 = vld [vmem:[#allocation3 + $0xc8] ss:$16 sps:$4 sm:$0xff]   ;;  %v3892_v10 = vld [vmem:[#allocation3 + $0xe4] ss:$16 sps:$4 sm:$0xff]  }
 0x142   :  { %766 = vmatprep.subr.bf16.mxu0 %v3868_v63  ;;  %807 = vmatprep.subr.bf16.mxu1 %v3870_v60  ;;  %v3894_v63 = vld [vmem:[#allocation3 + $0xec] ss:$16 sps:$4 sm:$0xff]   ;;  %v3898_v60 = vld [vmem:[#allocation3 + $0xe0] ss:$16 sps:$4 sm:$0xff]  }
 0x145   :  { %767 = vmatpush1.bf16.msra.mxu0 %v3874_v23  ;;  %808 = vmatpush1.bf16.msra.mxu1 %v3876_v1  ;;  %v3900_v23 = vld [vmem:[#allocation3 + $0xe8] ss:$16 sps:$4 sm:$0xff]  }
 0x146   :  { %768 = vmatprep.subr.bf16.mxu0 %v3880_v62  ;;  %809 = vmatprep.subr.bf16.mxu1 %v3882_v58 }
 0x149   :  { %769 = vmatpush1.bf16.msra.mxu0 %v3886_v50  ;;  %810 = vmatpush1.bf16.msra.mxu1 %v3888_v7 }
 0x14a   :  { %770 = vmatprep.subr.bf16.mxu0 %v3892_v10  ;;  %811 = vmatprep.subr.bf16.mxu1 %v3894_v63 }
 0x14d   :  { %771 = vmatpush1.bf16.msra.mxu0 %v3898_v60  ;;  %812 = vmatpush1.bf16.msra.mxu1 %v3900_v23 }
 0x14e   :  { %1052 = vmatprep.subr.bf16.mxu0 %v3656_v12  ;;  %1093 = vmatprep.subr.bf16.mxu1 %v3658_v13 }
 0x150   :  { %789 = vmatmul.mubr.bf16.vlgmr.msra.gmra.mrb[4].mxu0 %v3814_v8  ;;  %830 = vmatmul.mubr.bf16.vlgmr.msra.gmra.mrb[12].mxu1 %v3814_v8  ;;  %v3940_v8 = vld [vmem:[#allocation5 + $0x104] ss:$16 sps:$4 sm:$0xff]  }
 0x151   :  { %1053 = vmatpush1.bf16.msra.mxu0 %v3662_v15  ;;  %1094 = vmatpush1.bf16.msra.mxu1 %v3664_v16  ;;  %5269 = vst [vmem:[#allocation40_spill] sm:$0xff] %v3940_v8 }
 0x152   :  { %1054 = vmatprep.subr.bf16.mxu0 %v3670_v17  ;;  %1095 = vmatprep.subr.bf16.mxu1 %v3672_v18 }
 0x155   :  { %1055 = vmatpush1.bf16.msra.mxu0 %v3675_v20  ;;  %1096 = vmatpush1.bf16.msra.mxu1 %v3677_v21 }
 0x156   :  { %1056 = vmatprep.subr.bf16.mxu0 %v3693_v24  ;;  %1097 = vmatprep.subr.bf16.mxu1 %v3695_v25 }
 0x159   :  { %1057 = vmatpush1.bf16.msra.mxu0 %v3697_v26  ;;  %1098 = vmatpush1.bf16.msra.mxu1 %v3699_v27 }
 0x15a   :  { %1058 = vmatprep.subr.bf16.mxu0 %v3705_v28  ;;  %1099 = vmatprep.subr.bf16.mxu1 %v3707_v29 }
 0x15d   :  { %1059 = vmatpush1.bf16.msra.mxu0 %v3709_v30  ;;  %1100 = vmatpush1.bf16.msra.mxu1 %v3711_v31 }
 0x15e   :  { %1060 = vmatprep.subr.bf16.mxu0 %v3717_v32  ;;  %1101 = vmatprep.subr.bf16.mxu1 %v3719_v33 }
 0x161   :  { %1061 = vmatpush1.bf16.msra.mxu0 %v3721_v34  ;;  %1102 = vmatpush1.bf16.msra.mxu1 %v3723_v35 }
 0x162   :  { %1062 = vmatprep.subr.bf16.mxu0 %v3727_v36  ;;  %1103 = vmatprep.subr.bf16.mxu1 %v3729_v37  ;;  %v5305_v36 = vsub.s32 2, %v3660_v14 }
 0x164   :  { %v4053_v35 = vrot.slane %v3682_v22, %v5305_v36 }
 0x165   :  { %1063 = vmatpush1.bf16.msra.mxu0 %v3733_v38  ;;  %1104 = vmatpush1.bf16.msra.mxu1 %v3735_v39  ;;  %v3942_v38 = vld [vmem:[#allocation5 + $0x10c] ss:$16 sps:$4 sm:$0xff]   ;;  %v3944_v39 = vld [vmem:[#allocation5 + $0x100] ss:$16 sps:$4 sm:$0xff]  }
 0x166   :  { %1064 = vmatprep.subr.bf16.mxu0 %v3739_v40  ;;  %1105 = vmatprep.subr.bf16.mxu1 %v3741_v41  ;;  %5270 = vst [vmem:[#allocation41_spill] sm:$0xff] %v3942_v38  ;;  %5271 = vst [vmem:[#allocation42_spill] sm:$0xff] %v3944_v39  ;;  %v3946_v40 = vld [vmem:[#allocation5 + $0x108] ss:$16 sps:$4 sm:$0xff]  }
 0x167   :  { %5272 = vst [vmem:[#allocation43_spill] sm:$0xff] %v3946_v40  ;;  %5306 = vst [vmem:[#allocation74_spill] sm:$0xff] %v4053_v35 }
 0x169   :  { %1065 = vmatpush1.bf16.msra.mxu0 %v3745_v42  ;;  %1106 = vmatpush1.bf16.msra.mxu1 %v3747_v43  ;;  %v3996_v43 = vld [vmem:[#allocation5 + $0x1a4] ss:$16 sps:$4 sm:$0xff]   ;;  %v3998_v42 = vld [vmem:[#allocation5 + $0x1ac] ss:$16 sps:$4 sm:$0xff]  }
 0x16a   :  { %1066 = vmatprep.subr.bf16.mxu0 %v3751_v44  ;;  %1107 = vmatprep.subr.bf16.mxu1 %v3753_v45  ;;  %v3952_v45 = vld [vmem:[#allocation5 + $0x124] ss:$16 sps:$4 sm:$0xff]   ;;  %v3958_v44 = vld [vmem:[#allocation5 + $0x128] ss:$16 sps:$4 sm:$0xff]   ;;  %5289 = vst [vmem:[#allocation60_spill] sm:$0xff] %v3996_v43  ;;  %5290 = vst [vmem:[#allocation61_spill] sm:$0xff] %v3998_v42 }
 0x16b   :  { %5273 = vst [vmem:[#allocation44_spill] sm:$0xff] %v3952_v45  ;;  %5276 = vst [vmem:[#allocation47_spill] sm:$0xff] %v3958_v44 }
 0x16d   :  { %1067 = vmatpush1.bf16.msra.mxu0 %v3757_v46  ;;  %1108 = vmatpush1.bf16.msra.mxu1 %v3759_v47  ;;  %v3954_v46 = vld [vmem:[#allocation5 + $0x12c] ss:$16 sps:$4 sm:$0xff]   ;;  %v3956_v47 = vld [vmem:[#allocation5 + $0x120] ss:$16 sps:$4 sm:$0xff]  }
 0x16e   :  { %1068 = vmatprep.subr.bf16.mxu0 %v3940_v8  ;;  %1109 = vmatprep.subr.bf16.mxu1 %v3942_v38  ;;  %5274 = vst [vmem:[#allocation45_spill] sm:$0xff] %v3954_v46  ;;  %5275 = vst [vmem:[#allocation46_spill] sm:$0xff] %v3956_v47  ;;  %v3964_v38 = vld [vmem:[#allocation5 + $0x144] ss:$16 sps:$4 sm:$0xff]   ;;  %v3970_v8 = vld [vmem:[#allocation5 + $0x148] ss:$16 sps:$4 sm:$0xff]  }
 0x16f   :  { %5277 = vst [vmem:[#allocation48_spill] sm:$0xff] %v3964_v38  ;;  %5280 = vst [vmem:[#allocation51_spill] sm:$0xff] %v3970_v8 }
 0x171   :  { %1069 = vmatpush1.bf16.msra.mxu0 %v3944_v39  ;;  %1110 = vmatpush1.bf16.msra.mxu1 %v3946_v40  ;;  %v3966_v39 = vld [vmem:[#allocation5 + $0x14c] ss:$16 sps:$4 sm:$0xff]   ;;  %v3968_v40 = vld [vmem:[#allocation5 + $0x140] ss:$16 sps:$4 sm:$0xff]  }
 0x172   :  { %1070 = vmatprep.subr.bf16.mxu0 %v3952_v45  ;;  %1111 = vmatprep.subr.bf16.mxu1 %v3954_v46  ;;  %5278 = vst [vmem:[#allocation49_spill] sm:$0xff] %v3966_v39  ;;  %5279 = vst [vmem:[#allocation50_spill] sm:$0xff] %v3968_v40  ;;  %v3976_v46 = vld [vmem:[#allocation5 + $0x164] ss:$16 sps:$4 sm:$0xff]   ;;  %v3982_v45 = vld [vmem:[#allocation5 + $0x168] ss:$16 sps:$4 sm:$0xff]  }
 0x173   :  { %5281 = vst [vmem:[#allocation52_spill] sm:$0xff] %v3976_v46  ;;  %5284 = vst [vmem:[#allocation55_spill] sm:$0xff] %v3982_v45 }
 0x175   :  { %1071 = vmatpush1.bf16.msra.mxu0 %v3956_v47  ;;  %1112 = vmatpush1.bf16.msra.mxu1 %v3958_v44  ;;  %v3978_v47 = vld [vmem:[#allocation5 + $0x16c] ss:$16 sps:$4 sm:$0xff]   ;;  %v3980_v44 = vld [vmem:[#allocation5 + $0x160] ss:$16 sps:$4 sm:$0xff]  }
 0x176   :  { %1072 = vmatprep.subr.bf16.mxu0 %v3964_v38  ;;  %1113 = vmatprep.subr.bf16.mxu1 %v3966_v39  ;;  %5282 = vst [vmem:[#allocation53_spill] sm:$0xff] %v3978_v47  ;;  %5283 = vst [vmem:[#allocation54_spill] sm:$0xff] %v3980_v44  ;;  %v3988_v39 = vld [vmem:[#allocation5 + $0x184] ss:$16 sps:$4 sm:$0xff]   ;;  %v3994_v38 = vld [vmem:[#allocation5 + $0x188] ss:$16 sps:$4 sm:$0xff]  }
 0x177   :  { %5285 = vst [vmem:[#allocation56_spill] sm:$0xff] %v3988_v39  ;;  %5288 = vst [vmem:[#allocation59_spill] sm:$0xff] %v3994_v38 }
 0x179   :  { %1073 = vmatpush1.bf16.msra.mxu0 %v3968_v40  ;;  %1114 = vmatpush1.bf16.msra.mxu1 %v3970_v8  ;;  %v3990_v40 = vld [vmem:[#allocation5 + $0x18c] ss:$16 sps:$4 sm:$0xff]   ;;  %v3992_v8 = vld [vmem:[#allocation5 + $0x180] ss:$16 sps:$4 sm:$0xff]  }
 0x17a   :  { %1074 = vmatprep.subr.bf16.mxu0 %v3976_v46  ;;  %1115 = vmatprep.subr.bf16.mxu1 %v3978_v47  ;;  %5286 = vst [vmem:[#allocation57_spill] sm:$0xff] %v3990_v40  ;;  %5287 = vst [vmem:[#allocation58_spill] sm:$0xff] %v3992_v8  ;;  %v4010_v47 = vld [vmem:[#allocation5 + $0x1c4] ss:$16 sps:$4 sm:$0xff]   ;;  %v4012_v46 = vld [vmem:[#allocation5 + $0x1cc] ss:$16 sps:$4 sm:$0xff]  }
 0x17b   :  { %5293 = vst [vmem:[#allocation64_spill] sm:$0xff] %v4010_v47  ;;  %5294 = vst [vmem:[#allocation65_spill] sm:$0xff] %v4012_v46 }
 0x17d   :  { %1075 = vmatpush1.bf16.msra.mxu0 %v3980_v44  ;;  %1116 = vmatpush1.bf16.msra.mxu1 %v3982_v45  ;;  %v4004_v45 = vld [vmem:[#allocation5 + $0x1a0] ss:$16 sps:$4 sm:$0xff]   ;;  %v4006_v44 = vld [vmem:[#allocation5 + $0x1a8] ss:$16 sps:$4 sm:$0xff]  }
 0x17e   :  { %1076 = vmatprep.subr.bf16.mxu0 %v3988_v39  ;;  %1117 = vmatprep.subr.bf16.mxu1 %v3990_v40  ;;  %5291 = vst [vmem:[#allocation62_spill] sm:$0xff] %v4004_v45  ;;  %5292 = vst [vmem:[#allocation63_spill] sm:$0xff] %v4006_v44  ;;  %v4016_v40 = vld [vmem:[#allocation5 + $0x1c0] ss:$16 sps:$4 sm:$0xff]  }
 0x17f   :  { %5295 = vst [vmem:[#allocation66_spill] sm:$0xff] %v4016_v40 }
 0x181   :  { %1077 = vmatpush1.bf16.msra.mxu0 %v3992_v8  ;;  %1118 = vmatpush1.bf16.msra.mxu1 %v3994_v38  ;;  %v4018_v8 = vld [vmem:[#allocation5 + $0x1c8] ss:$16 sps:$4 sm:$0xff]   ;;  %v4022_v38 = vld [vmem:[#allocation5 + $0x1e4] ss:$16 sps:$4 sm:$0xff]  }
 0x182   :  { %1078 = vmatprep.subr.bf16.mxu0 %v3996_v43  ;;  %1119 = vmatprep.subr.bf16.mxu1 %v3998_v42  ;;  %5296 = vst [vmem:[#allocation67_spill] sm:$0xff] %v4018_v8  ;;  %5297 = vst [vmem:[#allocation68_spill] sm:$0xff] %v4022_v38  ;;  %v4024_v43 = vld [vmem:[#allocation5 + $0x1ec] ss:$16 sps:$4 sm:$0xff]   ;;  %v4028_v42 = vld [vmem:[#allocation5 + $0x1e0] ss:$16 sps:$4 sm:$0xff]  }
 0x183   :  { %5298 = vst [vmem:[#allocation69_spill] sm:$0xff] %v4024_v43  ;;  %5299 = vst [vmem:[#allocation70_spill] sm:$0xff] %v4028_v42 }
 0x185   :  { %1079 = vmatpush1.bf16.msra.mxu0 %v4004_v45  ;;  %1120 = vmatpush1.bf16.msra.mxu1 %v4006_v44  ;;  %v4030_v45 = vld [vmem:[#allocation5 + $0x1e8] ss:$16 sps:$4 sm:$0xff]   ;;  %v5303_v44 = vsub.s32 3, %v3660_v14 }
 0x186   :  { %1080 = vmatprep.subr.bf16.mxu0 %v4010_v47  ;;  %1121 = vmatprep.subr.bf16.mxu1 %v4012_v46  ;;  %5300 = vst [vmem:[#allocation71_spill] sm:$0xff] %v4030_v45 }
 0x189   :  { %1081 = vmatpush1.bf16.msra.mxu0 %v4016_v40  ;;  %1122 = vmatpush1.bf16.msra.mxu1 %v4018_v8  ;;  %v5301_v40 = vsub.s32 0, %v3660_v14 }
 0x18a   :  { %1082 = vmatprep.subr.bf16.mxu0 %v4022_v38  ;;  %1123 = vmatprep.subr.bf16.mxu1 %v4024_v43  ;;  %v4046_v38 = vrot.slane %v3682_v22, %v5303_v44 }
 0x18b   :  { %v4041_v8 = vrot.slane %v3682_v22, %v5301_v40 }
 0x18c   :  { %5304 = vst [vmem:[#allocation73_spill] sm:$0xff] %v4046_v38 }
 0x18d   :  { %1083 = vmatpush1.bf16.msra.mxu0 %v4028_v42  ;;  %1124 = vmatpush1.bf16.msra.mxu1 %v4030_v45  ;;  %5302 = vst [vmem:[#allocation72_spill] sm:$0xff] %v4041_v8 }
 0x18e   :  { %1158 = vmatprep.subr.bf16.mxu0 %v3763_v48  ;;  %1199 = vmatprep.subr.bf16.mxu1 %v3765_v49 }
 0x203   :  { %v533_v46 = vpop.f32.mrb[0].mxu0  ;;  %v573_v47 = vpop.f32.mrb[8].mxu1 }
 0x204   :  { %v534_v42 = vadd.f32 %v533_v46, %v4041_v8  ;;  %v535_v43 = vpop.f32.mrb[1].mxu0  ;;  %v575_v45 = vpop.f32.mrb[9].mxu1  ;;  %v574_v44 = vadd.f32 %v573_v47, %v4053_v35 }
 0x205   :  { %v536_v39 = vpop.f32.mrb[2].mxu0  ;;  %v577_v48 = vpop.f32.mrb[10].mxu1  ;;  %v576_v40 = vadd.f32 %v575_v45, %v4046_v38 }
 0x206   :  { %v2733_v41 = vmul.f32 -1.442695, %v534_v42  ;;  %v537_v49 = vpop.f32.mrb[3].mxu0  ;;  %v578_v37 = vpop.f32.mrb[11].mxu1 }
 0x207   :  { %v2734_v34 = vmul.f32 -1.442695, %v576_v40 }
 0x208   :  { %3087 = vpow2.f32 %v2733_v41 }
 0x209   :  { %3089 = vpow2.f32 %v2734_v34  ;;  %v4061_v34 = vadd.f32 %v3779_v55, %v3783_v56 }
 0x20a   :  { %3091 = vtanh.f32 %v574_v44 }
 0x212   :  { %v3088_v46 = vpop.eup %3087 }
 0x213   :  { %v583_v43 = vadd.f32 1.0, %v3088_v46  ;;  %v3090_v39 = vpop.eup %3089 }
 0x214   :  { %v590_v42 = vadd.f32 1.0, %v3090_v39  ;;  %v3092_v48 = vpop.eup %3091 }
 0x215   :  { %3093 = vrcp.f32 %v583_v43 }
 0x216   :  { %3095 = vrcp.f32 %v590_v42 }
 0x21f   :  { %v3094_v37 = vpop.eup %3093 }
 0x220   :  { %v4056_v41 = vmul.f32 %v3094_v37, %v3092_v48 }
 0x222   :  { %5307 = vst [vmem:[#allocation75_spill] sm:$0xff] %v4056_v41  ;;  %3097 = vtanh.f32 %v4056_v41 }
 0x223   :  { %v790_v14 = vpop.f32.mrb[4].mxu0  ;;  %v831_v22 = vpop.f32.mrb[12].mxu1 }
 0x224   :  { %v842_v36 = vrot.slane %v790_v14, 6  ;;  %v792_v45 = vpop.f32.mrb[5].mxu0  ;;  %v833_v49 = vpop.f32.mrb[13].mxu1  ;;  %v844_v56 = vrot.slane %v831_v22, 6  ;;  %v875_v22 = vrot.slane %v3807_v61, 6  ;;  %v5308_v61 = vmov 0  }
 0x225   :  { %v843_v47 = vrot.slane %v792_v45, 6  ;;  %v794_v40 = vpop.f32.mrb[6].mxu0  ;;  %v835_v44 = vpop.f32.mrb[14].mxu1  ;;  %v845_v41 = vrot.slane %v833_v49, 6 }
 0x226   :  { %v850_v46 = vadd.f32 %v842_v36, %v3777_v54  ;;  %v795_v43 = vpop.f32.mrb[7].mxu0  ;;  %v836_v39 = vpop.f32.mrb[15].mxu1  ;;  %v852_v36 = vadd.f32 %v844_v56, %v3804_v11 }
 0x227   :  { %v851_v42 = vadd.f32 %v843_v47, %v4061_v34  ;;  %v3096_v14 = vpop.eup %3095  ;;  %v853_v38 = vadd.f32 %v845_v41, %v3797_v5 }
 0x228   :  { %v2767_v48 = vmul.f32 -1.442695, %v850_v46 }
 0x229   :  { %v2769_v37 = vmul.f32 -1.442695, %v851_v42  ;;  %v2768_v40 = vmul.f32 -1.442695, %v853_v38 }
 0x22a   :  { %3099 = vpow2.f32 %v2767_v48 }
 0x22b   :  { %3101 = vpow2.f32 %v2769_v37 }
 0x22c   :  { %v3098_v35 = vpop.eup %3097  ;;  %3103 = vpow2.f32 %v2768_v40 }
 0x22d   :  { %v595_v55 = vmul.f32 %v3098_v35, %v3096_v14  ;;  %3105 = vtanh.f32 %v852_v36  ;;  %v5310_v36 = vld [vmem:[#allocation32_spill] sm:$0xff] }
 0x22f   :  { %v882_v45 = vrot.slane %v595_v55, 6 }
 0x231   :  { %v885_v44 = vpack.c.bf16 %v882_v45, %v882_v45 }
 0x233   :  { %v889_v43 = vrot.slane %v885_v44, 1  ;;  %v5309_v44 = vld [vmem:[#allocation31_spill] sm:$0xff] }
 0x234   :  { %v3100_v39 = vpop.eup %3099 }
 0x235   :  { %v3102_v54 = vpop.eup %3101  ;;  %v857_v47 = vadd.f32 1.0, %v3100_v39  ;;  %1084 = vmatprep.mubr.bf16.mxu0 %v889_v43  ;;  %1125 = vmatprep.mubr.bf16.mxu1 %v889_v43  ;;  %v5311_v43 = vld [vmem:[#allocation33_spill] sm:$0xff]  ;;  %v5312_v39 = vld [vmem:[#allocation34_spill] sm:$0xff] }
 0x236   :  { %v871_v49 = vadd.f32 1.0, %v3102_v54  ;;  %v3104_v46 = vpop.eup %3103 }
 0x237   :  { %3107 = vrcp.f32 %v857_v47  ;;  %v3106_v41 = vpop.eup %3105  ;;  %v864_v48 = vadd.f32 1.0, %v3104_v46  ;;  %v5313_v47 = vld [vmem:[#allocation35_spill] sm:$0xff]  ;;  %v5315_v46 = vld [vmem:[#allocation37_spill] sm:$0xff] }
 0x238   :  { %3109 = vrcp.f32 %v871_v49  ;;  %v5314_v49 = vld [vmem:[#allocation36_spill] sm:$0xff] }
 0x239   :  { %3111 = vrcp.f32 %v864_v48  ;;  %v5339_v48 = vld [vmem:[#allocation47_spill] sm:$0xff] }
 0x241   :  { %v3108_v35 = vpop.eup %3107 }
 0x242   :  { %v3110_v38 = vpop.eup %3109  ;;  %v867_v42 = vmul.f32 %v3108_v35, %v3106_v41  ;;  %v5316_v41 = vld [vmem:[#allocation38_spill] sm:$0xff]  ;;  %v5317_v35 = vld [vmem:[#allocation39_spill] sm:$0xff] }
 0x243   :  { %v877_v37 = vmul.f32 %v3110_v38, %v875_v22  ;;  %v3112_v55 = vpop.eup %3111  ;;  %v5336_v22 = vld [vmem:[#allocation44_spill] sm:$0xff]  ;;  %v5337_v38 = vld [vmem:[#allocation45_spill] sm:$0xff] }
 0x245   :  { %v4068_v14 = vadd.f32 %v877_v37, %v867_v42  ;;  %v5338_v42 = vld [vmem:[#allocation46_spill] sm:$0xff]  ;;  %v5340_v37 = vld [vmem:[#allocation48_spill] sm:$0xff] }
 0x247   :  { %3113 = vtanh.f32 %v4068_v14 }
 0x251   :  { %v3114_v56 = vpop.eup %3113 }
 0x252   :  { %v880_v45 = vmul.f32 %v3114_v56, %v3112_v55  ;;  %v5341_v55 = vld [vmem:[#allocation49_spill] sm:$0xff]  ;;  %v5342_v56 = vld [vmem:[#allocation50_spill] sm:$0xff] }
 0x254   :  { %v884_v54 = vpack.c.bf16 %v880_v45, %v880_v45  ;;  %v5343_v45 = vld [vmem:[#allocation51_spill] sm:$0xff] }
 0x256   :  { %v888_v40 = vrot.slane %v884_v54, 1  ;;  %v5344_v54 = vld [vmem:[#allocation52_spill] sm:$0xff] }
 0x258   :  { %1085 = vmatmul.mubr.bf16.vlgmr.msra.gmra.mrb[8].mxu0 %v888_v40  ;;  %1126 = vmatmul.mubr.bf16.vlgmr.msra.gmra.mrb[16].mxu1 %v888_v40 }
 0x259   :  { %1159 = vmatpush1.bf16.msra.mxu0 %v3810_v2  ;;  %1200 = vmatpush1.bf16.msra.mxu1 %v3812_v3 }
 0x25a   :  { %1160 = vmatprep.subr.bf16.mxu0 %v3816_v9  ;;  %1201 = vmatprep.subr.bf16.mxu1 %v3818_v19 }
 0x25b   :  { %1190 = vmatprep.mubr.bf16.mxu0 %v5308_v61  ;;  %1231 = vmatprep.mubr.bf16.mxu1 %v5308_v61 }
 0x25d   :  { %1161 = vmatpush1.bf16.msra.mxu0 %v3824_v52  ;;  %1202 = vmatpush1.bf16.msra.mxu1 %v3826_v51 }
 0x25e   :  { %1162 = vmatprep.subr.bf16.mxu0 %v3830_v53  ;;  %1203 = vmatprep.subr.bf16.mxu1 %v3832_v57 }
 0x261   :  { %1163 = vmatpush1.bf16.msra.mxu0 %v3838_v59  ;;  %1204 = vmatpush1.bf16.msra.mxu1 %v3840_v4 }
 0x262   :  { %1164 = vmatprep.subr.bf16.mxu0 %v3844_v0  ;;  %1205 = vmatprep.subr.bf16.mxu1 %v3846_v6 }
 0x265   :  { %1165 = vmatpush1.bf16.msra.mxu0 %v5309_v44  ;;  %1206 = vmatpush1.bf16.msra.mxu1 %v5310_v36 }
 0x266   :  { %1166 = vmatprep.subr.bf16.mxu0 %v5311_v43  ;;  %1207 = vmatprep.subr.bf16.mxu1 %v5312_v39 }
 0x269   :  { %1167 = vmatpush1.bf16.msra.mxu0 %v5313_v47  ;;  %1208 = vmatpush1.bf16.msra.mxu1 %v5314_v49 }
 0x26a   :  { %1168 = vmatprep.subr.bf16.mxu0 %v5315_v46  ;;  %1209 = vmatprep.subr.bf16.mxu1 %v5316_v41 }
 0x26d   :  { %1169 = vmatpush1.bf16.msra.mxu0 %v5317_v35  ;;  %1210 = vmatpush1.bf16.msra.mxu1 %v3876_v1 }
 0x26e   :  { %1170 = vmatprep.subr.bf16.mxu0 %v3880_v62  ;;  %1211 = vmatprep.subr.bf16.mxu1 %v3882_v58 }
 0x271   :  { %1171 = vmatpush1.bf16.msra.mxu0 %v3886_v50  ;;  %1212 = vmatpush1.bf16.msra.mxu1 %v3888_v7 }
 0x272   :  { %1172 = vmatprep.subr.bf16.mxu0 %v3892_v10  ;;  %1213 = vmatprep.subr.bf16.mxu1 %v3894_v63 }
 0x275   :  { %1173 = vmatpush1.bf16.msra.mxu0 %v3898_v60  ;;  %1214 = vmatpush1.bf16.msra.mxu1 %v3900_v23 }
 0x276   :  { %1294 = vmatprep.subr.bf16.mxu0 %v3656_v12  ;;  %1335 = vmatprep.subr.bf16.mxu1 %v3658_v13  ;;  %v5318_v12 = vld [vmem:[#allocation10_spill] sm:$0xff]  ;;  %v5319_v13 = vld [vmem:[#allocation11_spill] sm:$0xff] }
 0x278   :  { %1191 = vmatmul.mubr.bf16.vlgmr.msra.gmra.mrb[12].mxu0 %v888_v40  ;;  %1232 = vmatmul.mubr.bf16.vlgmr.msra.gmra.mrb[20].mxu1 %v888_v40  ;;  %v5345_v40 = vld [vmem:[#allocation53_spill] sm:$0xff] }
 0x279   :  { %1295 = vmatpush1.bf16.msra.mxu0 %v3662_v15  ;;  %1336 = vmatpush1.bf16.msra.mxu1 %v3664_v16  ;;  %v5320_v15 = vld [vmem:[#allocation12_spill] sm:$0xff]  ;;  %v5321_v16 = vld [vmem:[#allocation13_spill] sm:$0xff] }
 0x27a   :  { %1296 = vmatprep.subr.bf16.mxu0 %v3670_v17  ;;  %1337 = vmatprep.subr.bf16.mxu1 %v3672_v18  ;;  %v5322_v17 = vld [vmem:[#allocation14_spill] sm:$0xff]  ;;  %v5323_v18 = vld [vmem:[#allocation15_spill] sm:$0xff] }
 0x27d   :  { %1297 = vmatpush1.bf16.msra.mxu0 %v3675_v20  ;;  %1338 = vmatpush1.bf16.msra.mxu1 %v3677_v21  ;;  %v5324_v20 = vld [vmem:[#allocation16_spill] sm:$0xff]  ;;  %v5325_v21 = vld [vmem:[#allocation17_spill] sm:$0xff] }
 0x27e   :  { %1298 = vmatprep.subr.bf16.mxu0 %v3693_v24  ;;  %1339 = vmatprep.subr.bf16.mxu1 %v3695_v25  ;;  %v5326_v24 = vld [vmem:[#allocation18_spill] sm:$0xff]  ;;  %v5327_v25 = vld [vmem:[#allocation19_spill] sm:$0xff] }
 0x281   :  { %1299 = vmatpush1.bf16.msra.mxu0 %v3697_v26  ;;  %1340 = vmatpush1.bf16.msra.mxu1 %v3699_v27  ;;  %v5328_v26 = vld [vmem:[#allocation20_spill] sm:$0xff]  ;;  %v5329_v27 = vld [vmem:[#allocation21_spill] sm:$0xff] }
 0x282   :  { %1300 = vmatprep.subr.bf16.mxu0 %v3705_v28  ;;  %1341 = vmatprep.subr.bf16.mxu1 %v3707_v29  ;;  %v5330_v28 = vld [vmem:[#allocation22_spill] sm:$0xff]  ;;  %v5331_v29 = vld [vmem:[#allocation23_spill] sm:$0xff] }
 0x285   :  { %1301 = vmatpush1.bf16.msra.mxu0 %v3709_v30  ;;  %1342 = vmatpush1.bf16.msra.mxu1 %v3711_v31  ;;  %v5332_v30 = vld [vmem:[#allocation40_spill] sm:$0xff]  ;;  %v5333_v31 = vld [vmem:[#allocation41_spill] sm:$0xff] }
 0x286   :  { %1302 = vmatprep.subr.bf16.mxu0 %v3717_v32  ;;  %1343 = vmatprep.subr.bf16.mxu1 %v3719_v33  ;;  %v5334_v32 = vld [vmem:[#allocation42_spill] sm:$0xff]  ;;  %v5335_v33 = vld [vmem:[#allocation43_spill] sm:$0xff] }
 0x289   :  { %1303 = vmatpush1.bf16.msra.mxu0 %v5318_v12  ;;  %1344 = vmatpush1.bf16.msra.mxu1 %v5319_v13  ;;  %v5346_v12 = vld [vmem:[#allocation54_spill] sm:$0xff]  ;;  %v5347_v13 = vld [vmem:[#allocation55_spill] sm:$0xff] }
 0x28a   :  { %1304 = vmatprep.subr.bf16.mxu0 %v5320_v15  ;;  %1345 = vmatprep.subr.bf16.mxu1 %v5321_v16  ;;  %v5348_v15 = vld [vmem:[#allocation56_spill] sm:$0xff]  ;;  %v5349_v16 = vld [vmem:[#allocation57_spill] sm:$0xff] }
 0x28d   :  { %1305 = vmatpush1.bf16.msra.mxu0 %v5322_v17  ;;  %1346 = vmatpush1.bf16.msra.mxu1 %v5323_v18  ;;  %v5350_v17 = vld [vmem:[#allocation58_spill] sm:$0xff]  ;;  %v5351_v18 = vld [vmem:[#allocation59_spill] sm:$0xff] }
 0x28e   :  { %1306 = vmatprep.subr.bf16.mxu0 %v5324_v20  ;;  %1347 = vmatprep.subr.bf16.mxu1 %v5325_v21  ;;  %v5352_v20 = vld [vmem:[#allocation60_spill] sm:$0xff]  ;;  %v5353_v21 = vld [vmem:[#allocation61_spill] sm:$0xff] }
 0x291   :  { %1307 = vmatpush1.bf16.msra.mxu0 %v5326_v24  ;;  %1348 = vmatpush1.bf16.msra.mxu1 %v5327_v25  ;;  %v5354_v24 = vld [vmem:[#allocation62_spill] sm:$0xff]  ;;  %v5355_v25 = vld [vmem:[#allocation63_spill] sm:$0xff] }
 0x292   :  { %1308 = vmatprep.subr.bf16.mxu0 %v5328_v26  ;;  %1349 = vmatprep.subr.bf16.mxu1 %v5329_v27  ;;  %v5356_v26 = vld [vmem:[#allocation64_spill] sm:$0xff]  ;;  %v5357_v27 = vld [vmem:[#allocation65_spill] sm:$0xff] }
 0x295   :  { %1309 = vmatpush1.bf16.msra.mxu0 %v5330_v28  ;;  %1350 = vmatpush1.bf16.msra.mxu1 %v5331_v29  ;;  %v5358_v28 = vld [vmem:[#allocation66_spill] sm:$0xff]  ;;  %v5359_v29 = vld [vmem:[#allocation67_spill] sm:$0xff] }
 0x296   :  { %1310 = vmatprep.subr.bf16.mxu0 %v5332_v30  ;;  %1351 = vmatprep.subr.bf16.mxu1 %v5333_v31 }
 0x299   :  { %1311 = vmatpush1.bf16.msra.mxu0 %v5334_v32  ;;  %1352 = vmatpush1.bf16.msra.mxu1 %v5335_v33 }
 0x29a   :  { %1312 = vmatprep.subr.bf16.mxu0 %v5336_v22  ;;  %1353 = vmatprep.subr.bf16.mxu1 %v5337_v38 }
 0x29d   :  { %1313 = vmatpush1.bf16.msra.mxu0 %v5338_v42  ;;  %1354 = vmatpush1.bf16.msra.mxu1 %v5339_v48 }
 0x29e   :  { %1314 = vmatprep.subr.bf16.mxu0 %v5340_v37  ;;  %1355 = vmatprep.subr.bf16.mxu1 %v5341_v55 }
 0x2a1   :  { %1315 = vmatpush1.bf16.msra.mxu0 %v5342_v56  ;;  %1356 = vmatpush1.bf16.msra.mxu1 %v5343_v45 }
 0x2a2   :  { %1316 = vmatprep.subr.bf16.mxu0 %v5344_v54  ;;  %1357 = vmatprep.subr.bf16.mxu1 %v5345_v40 }
 0x2a5   :  { %1317 = vmatpush1.bf16.msra.mxu0 %v5346_v12  ;;  %1358 = vmatpush1.bf16.msra.mxu1 %v5347_v13  ;;  %v5366_v13 = vld [vmem:[#allocation9_spill] sm:$0xff] }
 0x2a6   :  { %1318 = vmatprep.subr.bf16.mxu0 %v5348_v15  ;;  %1359 = vmatprep.subr.bf16.mxu1 %v5349_v16  ;;  %v5360_v16 = vld [vmem:[#allocation68_spill] sm:$0xff] }
 0x2a9   :  { %1319 = vmatpush1.bf16.msra.mxu0 %v5350_v17  ;;  %1360 = vmatpush1.bf16.msra.mxu1 %v5351_v18  ;;  %v5361_v17 = vld [vmem:[#allocation69_spill] sm:$0xff]  ;;  %v5362_v18 = vld [vmem:[#allocation70_spill] sm:$0xff] }
 0x2aa   :  { %1320 = vmatprep.subr.bf16.mxu0 %v5352_v20  ;;  %1361 = vmatprep.subr.bf16.mxu1 %v5353_v21  ;;  %v5363_v20 = vld [vmem:[#allocation71_spill] sm:$0xff]  ;;  %v5364_v21 = vld [vmem:[#allocation24_spill] sm:$0xff] }
 0x2ad   :  { %1321 = vmatpush1.bf16.msra.mxu0 %v5354_v24  ;;  %1362 = vmatpush1.bf16.msra.mxu1 %v5355_v25  ;;  %v5365_v24 = vld [vmem:[#allocation25_spill] sm:$0xff] }
 0x2ae   :  { %1322 = vmatprep.subr.bf16.mxu0 %v5356_v26  ;;  %1363 = vmatprep.subr.bf16.mxu1 %v5357_v27 }
 0x2b1   :  { %1323 = vmatpush1.bf16.msra.mxu0 %v5358_v28  ;;  %1364 = vmatpush1.bf16.msra.mxu1 %v5359_v29 }
 0x2b2   :  { %1324 = vmatprep.subr.bf16.mxu0 %v5360_v16  ;;  %1365 = vmatprep.subr.bf16.mxu1 %v5361_v17 }
 0x2b5   :  { %1325 = vmatpush1.bf16.msra.mxu0 %v5362_v18  ;;  %1366 = vmatpush1.bf16.msra.mxu1 %v5363_v20  ;;  %v5367_v20 = vld [vmem:[#allocation73_spill] sm:$0xff] }
 0x2b6   :  { %1400 = vmatprep.subr.bf16.mxu0 %v5364_v21  ;;  %1441 = vmatprep.subr.bf16.mxu1 %v5365_v24  ;;  %v5368_v24 = vld [vmem:[#allocation74_spill] sm:$0xff] }
 0x32b   :  { %v1086_v25 = vpop.f32.mrb[8].mxu0  ;;  %v1127_v26 = vpop.f32.mrb[16].mxu1 }
 0x32c   :  { %v1087_v27 = vadd.f32 %v1086_v25, %v4041_v8  ;;  %v1088_v15 = vpop.f32.mrb[9].mxu0  ;;  %v1129_v28 = vpop.f32.mrb[17].mxu1  ;;  %v1128_v56 = vadd.f32 %v1127_v26, %v5368_v24 }
 0x32d   :  { %v1089_v29 = vadd.f32 %v1088_v15, %v5366_v13  ;;  %v1090_v12 = vpop.f32.mrb[10].mxu0  ;;  %v1131_v16 = vpop.f32.mrb[18].mxu1  ;;  %v1130_v21 = vadd.f32 %v1129_v28, %v5367_v20 }
 0x32e   :  { %v2802_v40 = vmul.f32 -1.442695, %v1087_v27  ;;  %v1091_v17 = vpop.f32.mrb[11].mxu0  ;;  %v1132_v54 = vpop.f32.mrb[19].mxu1 }
 0x32f   :  { %v2804_v18 = vmul.f32 -1.442695, %v1089_v29  ;;  %v2803_v45 = vmul.f32 -1.442695, %v1130_v21 }
 0x330   :  { %3115 = vpow2.f32 %v2802_v40 }
 0x331   :  { %3117 = vpow2.f32 %v2804_v18  ;;  %v5369_v18 = vld [vmem:[#allocation75_spill] sm:$0xff] }
 0x332   :  { %3119 = vpow2.f32 %v2803_v45 }
 0x333   :  { %3121 = vtanh.f32 %v1128_v56 }
 0x33a   :  { %v3116_v55 = vpop.eup %3115 }
 0x33b   :  { %v3118_v37 = vpop.eup %3117  ;;  %v1137_v25 = vadd.f32 1.0, %v3116_v55 }
 0x33c   :  { %v1151_v8 = vadd.f32 1.0, %v3118_v37  ;;  %v3120_v12 = vpop.eup %3119 }
 0x33d   :  { %3123 = vrcp.f32 %v1137_v25  ;;  %v3122_v15 = vpop.eup %3121  ;;  %v1144_v40 = vadd.f32 1.0, %v3120_v12 }
 0x33e   :  { %3125 = vrcp.f32 %v1151_v8  ;;  %v5371_v8 = vld [vmem:[#allocation26_spill] sm:$0xff] }
 0x33f   :  { %3127 = vrcp.f32 %v1144_v40 }
 0x347   :  { %v3124_v16 = vpop.eup %3123 }
 0x348   :  { %v3126_v54 = vpop.eup %3125  ;;  %v1147_v17 = vmul.f32 %v3124_v16, %v3122_v15 }
 0x349   :  { %v1154_v27 = vmul.f32 %v3126_v54, %v5369_v18  ;;  %v3128_v18 = vpop.eup %3127 }
 0x34b   :  { %v4174_v28 = vadd.f32 %v1154_v27, %v1147_v17  ;;  %v1192_v29 = vpop.f32.mrb[12].mxu0  ;;  %v1233_v26 = vpop.f32.mrb[20].mxu1 }
 0x34c   :  { %v1244_v21 = vrot.slane %v1192_v29, 4  ;;  %v1194_v55 = vpop.f32.mrb[13].mxu0  ;;  %v1235_v45 = vpop.f32.mrb[21].mxu1  ;;  %v1246_v27 = vrot.slane %v1233_v26, 4 }
 0x34d   :  { %5370 = vst [vmem:[#allocation31_spill] sm:$0xff] %v4174_v28  ;;  %v1245_v56 = vrot.slane %v1194_v55, 4  ;;  %v1196_v37 = vpop.f32.mrb[14].mxu0  ;;  %v1237_v25 = vpop.f32.mrb[22].mxu1  ;;  %3129 = vtanh.f32 %v4174_v28  ;;  %v1247_v17 = vrot.slane %v1235_v45, 4 }
 0x34e   :  { %v1252_v24 = vadd.f32 %v1244_v21, %v5371_v8  ;;  %v1197_v20 = vpop.f32.mrb[15].mxu0  ;;  %v1238_v15 = vpop.f32.mrb[23].mxu1  ;;  %v1254_v25 = vadd.f32 %v1246_v27, %v3804_v11 }
 0x34f   :  { %v1253_v12 = vadd.f32 %v1245_v56, %v4061_v34  ;;  %v1255_v40 = vadd.f32 %v1247_v17, %v3797_v5 }
 0x350   :  { %v2805_v16 = vmul.f32 -1.442695, %v1252_v24 }
 0x351   :  { %v2807_v54 = vmul.f32 -1.442695, %v1253_v12  ;;  %v2806_v37 = vmul.f32 -1.442695, %v1255_v40 }
 0x352   :  { %3131 = vpow2.f32 %v2805_v16  ;;  %v1277_v16 = vrot.slane %v4068_v14, 6  ;;  %v4280_v14 = vld [vmem:[#allocation5 + $0xac] ss:$16 sps:$4 sm:$0xff]  }
 0x353   :  { %3133 = vpow2.f32 %v2807_v54  ;;  %5375 = vst [vmem:[#allocation35_spill] sm:$0xff] %v4280_v14 }
 0x354   :  { %3135 = vpow2.f32 %v2806_v37 }
 0x355   :  { %3137 = vtanh.f32 %v1254_v25  ;;  %v4310_v25 = vld [vmem:[#allocation5 + $0xe8] ss:$16 sps:$4 sm:$0xff]  }
 0x356   :  { %5385 = vst [vmem:[#allocation15_spill] sm:$0xff] %v4310_v25 }
 0x357   :  { %v3130_v29 = vpop.eup %3129 }
 0x358   :  { %v1157_v55 = vmul.f32 %v3130_v29, %v3128_v18 }
 0x35a   :  { %v1284_v28 = vrot.slane %v1157_v55, 4 }
 0x35c   :  { %v3132_v21 = vpop.eup %3131  ;;  %v1287_v20 = vpack.c.bf16 %v1284_v28, %v1284_v28 }
 0x35d   :  { %v3134_v15 = vpop.eup %3133  ;;  %v1259_v8 = vadd.f32 1.0, %v3132_v21  ;;  %v5386_v21 = vld [vmem:[#allocation48_spill] sm:$0xff] }
 0x35e   :  { %v1273_v24 = vadd.f32 1.0, %v3134_v15  ;;  %v1291_v45 = vrot.slane %v1287_v20, 2  ;;  %v3136_v56 = vpop.eup %3135  ;;  %v5387_v20 = vld [vmem:[#allocation49_spill] sm:$0xff]  ;;  %v5388_v15 = vld [vmem:[#allocation50_spill] sm:$0xff] }
 0x35f   :  { %3139 = vrcp.f32 %v1259_v8  ;;  %v3138_v26 = vpop.eup %3137  ;;  %v1266_v40 = vadd.f32 1.0, %v3136_v56  ;;  %v5399_v56 = vld [vmem:[#allocation61_spill] sm:$0xff] }
 0x360   :  { %3141 = vrcp.f32 %v1273_v24  ;;  %1326 = vmatprep.mubr.bf16.mxu0 %v1291_v45  ;;  %1367 = vmatprep.mubr.bf16.mxu1 %v1291_v45  ;;  %v5397_v24 = vld [vmem:[#allocation59_spill] sm:$0xff]  ;;  %v5398_v45 = vld [vmem:[#allocation60_spill] sm:$0xff] }
 0x361   :  { %3143 = vrcp.f32 %v1266_v40  ;;  %v5405_v40 = vld [vmem:[#allocation67_spill] sm:$0xff] }
 0x369   :  { %v3140_v12 = vpop.eup %3139 }
 0x36a   :  { %v3142_v54 = vpop.eup %3141  ;;  %v1269_v17 = vmul.f32 %v3140_v12, %v3138_v26  ;;  %v5400_v26 = vld [vmem:[#allocation62_spill] sm:$0xff]  ;;  %v5401_v12 = vld [vmem:[#allocation63_spill] sm:$0xff] }
 0x36b   :  { %v1279_v18 = vmul.f32 %v3142_v54, %v1277_v16  ;;  %v3144_v27 = vpop.eup %3143  ;;  %v5402_v16 = vld [vmem:[#allocation64_spill] sm:$0xff]  ;;  %v5403_v54 = vld [vmem:[#allocation65_spill] sm:$0xff] }
 0x36d   :  { %v4182_v28 = vadd.f32 %v1279_v18, %v1269_v17  ;;  %v5404_v17 = vld [vmem:[#allocation66_spill] sm:$0xff]  ;;  %v5406_v18 = vld [vmem:[#allocation68_spill] sm:$0xff] }
 0x36f   :  { %3145 = vtanh.f32 %v4182_v28 }
 0x379   :  { %v3146_v29 = vpop.eup %3145 }
 0x37a   :  { %v1282_v8 = vmul.f32 %v3146_v29, %v3144_v27  ;;  %v5407_v27 = vld [vmem:[#allocation69_spill] sm:$0xff]  ;;  %v5408_v29 = vld [vmem:[#allocation70_spill] sm:$0xff] }
 0x37c   :  { %v1286_v55 = vpack.c.bf16 %v1282_v8, %v1282_v8  ;;  %v5409_v8 = vld [vmem:[#allocation71_spill] sm:$0xff] }
 0x37e   :  { %v1290_v37 = vrot.slane %v1286_v55, 2  ;;  %v4345_v55 = vld [vmem:[#allocation3 + $0x4] ss:$16 sps:$4 sm:$0xff]  }
 0x37f   :  { %5410 = vst [vmem:[#allocation16_spill] sm:$0xff] %v4345_v55 }
 0x380   :  { %1327 = vmatmul.mubr.bf16.vlgmr.msra.gmra.mrb[16].mxu0 %v1290_v37  ;;  %1368 = vmatmul.mubr.bf16.vlgmr.msra.gmra.mrb[24].mxu1 %v1290_v37 }
 0x381   :  { %1401 = vmatpush1.bf16.msra.mxu0 %v3810_v2  ;;  %1442 = vmatpush1.bf16.msra.mxu1 %v3812_v3  ;;  %v4217_v2 = vld [vmem:[#allocation5 + $0x4] ss:$16 sps:$4 sm:$0xff]   ;;  %v4247_v3 = vld [vmem:[#allocation5 + $0x40] ss:$16 sps:$4 sm:$0xff]  }
 0x382   :  { %1402 = vmatprep.subr.bf16.mxu0 %v3816_v9  ;;  %1443 = vmatprep.subr.bf16.mxu1 %v3818_v19  ;;  %v4250_v9 = vld [vmem:[#allocation5 + $0x48] ss:$16 sps:$4 sm:$0xff]   ;;  %v4253_v19 = vld [vmem:[#allocation5 + $0x64] ss:$16 sps:$4 sm:$0xff]  }
 0x383   :  { %1432 = vmatprep.mubr.bf16.mxu0 %v5308_v61  ;;  %1473 = vmatprep.mubr.bf16.mxu1 %v5308_v61 }
 0x385   :  { %1403 = vmatpush1.bf16.msra.mxu0 %v3824_v52  ;;  %1444 = vmatpush1.bf16.msra.mxu1 %v3826_v51  ;;  %v4256_v52 = vld [vmem:[#allocation5 + $0x6c] ss:$16 sps:$4 sm:$0xff]   ;;  %v4259_v51 = vld [vmem:[#allocation5 + $0x60] ss:$16 sps:$4 sm:$0xff]  }
 0x386   :  { %1404 = vmatprep.subr.bf16.mxu0 %v3830_v53  ;;  %1445 = vmatprep.subr.bf16.mxu1 %v3832_v57  ;;  %v4262_v53 = vld [vmem:[#allocation5 + $0x68] ss:$16 sps:$4 sm:$0xff]   ;;  %v4265_v57 = vld [vmem:[#allocation5 + $0x84] ss:$16 sps:$4 sm:$0xff]  }
 0x389   :  { %1405 = vmatpush1.bf16.msra.mxu0 %v3838_v59  ;;  %1446 = vmatpush1.bf16.msra.mxu1 %v3840_v4  ;;  %v4268_v59 = vld [vmem:[#allocation5 + $0x8c] ss:$16 sps:$4 sm:$0xff]   ;;  %v4271_v4 = vld [vmem:[#allocation5 + $0x80] ss:$16 sps:$4 sm:$0xff]  }
 0x38a   :  { %1406 = vmatprep.subr.bf16.mxu0 %v3844_v0  ;;  %1447 = vmatprep.subr.bf16.mxu1 %v3846_v6  ;;  %5372 = vst [vmem:[#allocation32_spill] sm:$0xff] %v4271_v4  ;;  %v4274_v0 = vld [vmem:[#allocation5 + $0x88] ss:$16 sps:$4 sm:$0xff]   ;;  %v4277_v6 = vld [vmem:[#allocation5 + $0xa4] ss:$16 sps:$4 sm:$0xff]  }
 0x38b   :  { %5373 = vst [vmem:[#allocation33_spill] sm:$0xff] %v4274_v0  ;;  %5374 = vst [vmem:[#allocation34_spill] sm:$0xff] %v4277_v6 }
 0x38d   :  { %1407 = vmatpush1.bf16.msra.mxu0 %v5309_v44  ;;  %1448 = vmatpush1.bf16.msra.mxu1 %v5310_v36  ;;  %v4283_v44 = vld [vmem:[#allocation5 + $0xa0] ss:$16 sps:$4 sm:$0xff]   ;;  %v4286_v36 = vld [vmem:[#allocation5 + $0xa8] ss:$16 sps:$4 sm:$0xff]  }
 0x38e   :  { %1408 = vmatprep.subr.bf16.mxu0 %v5311_v43  ;;  %1449 = vmatprep.subr.bf16.mxu1 %v5312_v39  ;;  %5376 = vst [vmem:[#allocation36_spill] sm:$0xff] %v4283_v44  ;;  %5377 = vst [vmem:[#allocation37_spill] sm:$0xff] %v4286_v36  ;;  %v4289_v43 = vld [vmem:[#allocation5 + $0xc4] ss:$16 sps:$4 sm:$0xff]   ;;  %v4292_v39 = vld [vmem:[#allocation5 + $0xcc] ss:$16 sps:$4 sm:$0xff]  }
 0x38f   :  { %5378 = vst [vmem:[#allocation38_spill] sm:$0xff] %v4289_v43  ;;  %5379 = vst [vmem:[#allocation39_spill] sm:$0xff] %v4292_v39 }
 0x391   :  { %1409 = vmatpush1.bf16.msra.mxu0 %v5313_v47  ;;  %1450 = vmatpush1.bf16.msra.mxu1 %v5314_v49  ;;  %v4295_v47 = vld [vmem:[#allocation5 + $0xc0] ss:$16 sps:$4 sm:$0xff]   ;;  %v4298_v49 = vld [vmem:[#allocation5 + $0xc8] ss:$16 sps:$4 sm:$0xff]  }
 0x392   :  { %1410 = vmatprep.subr.bf16.mxu0 %v5315_v46  ;;  %1451 = vmatprep.subr.bf16.mxu1 %v5316_v41  ;;  %5380 = vst [vmem:[#allocation10_spill] sm:$0xff] %v4295_v47  ;;  %5381 = vst [vmem:[#allocation11_spill] sm:$0xff] %v4298_v49  ;;  %v4301_v46 = vld [vmem:[#allocation5 + $0xe4] ss:$16 sps:$4 sm:$0xff]   ;;  %v4304_v41 = vld [vmem:[#allocation5 + $0xec] ss:$16 sps:$4 sm:$0xff]  }
 0x393   :  { %5382 = vst [vmem:[#allocation12_spill] sm:$0xff] %v4301_v46  ;;  %5383 = vst [vmem:[#allocation13_spill] sm:$0xff] %v4304_v41 }
 0x395   :  { %1411 = vmatpush1.bf16.msra.mxu0 %v5317_v35  ;;  %1452 = vmatpush1.bf16.msra.mxu1 %v3876_v1  ;;  %v4220_v1 = vld [vmem:[#allocation5 + $0xc] ss:$16 sps:$4 sm:$0xff]   ;;  %v4307_v35 = vld [vmem:[#allocation5 + $0xe0] ss:$16 sps:$4 sm:$0xff]  }
 0x396   :  { %1412 = vmatprep.subr.bf16.mxu0 %v3880_v62  ;;  %1453 = vmatprep.subr.bf16.mxu1 %v3882_v58  ;;  %v4226_v58 = vld [vmem:[#allocation5 + $0x8] ss:$16 sps:$4 sm:$0xff]   ;;  %v4235_v62 = vld [vmem:[#allocation5 + $0x20] ss:$16 sps:$4 sm:$0xff]   ;;  %5384 = vst [vmem:[#allocation14_spill] sm:$0xff] %v4307_v35 }
 0x399   :  { %1413 = vmatpush1.bf16.msra.mxu0 %v3886_v50  ;;  %1454 = vmatpush1.bf16.msra.mxu1 %v3888_v7  ;;  %v4223_v50 = vld [vmem:[#allocation5] ss:$16 sps:$4 sm:$0xff]   ;;  %v4241_v7 = vld [vmem:[#allocation5 + $0x44] ss:$16 sps:$4 sm:$0xff]  }
 0x39a   :  { %1414 = vmatprep.subr.bf16.mxu0 %v3892_v10  ;;  %1455 = vmatprep.subr.bf16.mxu1 %v3894_v63  ;;  %v4238_v63 = vld [vmem:[#allocation5 + $0x28] ss:$16 sps:$4 sm:$0xff]   ;;  %v4244_v10 = vld [vmem:[#allocation5 + $0x4c] ss:$16 sps:$4 sm:$0xff]  }
 0x39d   :  { %1415 = vmatpush1.bf16.msra.mxu0 %v3898_v60  ;;  %1456 = vmatpush1.bf16.msra.mxu1 %v3900_v23  ;;  %v4229_v60 = vld [vmem:[#allocation5 + $0x24] ss:$16 sps:$4 sm:$0xff]   ;;  %v4232_v23 = vld [vmem:[#allocation5 + $0x2c] ss:$16 sps:$4 sm:$0xff]  }
 0x39e   :  { %1536 = vmatprep.subr.bf16.mxu0 %v4217_v2  ;;  %1577 = vmatprep.subr.bf16.mxu1 %v4220_v1 }
 0x3a0   :  { %1433 = vmatmul.mubr.bf16.vlgmr.msra.gmra.mrb[20].mxu0 %v1290_v37  ;;  %1474 = vmatmul.mubr.bf16.vlgmr.msra.gmra.mrb[28].mxu1 %v1290_v37  ;;  %v4348_v37 = vld [vmem:[#allocation3 + $0xc] ss:$16 sps:$4 sm:$0xff]  }
 0x3a1   :  { %1537 = vmatpush1.bf16.msra.mxu0 %v4223_v50  ;;  %1578 = vmatpush1.bf16.msra.mxu1 %v4226_v58  ;;  %5411 = vst [vmem:[#allocation17_spill] sm:$0xff] %v4348_v37 }
 0x3a2   :  { %1538 = vmatprep.subr.bf16.mxu0 %v4229_v60  ;;  %1579 = vmatprep.subr.bf16.mxu1 %v4232_v23 }
 0x3a5   :  { %1539 = vmatpush1.bf16.msra.mxu0 %v4235_v62  ;;  %1580 = vmatpush1.bf16.msra.mxu1 %v4238_v63 }
 0x3a6   :  { %1540 = vmatprep.subr.bf16.mxu0 %v4241_v7  ;;  %1581 = vmatprep.subr.bf16.mxu1 %v4244_v10 }
 0x3a9   :  { %1541 = vmatpush1.bf16.msra.mxu0 %v4247_v3  ;;  %1582 = vmatpush1.bf16.msra.mxu1 %v4250_v9 }
 0x3aa   :  { %1542 = vmatprep.subr.bf16.mxu0 %v4253_v19  ;;  %1583 = vmatprep.subr.bf16.mxu1 %v4256_v52 }
 0x3ad   :  { %1543 = vmatpush1.bf16.msra.mxu0 %v4259_v51  ;;  %1584 = vmatpush1.bf16.msra.mxu1 %v4262_v53 }
 0x3ae   :  { %1544 = vmatprep.subr.bf16.mxu0 %v4265_v57  ;;  %1585 = vmatprep.subr.bf16.mxu1 %v4268_v59 }
 0x3b1   :  { %1545 = vmatpush1.bf16.msra.mxu0 %v4271_v4  ;;  %1586 = vmatpush1.bf16.msra.mxu1 %v4274_v0 }
 0x3b2   :  { %1546 = vmatprep.subr.bf16.mxu0 %v4277_v6  ;;  %1587 = vmatprep.subr.bf16.mxu1 %v4280_v14 }
 0x3b5   :  { %1547 = vmatpush1.bf16.msra.mxu0 %v4283_v44  ;;  %1588 = vmatpush1.bf16.msra.mxu1 %v4286_v36 }
 0x3b6   :  { %1548 = vmatprep.subr.bf16.mxu0 %v4289_v43  ;;  %1589 = vmatprep.subr.bf16.mxu1 %v4292_v39 }
 0x3b9   :  { %1549 = vmatpush1.bf16.msra.mxu0 %v4295_v47  ;;  %1590 = vmatpush1.bf16.msra.mxu1 %v4298_v49 }
 0x3ba   :  { %1550 = vmatprep.subr.bf16.mxu0 %v4301_v46  ;;  %1591 = vmatprep.subr.bf16.mxu1 %v4304_v41 }
 0x3bd   :  { %1551 = vmatpush1.bf16.msra.mxu0 %v4307_v35  ;;  %1592 = vmatpush1.bf16.msra.mxu1 %v4310_v25 }
 0x3be   :  { %1552 = vmatprep.subr.bf16.mxu0 %v5332_v30  ;;  %1593 = vmatprep.subr.bf16.mxu1 %v5333_v31  ;;  %v5389_v30 = vld [vmem:[#allocation51_spill] sm:$0xff]  ;;  %v5390_v31 = vld [vmem:[#allocation52_spill] sm:$0xff] }
 0x3c1   :  { %1553 = vmatpush1.bf16.msra.mxu0 %v5334_v32  ;;  %1594 = vmatpush1.bf16.msra.mxu1 %v5335_v33  ;;  %v5391_v32 = vld [vmem:[#allocation53_spill] sm:$0xff]  ;;  %v5392_v33 = vld [vmem:[#allocation54_spill] sm:$0xff] }
 0x3c2   :  { %1554 = vmatprep.subr.bf16.mxu0 %v5336_v22  ;;  %1595 = vmatprep.subr.bf16.mxu1 %v5337_v38  ;;  %v5393_v22 = vld [vmem:[#allocation55_spill] sm:$0xff]  ;;  %v5394_v38 = vld [vmem:[#allocation56_spill] sm:$0xff] }
 0x3c5   :  { %1555 = vmatpush1.bf16.msra.mxu0 %v5338_v42  ;;  %1596 = vmatpush1.bf16.msra.mxu1 %v5339_v48  ;;  %v5395_v42 = vld [vmem:[#allocation57_spill] sm:$0xff]  ;;  %v5396_v48 = vld [vmem:[#allocation58_spill] sm:$0xff] }
 0x3c6   :  { %1556 = vmatprep.subr.bf16.mxu0 %v5386_v21  ;;  %1597 = vmatprep.subr.bf16.mxu1 %v5387_v20 }
 0x3c9   :  { %1557 = vmatpush1.bf16.msra.mxu0 %v5388_v15  ;;  %1598 = vmatpush1.bf16.msra.mxu1 %v5389_v30  ;;  %v5412_v15 = vld [vmem:[#allocation72_spill] sm:$0xff] }
 0x3ca   :  { %1558 = vmatprep.subr.bf16.mxu0 %v5390_v31  ;;  %1599 = vmatprep.subr.bf16.mxu1 %v5391_v32 }
 0x3cd   :  { %1559 = vmatpush1.bf16.msra.mxu0 %v5392_v33  ;;  %1600 = vmatpush1.bf16.msra.mxu1 %v5393_v22 }
 0x3ce   :  { %1560 = vmatprep.subr.bf16.mxu0 %v5394_v38  ;;  %1601 = vmatprep.subr.bf16.mxu1 %v5395_v42 }
 0x3d1   :  { %1561 = vmatpush1.bf16.msra.mxu0 %v5396_v48  ;;  %1602 = vmatpush1.bf16.msra.mxu1 %v5397_v24 }
 0x3d2   :  { %1562 = vmatprep.subr.bf16.mxu0 %v5398_v45  ;;  %1603 = vmatprep.subr.bf16.mxu1 %v5399_v56  ;;  %v5413_v56 = vld [vmem:[#allocation73_spill] sm:$0xff] }
 0x3d5   :  { %1563 = vmatpush1.bf16.msra.mxu0 %v5400_v26  ;;  %1604 = vmatpush1.bf16.msra.mxu1 %v5401_v12 }
 0x3d6   :  { %1564 = vmatprep.subr.bf16.mxu0 %v5402_v16  ;;  %1605 = vmatprep.subr.bf16.mxu1 %v5403_v54  ;;  %v5414_v16 = vld [vmem:[#allocation74_spill] sm:$0xff] }
 0x3d9   :  { %1565 = vmatpush1.bf16.msra.mxu0 %v5404_v17  ;;  %1606 = vmatpush1.bf16.msra.mxu1 %v5405_v40 }
 0x3da   :  { %1566 = vmatprep.subr.bf16.mxu0 %v5406_v18  ;;  %1607 = vmatprep.subr.bf16.mxu1 %v5407_v27 }
 0x3dd   :  { %1567 = vmatpush1.bf16.msra.mxu0 %v5408_v29  ;;  %1608 = vmatpush1.bf16.msra.mxu1 %v5409_v8 }
 0x3de   :  { %1642 = vmatprep.subr.bf16.mxu0 %v4345_v55  ;;  %1683 = vmatprep.subr.bf16.mxu1 %v4348_v37 }
 0x453   :  { %v1328_v21 = vpop.f32.mrb[16].mxu0  ;;  %v1369_v20 = vpop.f32.mrb[24].mxu1 }
 0x454   :  { %v1329_v30 = vadd.f32 %v1328_v21, %v5412_v15  ;;  %v1330_v31 = vpop.f32.mrb[17].mxu0  ;;  %v1371_v32 = vpop.f32.mrb[25].mxu1  ;;  %v1370_v54 = vadd.f32 %v1369_v20, %v5414_v16 }
 0x455   :  { %v1331_v33 = vadd.f32 %v1330_v31, %v5366_v13  ;;  %v1332_v22 = vpop.f32.mrb[18].mxu0  ;;  %v1373_v38 = vpop.f32.mrb[26].mxu1  ;;  %v1372_v26 = vadd.f32 %v1371_v32, %v5413_v56 }
 0x456   :  { %v2808_v42 = vmul.f32 -1.442695, %v1329_v30  ;;  %v1333_v48 = vpop.f32.mrb[19].mxu0  ;;  %v1374_v24 = vpop.f32.mrb[27].mxu1  ;;  %v5415_v22 = vld [vmem:[#allocation31_spill] sm:$0xff] }
 0x457   :  { %v2810_v45 = vmul.f32 -1.442695, %v1331_v33  ;;  %v2809_v12 = vmul.f32 -1.442695, %v1372_v26 }
 0x458   :  { %3147 = vpow2.f32 %v2808_v42 }
 0x459   :  { %3149 = vpow2.f32 %v2810_v45 }
 0x45a   :  { %3151 = vpow2.f32 %v2809_v12 }
 0x45b   :  { %3153 = vtanh.f32 %v1370_v54 }
 0x462   :  { %v3148_v17 = vpop.eup %3147 }
 0x463   :  { %v3150_v40 = vpop.eup %3149  ;;  %v1379_v18 = vadd.f32 1.0, %v3148_v17  ;;  %v5416_v17 = vld [vmem:[#allocation26_spill] sm:$0xff] }
 0x464   :  { %v1393_v27 = vadd.f32 1.0, %v3150_v40  ;;  %v3152_v29 = vpop.eup %3151 }
 0x465   :  { %3155 = vrcp.f32 %v1379_v18  ;;  %v3154_v8 = vpop.eup %3153  ;;  %v1386_v33 = vadd.f32 1.0, %v3152_v29 }
 0x466   :  { %3157 = vrcp.f32 %v1393_v27 }
 0x467   :  { %3159 = vrcp.f32 %v1386_v33 }
 0x46f   :  { %v3156_v21 = vpop.eup %3155 }
 0x470   :  { %v3158_v30 = vpop.eup %3157  ;;  %v1389_v31 = vmul.f32 %v3156_v21, %v3154_v8 }
 0x471   :  { %v1396_v38 = vmul.f32 %v3158_v30, %v5415_v22  ;;  %v3160_v33 = vpop.eup %3159 }
 0x473   :  { %v4356_v32 = vadd.f32 %v1396_v38, %v1389_v31  ;;  %v1434_v42 = vpop.f32.mrb[20].mxu0  ;;  %v1475_v20 = vpop.f32.mrb[28].mxu1 }
 0x474   :  { %v1486_v48 = vrot.slane %v1434_v42, 2  ;;  %v1436_v24 = vpop.f32.mrb[21].mxu0  ;;  %v1477_v45 = vpop.f32.mrb[29].mxu1  ;;  %v1488_v22 = vrot.slane %v1475_v20, 2 }
 0x475   :  { %v1487_v26 = vrot.slane %v1436_v24, 2  ;;  %v1438_v12 = vpop.f32.mrb[22].mxu0  ;;  %v1479_v54 = vpop.f32.mrb[30].mxu1  ;;  %3161 = vtanh.f32 %v4356_v32  ;;  %v1489_v30 = vrot.slane %v1477_v45, 2 }
 0x476   :  { %v1494_v40 = vadd.f32 %v1486_v48, %v5416_v17  ;;  %v1439_v18 = vpop.f32.mrb[23].mxu0  ;;  %v1480_v27 = vpop.f32.mrb[31].mxu1  ;;  %v1496_v12 = vadd.f32 %v1488_v22, %v3804_v11 }
 0x477   :  { %v1495_v29 = vadd.f32 %v1487_v26, %v4061_v34  ;;  %v1497_v31 = vadd.f32 %v1489_v30, %v3797_v5 }
 0x478   :  { %v2811_v8 = vmul.f32 -1.442695, %v1494_v40  ;;  %v1519_v40 = vrot.slane %v4182_v28, 6  ;;  %v4371_v28 = vld [vmem:[#allocation3] ss:$16 sps:$4 sm:$0xff]  }
 0x479   :  { %v2813_v21 = vmul.f32 -1.442695, %v1495_v29  ;;  %v2812_v24 = vmul.f32 -1.442695, %v1497_v31 }
 0x47a   :  { %3163 = vpow2.f32 %v2811_v8 }
 0x47b   :  { %3165 = vpow2.f32 %v2813_v21 }
 0x47c   :  { %3167 = vpow2.f32 %v2812_v24  ;;  %v4374_v24 = vld [vmem:[#allocation3 + $0x8] ss:$16 sps:$4 sm:$0xff]  }
 0x47d   :  { %3169 = vtanh.f32 %v1496_v12  ;;  %v4377_v12 = vld [vmem:[#allocation3 + $0x24] ss:$16 sps:$4 sm:$0xff]  }
 0x47f   :  { %v3162_v38 = vpop.eup %3161 }
 0x480   :  { %v1399_v42 = vmul.f32 %v3162_v38, %v3160_v33 }
 0x482   :  { %v1526_v54 = vrot.slane %v1399_v42, 2 }
 0x484   :  { %v3164_v48 = vpop.eup %3163  ;;  %v1529_v17 = vpack.c.bf16 %v1526_v54, %v1526_v54  ;;  %v4380_v54 = vld [vmem:[#allocation3 + $0x2c] ss:$16 sps:$4 sm:$0xff]  }
 0x485   :  { %v3166_v18 = vpop.eup %3165  ;;  %v1501_v27 = vadd.f32 1.0, %v3164_v48  ;;  %v4385_v48 = vld [vmem:[#allocation3 + $0x20] ss:$16 sps:$4 sm:$0xff]  }
 0x486   :  { %v1515_v34 = vadd.f32 1.0, %v3166_v18  ;;  %v1533_v45 = vrot.slane %v1529_v17, 3  ;;  %v3168_v5 = vpop.eup %3167  ;;  %v4388_v17 = vld [vmem:[#allocation3 + $0x28] ss:$16 sps:$4 sm:$0xff]   ;;  %v4391_v18 = vld [vmem:[#allocation3 + $0x44] ss:$16 sps:$4 sm:$0xff]  }
 0x487   :  { %3171 = vrcp.f32 %v1501_v27  ;;  %v3170_v20 = vpop.eup %3169  ;;  %v1508_v8 = vadd.f32 1.0, %v3168_v5  ;;  %v4394_v27 = vld [vmem:[#allocation3 + $0x4c] ss:$16 sps:$4 sm:$0xff]   ;;  %v4403_v5 = vld [vmem:[#allocation3 + $0x64] ss:$16 sps:$4 sm:$0xff]  }
 0x488   :  { %3173 = vrcp.f32 %v1515_v34  ;;  %1568 = vmatprep.mubr.bf16.mxu0 %v1533_v45  ;;  %1609 = vmatprep.mubr.bf16.mxu1 %v1533_v45  ;;  %v4397_v34 = vld [vmem:[#allocation3 + $0x40] ss:$16 sps:$4 sm:$0xff]   ;;  %v4400_v45 = vld [vmem:[#allocation3 + $0x48] ss:$16 sps:$4 sm:$0xff]  }
 0x489   :  { %3175 = vrcp.f32 %v1508_v8  ;;  %v4421_v8 = vld [vmem:[#allocation3 + $0x80] ss:$16 sps:$4 sm:$0xff]  }
 0x48a   :  { %5417 = vst [vmem:[#allocation18_spill] sm:$0xff] %v4421_v8 }
 0x491   :  { %v3172_v26 = vpop.eup %3171 }
 0x492   :  { %v3174_v29 = vpop.eup %3173  ;;  %v1511_v11 = vmul.f32 %v3172_v26, %v3170_v20  ;;  %v4406_v20 = vld [vmem:[#allocation3 + $0x6c] ss:$16 sps:$4 sm:$0xff]   ;;  %v4409_v26 = vld [vmem:[#allocation3 + $0x60] ss:$16 sps:$4 sm:$0xff]  }
 0x493   :  { %v1521_v21 = vmul.f32 %v3174_v29, %v1519_v40  ;;  %v3176_v31 = vpop.eup %3175  ;;  %v4412_v40 = vld [vmem:[#allocation3 + $0x68] ss:$16 sps:$4 sm:$0xff]   ;;  %v4415_v29 = vld [vmem:[#allocation3 + $0x84] ss:$16 sps:$4 sm:$0xff]  }
 0x495   :  { %v4364_v30 = vadd.f32 %v1521_v21, %v1511_v11  ;;  %v4418_v11 = vld [vmem:[#allocation3 + $0x8c] ss:$16 sps:$4 sm:$0xff]   ;;  %v4424_v21 = vld [vmem:[#allocation3 + $0x88] ss:$16 sps:$4 sm:$0xff]  }
 0x496   :  { %5418 = vst [vmem:[#allocation19_spill] sm:$0xff] %v4424_v21 }
 0x497   :  { %3177 = vtanh.f32 %v4364_v30 }
 0x4a1   :  { %v3178_v33 = vpop.eup %3177 }
 0x4a2   :  { %v1524_v22 = vmul.f32 %v3178_v33, %v3176_v31  ;;  %v4427_v31 = vld [vmem:[#allocation3 + $0xa4] ss:$16 sps:$4 sm:$0xff]   ;;  %v4430_v33 = vld [vmem:[#allocation3 + $0xac] ss:$16 sps:$4 sm:$0xff]  }
 0x4a3   :  { %5419 = vst [vmem:[#allocation20_spill] sm:$0xff] %v4427_v31  ;;  %5420 = vst [vmem:[#allocation21_spill] sm:$0xff] %v4430_v33 }
 0x4a4   :  { %v1528_v38 = vpack.c.bf16 %v1524_v22, %v1524_v22  ;;  %v4433_v22 = vld [vmem:[#allocation3 + $0xa0] ss:$16 sps:$4 sm:$0xff]  }
 0x4a5   :  { %5421 = vst [vmem:[#allocation22_spill] sm:$0xff] %v4433_v22 }
 0x4a6   :  { %v4367_v42 = vrot.slane %v1528_v38, 3  ;;  %v4436_v38 = vld [vmem:[#allocation3 + $0xa8] ss:$16 sps:$4 sm:$0xff]  }
 0x4a7   :  { %5422 = vst [vmem:[#allocation23_spill] sm:$0xff] %v4436_v38 }
 0x4a8   :  { %1569 = vmatmul.mubr.bf16.vlgmr.msra.gmra.mrb[24].mxu0 %v4367_v42  ;;  %1610 = vmatmul.mubr.bf16.vlgmr.msra.gmra.mrb[32].mxu1 %v4367_v42 }
 0x4a9   :  { %1643 = vmatpush1.bf16.msra.mxu0 %v4371_v28  ;;  %1684 = vmatpush1.bf16.msra.mxu1 %v4374_v24 }
 0x4aa   :  { %1644 = vmatprep.subr.bf16.mxu0 %v4377_v12  ;;  %1685 = vmatprep.subr.bf16.mxu1 %v4380_v54 }
 0x4ab   :  { %1674 = vmatprep.mubr.bf16.mxu0 %v5308_v61  ;;  %1715 = vmatprep.mubr.bf16.mxu1 %v5308_v61 }
 0x4ad   :  { %1645 = vmatpush1.bf16.msra.mxu0 %v4385_v48  ;;  %1686 = vmatpush1.bf16.msra.mxu1 %v4388_v17 }
 0x4ae   :  { %1646 = vmatprep.subr.bf16.mxu0 %v4391_v18  ;;  %1687 = vmatprep.subr.bf16.mxu1 %v4394_v27 }
 0x4b1   :  { %1647 = vmatpush1.bf16.msra.mxu0 %v4397_v34  ;;  %1688 = vmatpush1.bf16.msra.mxu1 %v4400_v45 }
 0x4b2   :  { %1648 = vmatprep.subr.bf16.mxu0 %v4403_v5  ;;  %1689 = vmatprep.subr.bf16.mxu1 %v4406_v20 }
 0x4b5   :  { %1649 = vmatpush1.bf16.msra.mxu0 %v4409_v26  ;;  %1690 = vmatpush1.bf16.msra.mxu1 %v4412_v40 }
 0x4b6   :  { %1650 = vmatprep.subr.bf16.mxu0 %v4415_v29  ;;  %1691 = vmatprep.subr.bf16.mxu1 %v4418_v11 }
 0x4b9   :  { %1651 = vmatpush1.bf16.msra.mxu0 %v4421_v8  ;;  %1692 = vmatpush1.bf16.msra.mxu1 %v4424_v21  ;;  %v4439_v8 = vld [vmem:[#allocation3 + $0xc4] ss:$16 sps:$4 sm:$0xff]   ;;  %v4442_v21 = vld [vmem:[#allocation3 + $0xcc] ss:$16 sps:$4 sm:$0xff]  }
 0x4ba   :  { %1652 = vmatprep.subr.bf16.mxu0 %v4427_v31  ;;  %1693 = vmatprep.subr.bf16.mxu1 %v4430_v33  ;;  %5423 = vst [vmem:[#allocation40_spill] sm:$0xff] %v4439_v8  ;;  %5424 = vst [vmem:[#allocation41_spill] sm:$0xff] %v4442_v21  ;;  %v4445_v31 = vld [vmem:[#allocation3 + $0xc0] ss:$16 sps:$4 sm:$0xff]   ;;  %v4448_v33 = vld [vmem:[#allocation3 + $0xc8] ss:$16 sps:$4 sm:$0xff]  }
 0x4bd   :  { %1653 = vmatpush1.bf16.msra.mxu0 %v4433_v22  ;;  %1694 = vmatpush1.bf16.msra.mxu1 %v4436_v38  ;;  %v4451_v22 = vld [vmem:[#allocation3 + $0xe4] ss:$16 sps:$4 sm:$0xff]   ;;  %v4454_v38 = vld [vmem:[#allocation3 + $0xec] ss:$16 sps:$4 sm:$0xff]  }
 0x4be   :  { %1654 = vmatprep.subr.bf16.mxu0 %v4439_v8  ;;  %1695 = vmatprep.subr.bf16.mxu1 %v4442_v21  ;;  %v4457_v8 = vld [vmem:[#allocation3 + $0xe0] ss:$16 sps:$4 sm:$0xff]   ;;  %v4460_v21 = vld [vmem:[#allocation3 + $0xe8] ss:$16 sps:$4 sm:$0xff]  }
 0x4c1   :  { %1655 = vmatpush1.bf16.msra.mxu0 %v4445_v31  ;;  %1696 = vmatpush1.bf16.msra.mxu1 %v4448_v33 }
 0x4c2   :  { %1656 = vmatprep.subr.bf16.mxu0 %v4451_v22  ;;  %1697 = vmatprep.subr.bf16.mxu1 %v4454_v38 }
 0x4c5   :  { %1657 = vmatpush1.bf16.msra.mxu0 %v4457_v8  ;;  %1698 = vmatpush1.bf16.msra.mxu1 %v4460_v21 }
 0x4c6   :  { %1757 = vmatprep.subr.bf16.mxu0 %v4217_v2  ;;  %1798 = vmatprep.subr.bf16.mxu1 %v4220_v1 }
 0x4c8   :  { %1675 = vmatmul.mubr.bf16.vlgmr.msra.gmra.mrb[28].mxu0 %v4367_v42  ;;  %1716 = vmatmul.mubr.bf16.vlgmr.msra.gmra.mrb[36].mxu1 %v4367_v42  ;;  %v4497_v42 = vld [vmem:[#allocation5 + $0x104] ss:$16 sps:$4 sm:$0xff]  }
 0x4c9   :  { %1758 = vmatpush1.bf16.msra.mxu0 %v4223_v50  ;;  %1799 = vmatpush1.bf16.msra.mxu1 %v4226_v58  ;;  %5425 = vst [vmem:[#allocation42_spill] sm:$0xff] %v4497_v42 }
 0x4ca   :  { %1759 = vmatprep.subr.bf16.mxu0 %v4229_v60  ;;  %1800 = vmatprep.subr.bf16.mxu1 %v4232_v23 }
 0x4cd   :  { %1760 = vmatpush1.bf16.msra.mxu0 %v4235_v62  ;;  %1801 = vmatpush1.bf16.msra.mxu1 %v4238_v63 }
 0x4ce   :  { %1761 = vmatprep.subr.bf16.mxu0 %v4241_v7  ;;  %1802 = vmatprep.subr.bf16.mxu1 %v4244_v10 }
 0x4d1   :  { %1762 = vmatpush1.bf16.msra.mxu0 %v4247_v3  ;;  %1803 = vmatpush1.bf16.msra.mxu1 %v4250_v9 }
 0x4d2   :  { %1763 = vmatprep.subr.bf16.mxu0 %v4253_v19  ;;  %1804 = vmatprep.subr.bf16.mxu1 %v4256_v52 }
 0x4d5   :  { %1764 = vmatpush1.bf16.msra.mxu0 %v4259_v51  ;;  %1805 = vmatpush1.bf16.msra.mxu1 %v4262_v53 }
 0x4d6   :  { %1765 = vmatprep.subr.bf16.mxu0 %v4265_v57  ;;  %1806 = vmatprep.subr.bf16.mxu1 %v4268_v59 }
 0x4d9   :  { %1766 = vmatpush1.bf16.msra.mxu0 %v4271_v4  ;;  %1807 = vmatpush1.bf16.msra.mxu1 %v4274_v0 }
 0x4da   :  { %1767 = vmatprep.subr.bf16.mxu0 %v4277_v6  ;;  %1808 = vmatprep.subr.bf16.mxu1 %v4280_v14 }
 0x4dd   :  { %1768 = vmatpush1.bf16.msra.mxu0 %v4283_v44  ;;  %1809 = vmatpush1.bf16.msra.mxu1 %v4286_v36  ;;  %v4500_v36 = vld [vmem:[#allocation5 + $0x10c] ss:$16 sps:$4 sm:$0xff]  }
 0x4de   :  { %1769 = vmatprep.subr.bf16.mxu0 %v4289_v43  ;;  %1810 = vmatprep.subr.bf16.mxu1 %v4292_v39  ;;  %5426 = vst [vmem:[#allocation43_spill] sm:$0xff] %v4500_v36  ;;  %v4503_v39 = vld [vmem:[#allocation5 + $0x100] ss:$16 sps:$4 sm:$0xff]  }
 0x4df   :  { %5427 = vst [vmem:[#allocation44_spill] sm:$0xff] %v4503_v39 }
 0x4e1   :  { %1770 = vmatpush1.bf16.msra.mxu0 %v4295_v47  ;;  %1811 = vmatpush1.bf16.msra.mxu1 %v4298_v49  ;;  %v4506_v49 = vld [vmem:[#allocation5 + $0x108] ss:$16 sps:$4 sm:$0xff]  }
 0x4e2   :  { %1771 = vmatprep.subr.bf16.mxu0 %v4301_v46  ;;  %1812 = vmatprep.subr.bf16.mxu1 %v4304_v41  ;;  %5428 = vst [vmem:[#allocation45_spill] sm:$0xff] %v4506_v49  ;;  %v4509_v41 = vld [vmem:[#allocation5 + $0x124] ss:$16 sps:$4 sm:$0xff]  }
 0x4e3   :  { %5429 = vst [vmem:[#allocation46_spill] sm:$0xff] %v4509_v41 }
 0x4e5   :  { %1772 = vmatpush1.bf16.msra.mxu0 %v4307_v35  ;;  %1813 = vmatpush1.bf16.msra.mxu1 %v4310_v25  ;;  %v4512_v25 = vld [vmem:[#allocation5 + $0x12c] ss:$16 sps:$4 sm:$0xff]  }
 0x4e6   :  { %1773 = vmatprep.subr.bf16.mxu0 %v4497_v42  ;;  %1814 = vmatprep.subr.bf16.mxu1 %v4500_v36  ;;  %5430 = vst [vmem:[#allocation47_spill] sm:$0xff] %v4512_v25  ;;  %v4515_v42 = vld [vmem:[#allocation5 + $0x120] ss:$16 sps:$4 sm:$0xff]   ;;  %v4518_v36 = vld [vmem:[#allocation5 + $0x128] ss:$16 sps:$4 sm:$0xff]  }
 0x4e7   :  { %5431 = vst [vmem:[#allocation24_spill] sm:$0xff] %v4515_v42  ;;  %5432 = vst [vmem:[#allocation25_spill] sm:$0xff] %v4518_v36 }
 0x4e9   :  { %1774 = vmatpush1.bf16.msra.mxu0 %v4503_v39  ;;  %1815 = vmatpush1.bf16.msra.mxu1 %v4506_v49  ;;  %v4521_v39 = vld [vmem:[#allocation5 + $0x144] ss:$16 sps:$4 sm:$0xff]   ;;  %v4524_v49 = vld [vmem:[#allocation5 + $0x14c] ss:$16 sps:$4 sm:$0xff]  }
 0x4ea   :  { %1775 = vmatprep.subr.bf16.mxu0 %v4509_v41  ;;  %1816 = vmatprep.subr.bf16.mxu1 %v4512_v25  ;;  %5433 = vst [vmem:[#allocation75_spill] sm:$0xff] %v4521_v39  ;;  %5434 = vst [vmem:[#allocation48_spill] sm:$0xff] %v4524_v49  ;;  %v4527_v41 = vld [vmem:[#allocation5 + $0x140] ss:$16 sps:$4 sm:$0xff]   ;;  %v4530_v25 = vld [vmem:[#allocation5 + $0x148] ss:$16 sps:$4 sm:$0xff]  }
 0x4eb   :  { %5435 = vst [vmem:[#allocation49_spill] sm:$0xff] %v4527_v41  ;;  %5436 = vst [vmem:[#allocation50_spill] sm:$0xff] %v4530_v25 }
 0x4ed   :  { %1776 = vmatpush1.bf16.msra.mxu0 %v4515_v42  ;;  %1817 = vmatpush1.bf16.msra.mxu1 %v4518_v36  ;;  %v4533_v42 = vld [vmem:[#allocation5 + $0x164] ss:$16 sps:$4 sm:$0xff]   ;;  %v4536_v36 = vld [vmem:[#allocation5 + $0x16c] ss:$16 sps:$4 sm:$0xff]  }
 0x4ee   :  { %1777 = vmatprep.subr.bf16.mxu0 %v4521_v39  ;;  %1818 = vmatprep.subr.bf16.mxu1 %v4524_v49  ;;  %5437 = vst [vmem:[#allocation51_spill] sm:$0xff] %v4533_v42  ;;  %5438 = vst [vmem:[#allocation52_spill] sm:$0xff] %v4536_v36  ;;  %v4539_v39 = vld [vmem:[#allocation5 + $0x160] ss:$16 sps:$4 sm:$0xff]   ;;  %v4542_v49 = vld [vmem:[#allocation5 + $0x168] ss:$16 sps:$4 sm:$0xff]  }
 0x4ef   :  { %5439 = vst [vmem:[#allocation53_spill] sm:$0xff] %v4539_v39  ;;  %5440 = vst [vmem:[#allocation54_spill] sm:$0xff] %v4542_v49 }
 0x4f1   :  { %1778 = vmatpush1.bf16.msra.mxu0 %v4527_v41  ;;  %1819 = vmatpush1.bf16.msra.mxu1 %v4530_v25  ;;  %v4545_v41 = vld [vmem:[#allocation5 + $0x184] ss:$16 sps:$4 sm:$0xff]   ;;  %v4548_v25 = vld [vmem:[#allocation5 + $0x18c] ss:$16 sps:$4 sm:$0xff]  }
 0x4f2   :  { %1779 = vmatprep.subr.bf16.mxu0 %v4533_v42  ;;  %1820 = vmatprep.subr.bf16.mxu1 %v4536_v36  ;;  %5441 = vst [vmem:[#allocation55_spill] sm:$0xff] %v4545_v41  ;;  %5442 = vst [vmem:[#allocation56_spill] sm:$0xff] %v4548_v25  ;;  %v4551_v42 = vld [vmem:[#allocation5 + $0x180] ss:$16 sps:$4 sm:$0xff]   ;;  %v4554_v36 = vld [vmem:[#allocation5 + $0x188] ss:$16 sps:$4 sm:$0xff]  }
 0x4f3   :  { %5443 = vst [vmem:[#allocation57_spill] sm:$0xff] %v4551_v42  ;;  %5444 = vst [vmem:[#allocation58_spill] sm:$0xff] %v4554_v36 }
 0x4f5   :  { %1780 = vmatpush1.bf16.msra.mxu0 %v4539_v39  ;;  %1821 = vmatpush1.bf16.msra.mxu1 %v4542_v49  ;;  %v4557_v39 = vld [vmem:[#allocation5 + $0x1a4] ss:$16 sps:$4 sm:$0xff]   ;;  %v4560_v49 = vld [vmem:[#allocation5 + $0x1ac] ss:$16 sps:$4 sm:$0xff]  }
 0x4f6   :  { %1781 = vmatprep.subr.bf16.mxu0 %v4545_v41  ;;  %1822 = vmatprep.subr.bf16.mxu1 %v4548_v25  ;;  %5445 = vst [vmem:[#allocation59_spill] sm:$0xff] %v4557_v39  ;;  %5446 = vst [vmem:[#allocation60_spill] sm:$0xff] %v4560_v49  ;;  %v4563_v41 = vld [vmem:[#allocation5 + $0x1a0] ss:$16 sps:$4 sm:$0xff]   ;;  %v4566_v25 = vld [vmem:[#allocation5 + $0x1a8] ss:$16 sps:$4 sm:$0xff]  }
 0x4f7   :  { %5447 = vst [vmem:[#allocation61_spill] sm:$0xff] %v4563_v41  ;;  %5448 = vst [vmem:[#allocation62_spill] sm:$0xff] %v4566_v25 }
 0x4f9   :  { %1782 = vmatpush1.bf16.msra.mxu0 %v4551_v42  ;;  %1823 = vmatpush1.bf16.msra.mxu1 %v4554_v36  ;;  %v4569_v42 = vld [vmem:[#allocation5 + $0x1c4] ss:$16 sps:$4 sm:$0xff]   ;;  %v4572_v36 = vld [vmem:[#allocation5 + $0x1cc] ss:$16 sps:$4 sm:$0xff]  }
 0x4fa   :  { %1783 = vmatprep.subr.bf16.mxu0 %v4557_v39  ;;  %1824 = vmatprep.subr.bf16.mxu1 %v4560_v49  ;;  %5449 = vst [vmem:[#allocation63_spill] sm:$0xff] %v4569_v42  ;;  %5450 = vst [vmem:[#allocation64_spill] sm:$0xff] %v4572_v36  ;;  %v4575_v39 = vld [vmem:[#allocation5 + $0x1c0] ss:$16 sps:$4 sm:$0xff]   ;;  %v4578_v49 = vld [vmem:[#allocation5 + $0x1c8] ss:$16 sps:$4 sm:$0xff]  }
 0x4fb   :  { %5451 = vst [vmem:[#allocation65_spill] sm:$0xff] %v4575_v39  ;;  %5452 = vst [vmem:[#allocation66_spill] sm:$0xff] %v4578_v49 }
 0x4fd   :  { %1784 = vmatpush1.bf16.msra.mxu0 %v4563_v41  ;;  %1825 = vmatpush1.bf16.msra.mxu1 %v4566_v25  ;;  %v4581_v41 = vld [vmem:[#allocation5 + $0x1e4] ss:$16 sps:$4 sm:$0xff]   ;;  %v4584_v25 = vld [vmem:[#allocation5 + $0x1ec] ss:$16 sps:$4 sm:$0xff]  }
 0x4fe   :  { %1785 = vmatprep.subr.bf16.mxu0 %v4569_v42  ;;  %1826 = vmatprep.subr.bf16.mxu1 %v4572_v36  ;;  %5453 = vst [vmem:[#allocation67_spill] sm:$0xff] %v4581_v41  ;;  %5454 = vst [vmem:[#allocation68_spill] sm:$0xff] %v4584_v25  ;;  %v4587_v42 = vld [vmem:[#allocation5 + $0x1e0] ss:$16 sps:$4 sm:$0xff]   ;;  %v4590_v36 = vld [vmem:[#allocation5 + $0x1e8] ss:$16 sps:$4 sm:$0xff]  }
 0x4ff   :  { %5455 = vst [vmem:[#allocation69_spill] sm:$0xff] %v4587_v42  ;;  %5456 = vst [vmem:[#allocation70_spill] sm:$0xff] %v4590_v36 }
 0x501   :  { %1786 = vmatpush1.bf16.msra.mxu0 %v4575_v39  ;;  %1827 = vmatpush1.bf16.msra.mxu1 %v4578_v49 }
 0x502   :  { %1787 = vmatprep.subr.bf16.mxu0 %v4581_v41  ;;  %1828 = vmatprep.subr.bf16.mxu1 %v4584_v25 }
 0x505   :  { %1788 = vmatpush1.bf16.msra.mxu0 %v4587_v42  ;;  %1829 = vmatpush1.bf16.msra.mxu1 %v4590_v36 }
 0x506   :  { %1863 = vmatprep.subr.bf16.mxu0 %v4345_v55  ;;  %1904 = vmatprep.subr.bf16.mxu1 %v4348_v37 }
 0x57b   :  { %v1570_v49 = vpop.f32.mrb[24].mxu0  ;;  %v1611_v39 = vpop.f32.mrb[32].mxu1 }
 0x57c   :  { %v1571_v41 = vadd.f32 %v1570_v49, %v5412_v15  ;;  %v1572_v35 = vpop.f32.mrb[25].mxu0  ;;  %v1613_v46 = vpop.f32.mrb[33].mxu1  ;;  %v1612_v37 = vadd.f32 %v1611_v39, %v5414_v16  ;;  %v5457_v39 = vld [vmem:[#allocation27_spill] sm:$0xff] }
 0x57d   :  { %v1573_v25 = vadd.f32 %v1572_v35, %v5366_v13  ;;  %v1574_v47 = vpop.f32.mrb[26].mxu0  ;;  %v1615_v43 = vpop.f32.mrb[34].mxu1  ;;  %v1614_v55 = vadd.f32 %v1613_v46, %v5413_v56 }
 0x57e   :  { %v2814_v44 = vmul.f32 -1.442695, %v1571_v41  ;;  %v1575_v42 = vpop.f32.mrb[27].mxu0  ;;  %v1616_v14 = vpop.f32.mrb[35].mxu1 }
 0x57f   :  { %v2816_v6 = vmul.f32 -1.442695, %v1573_v25  ;;  %v2815_v36 = vmul.f32 -1.442695, %v1614_v55 }
 0x580   :  { %3179 = vpow2.f32 %v2814_v44 }
 0x581   :  { %3181 = vpow2.f32 %v2816_v6 }
 0x582   :  { %3183 = vpow2.f32 %v2815_v36 }
 0x583   :  { %3185 = vtanh.f32 %v1612_v37 }
 0x58a   :  { %v3180_v0 = vpop.eup %3179 }
 0x58b   :  { %v3182_v4 = vpop.eup %3181  ;;  %v1621_v49 = vadd.f32 1.0, %v3180_v0 }
 0x58c   :  { %v1635_v15 = vadd.f32 1.0, %v3182_v4  ;;  %v3184_v43 = vpop.eup %3183  ;;  %v5458_v4 = vld [vmem:[#allocation28_spill] sm:$0xff] }
 0x58d   :  { %3187 = vrcp.f32 %v1621_v49  ;;  %v3186_v47 = vpop.eup %3185  ;;  %v1628_v44 = vadd.f32 1.0, %v3184_v43 }
 0x58e   :  { %3189 = vrcp.f32 %v1635_v15 }
 0x58f   :  { %3191 = vrcp.f32 %v1628_v44 }
 0x597   :  { %v3188_v41 = vpop.eup %3187 }
 0x598   :  { %v3190_v14 = vpop.eup %3189  ;;  %v1631_v35 = vmul.f32 %v3188_v41, %v3186_v47 }
 0x599   :  { %v1638_v6 = vmul.f32 %v3190_v14, %v4356_v32  ;;  %v5459_v32 = vld [vmem:[#allocation30_spill] sm:$0xff] }
 0x59b   :  { %v1676_v46 = vpop.f32.mrb[28].mxu0  ;;  %v1717_v25 = vpop.f32.mrb[36].mxu1  ;;  %v4600_v55 = vadd.f32 %v1638_v6, %v1631_v35 }
 0x59c   :  { %v1724_v0 = vadd.f32 %v1676_v46, %v5457_v39  ;;  %v1678_v36 = vpop.f32.mrb[29].mxu0  ;;  %v1719_v37 = vpop.f32.mrb[37].mxu1  ;;  %v5460_v46 = vld [vmem:[#allocation29_spill] sm:$0xff] }
 0x59d   :  { %v1725_v42 = vadd.f32 %v1678_v36, %v5458_v4  ;;  %v1680_v15 = vpop.f32.mrb[30].mxu0  ;;  %v1721_v49 = vpop.f32.mrb[38].mxu1  ;;  %3193 = vtanh.f32 %v4600_v55  ;;  %v1727_v14 = vadd.f32 %v1719_v37, %v5459_v32  ;;  %v1726_v39 = vadd.f32 %v1717_v25, %v5460_v46 }
 0x59e   :  { %v2817_v16 = vmul.f32 -1.442695, %v1724_v0  ;;  %v1681_v47 = vpop.f32.mrb[31].mxu0  ;;  %v1722_v43 = vpop.f32.mrb[39].mxu1 }
 0x59f   :  { %v2819_v41 = vmul.f32 -1.442695, %v1725_v42  ;;  %v3192_v35 = vpop.eup %3191  ;;  %v2818_v6 = vmul.f32 -1.442695, %v1727_v14  ;;  %v1749_v47 = vrot.slane %v4364_v30, 6  ;;  %v5461_v30 = vld [vmem:[#allocation18_spill] sm:$0xff] }
 0x5a0   :  { %3195 = vpow2.f32 %v2817_v16 }
 0x5a1   :  { %3197 = vpow2.f32 %v2819_v41 }
 0x5a2   :  { %3199 = vpow2.f32 %v2818_v6  ;;  %v5462_v6 = vld [vmem:[#allocation19_spill] sm:$0xff] }
 0x5a3   :  { %3201 = vtanh.f32 %v1726_v39 }
 0x5a7   :  { %v3194_v44 = vpop.eup %3193 }
 0x5a8   :  { %v1641_v56 = vmul.f32 %v3194_v44, %v3192_v35 }
 0x5aa   :  { %v3196_v13 = vpop.eup %3195  ;;  %v1756_v36 = vpack.c.bf16 %v1641_v56, %v1641_v56 }
 0x5ab   :  { %v3198_v15 = vpop.eup %3197  ;;  %v1731_v49 = vadd.f32 1.0, %v3196_v13 }
 0x5ac   :  { %v1745_v0 = vadd.f32 1.0, %v3198_v15  ;;  %1789 = vmatprep.mubr.bf16.mxu0 %v1756_v36  ;;  %1830 = vmatprep.mubr.bf16.mxu1 %v1756_v36  ;;  %v3200_v16 = vpop.eup %3199  ;;  %v5463_v36 = vld [vmem:[#allocation20_spill] sm:$0xff]  ;;  %v5464_v15 = vld [vmem:[#allocation21_spill] sm:$0xff] }
 0x5ad   :  { %3203 = vrcp.f32 %v1731_v49  ;;  %v3202_v42 = vpop.eup %3201  ;;  %v1738_v25 = vadd.f32 1.0, %v3200_v16  ;;  %v5465_v49 = vld [vmem:[#allocation22_spill] sm:$0xff]  ;;  %v5467_v16 = vld [vmem:[#allocation40_spill] sm:$0xff] }
 0x5ae   :  { %3205 = vrcp.f32 %v1745_v0  ;;  %v5466_v0 = vld [vmem:[#allocation23_spill] sm:$0xff] }
 0x5af   :  { %3207 = vrcp.f32 %v1738_v25  ;;  %v5491_v25 = vld [vmem:[#allocation75_spill] sm:$0xff] }
 0x5b7   :  { %v3204_v37 = vpop.eup %3203 }
 0x5b8   :  { %v3206_v43 = vpop.eup %3205  ;;  %v1741_v41 = vmul.f32 %v3204_v37, %v3202_v42  ;;  %v5468_v42 = vld [vmem:[#allocation41_spill] sm:$0xff]  ;;  %v5487_v37 = vld [vmem:[#allocation46_spill] sm:$0xff] }
 0x5b9   :  { %v1751_v14 = vmul.f32 %v3206_v43, %v1749_v47  ;;  %v3208_v13 = vpop.eup %3207  ;;  %v5488_v47 = vld [vmem:[#allocation47_spill] sm:$0xff]  ;;  %v5489_v43 = vld [vmem:[#allocation24_spill] sm:$0xff] }
 0x5bb   :  { %v4608_v35 = vadd.f32 %v1751_v14, %v1741_v41  ;;  %v5490_v41 = vld [vmem:[#allocation25_spill] sm:$0xff]  ;;  %v5492_v14 = vld [vmem:[#allocation48_spill] sm:$0xff] }
 0x5bd   :  { %3209 = vtanh.f32 %v4608_v35 }
 0x5c7   :  { %v3210_v56 = vpop.eup %3209 }
 0x5c8   :  { %v1754_v39 = vmul.f32 %v3210_v56, %v3208_v13  ;;  %v5493_v13 = vld [vmem:[#allocation49_spill] sm:$0xff]  ;;  %v5494_v56 = vld [vmem:[#allocation50_spill] sm:$0xff] }
 0x5ca   :  { %v1755_v44 = vpack.c.bf16 %v1754_v39, %v1754_v39  ;;  %v5495_v39 = vld [vmem:[#allocation51_spill] sm:$0xff] }
 0x5cc   :  { %1790 = vmatmul.mubr.bf16.vlgmr.msra.gmra.mrb[32].mxu0 %v1755_v44  ;;  %1831 = vmatmul.mubr.bf16.vlgmr.msra.gmra.mrb[40].mxu1 %v1755_v44 }
 0x5cd   :  { %1864 = vmatpush1.bf16.msra.mxu0 %v4371_v28  ;;  %1905 = vmatpush1.bf16.msra.mxu1 %v4374_v24 }
 0x5ce   :  { %1865 = vmatprep.subr.bf16.mxu0 %v4377_v12  ;;  %1906 = vmatprep.subr.bf16.mxu1 %v4380_v54 }
 0x5cf   :  { %1895 = vmatprep.mubr.bf16.mxu0 %v5308_v61  ;;  %1936 = vmatprep.mubr.bf16.mxu1 %v5308_v61 }
 0x5d1   :  { %1866 = vmatpush1.bf16.msra.mxu0 %v4385_v48  ;;  %1907 = vmatpush1.bf16.msra.mxu1 %v4388_v17 }
 0x5d2   :  { %1867 = vmatprep.subr.bf16.mxu0 %v4391_v18  ;;  %1908 = vmatprep.subr.bf16.mxu1 %v4394_v27 }
 0x5d5   :  { %1868 = vmatpush1.bf16.msra.mxu0 %v4397_v34  ;;  %1909 = vmatpush1.bf16.msra.mxu1 %v4400_v45 }
 0x5d6   :  { %1869 = vmatprep.subr.bf16.mxu0 %v4403_v5  ;;  %1910 = vmatprep.subr.bf16.mxu1 %v4406_v20 }
 0x5d9   :  { %1870 = vmatpush1.bf16.msra.mxu0 %v4409_v26  ;;  %1911 = vmatpush1.bf16.msra.mxu1 %v4412_v40 }
 0x5da   :  { %1871 = vmatprep.subr.bf16.mxu0 %v4415_v29  ;;  %1912 = vmatprep.subr.bf16.mxu1 %v4418_v11 }
 0x5dd   :  { %1872 = vmatpush1.bf16.msra.mxu0 %v5461_v30  ;;  %1913 = vmatpush1.bf16.msra.mxu1 %v5462_v6 }
 0x5de   :  { %1873 = vmatprep.subr.bf16.mxu0 %v5463_v36  ;;  %1914 = vmatprep.subr.bf16.mxu1 %v5464_v15 }
 0x5e1   :  { %1874 = vmatpush1.bf16.msra.mxu0 %v5465_v49  ;;  %1915 = vmatpush1.bf16.msra.mxu1 %v5466_v0 }
 0x5e2   :  { %1875 = vmatprep.subr.bf16.mxu0 %v5467_v16  ;;  %1916 = vmatprep.subr.bf16.mxu1 %v5468_v42 }
 0x5e5   :  { %1876 = vmatpush1.bf16.msra.mxu0 %v4445_v31  ;;  %1917 = vmatpush1.bf16.msra.mxu1 %v4448_v33 }
 0x5e6   :  { %1877 = vmatprep.subr.bf16.mxu0 %v4451_v22  ;;  %1918 = vmatprep.subr.bf16.mxu1 %v4454_v38 }
 0x5e9   :  { %1878 = vmatpush1.bf16.msra.mxu0 %v4457_v8  ;;  %1919 = vmatpush1.bf16.msra.mxu1 %v4460_v21 }
 0x5ea   :  { %1999 = vmatprep.subr.bf16.mxu0 %v4217_v2  ;;  %2040 = vmatprep.subr.bf16.mxu1 %v4220_v1  ;;  %v5469_v2 = vld [vmem:[#allocation32_spill] sm:$0xff]  ;;  %v5470_v1 = vld [vmem:[#allocation33_spill] sm:$0xff] }
 0x5ec   :  { %1896 = vmatmul.mubr.bf16.vlgmr.msra.gmra.mrb[36].mxu0 %v1755_v44  ;;  %1937 = vmatmul.mubr.bf16.vlgmr.msra.gmra.mrb[44].mxu1 %v1755_v44  ;;  %v5496_v44 = vld [vmem:[#allocation52_spill] sm:$0xff] }
 0x5ed   :  { %2000 = vmatpush1.bf16.msra.mxu0 %v4223_v50  ;;  %2041 = vmatpush1.bf16.msra.mxu1 %v4226_v58  ;;  %v5471_v50 = vld [vmem:[#allocation34_spill] sm:$0xff]  ;;  %v5472_v58 = vld [vmem:[#allocation35_spill] sm:$0xff] }
 0x5ee   :  { %2001 = vmatprep.subr.bf16.mxu0 %v4229_v60  ;;  %2042 = vmatprep.subr.bf16.mxu1 %v4232_v23  ;;  %v5473_v60 = vld [vmem:[#allocation36_spill] sm:$0xff]  ;;  %v5474_v23 = vld [vmem:[#allocation37_spill] sm:$0xff] }
 0x5f1   :  { %2002 = vmatpush1.bf16.msra.mxu0 %v4235_v62  ;;  %2043 = vmatpush1.bf16.msra.mxu1 %v4238_v63  ;;  %v5475_v62 = vld [vmem:[#allocation38_spill] sm:$0xff]  ;;  %v5476_v63 = vld [vmem:[#allocation39_spill] sm:$0xff] }
 0x5f2   :  { %2003 = vmatprep.subr.bf16.mxu0 %v4241_v7  ;;  %2044 = vmatprep.subr.bf16.mxu1 %v4244_v10  ;;  %v5477_v7 = vld [vmem:[#allocation10_spill] sm:$0xff]  ;;  %v5478_v10 = vld [vmem:[#allocation11_spill] sm:$0xff] }
 0x5f5   :  { %2004 = vmatpush1.bf16.msra.mxu0 %v4247_v3  ;;  %2045 = vmatpush1.bf16.msra.mxu1 %v4250_v9  ;;  %v5479_v3 = vld [vmem:[#allocation12_spill] sm:$0xff]  ;;  %v5480_v9 = vld [vmem:[#allocation13_spill] sm:$0xff] }
 0x5f6   :  { %2005 = vmatprep.subr.bf16.mxu0 %v4253_v19  ;;  %2046 = vmatprep.subr.bf16.mxu1 %v4256_v52  ;;  %v5481_v19 = vld [vmem:[#allocation14_spill] sm:$0xff]  ;;  %v5482_v52 = vld [vmem:[#allocation15_spill] sm:$0xff] }
 0x5f9   :  { %2006 = vmatpush1.bf16.msra.mxu0 %v4259_v51  ;;  %2047 = vmatpush1.bf16.msra.mxu1 %v4262_v53  ;;  %v5483_v51 = vld [vmem:[#allocation42_spill] sm:$0xff]  ;;  %v5484_v53 = vld [vmem:[#allocation43_spill] sm:$0xff] }
 0x5fa   :  { %2007 = vmatprep.subr.bf16.mxu0 %v4265_v57  ;;  %2048 = vmatprep.subr.bf16.mxu1 %v4268_v59  ;;  %v5485_v57 = vld [vmem:[#allocation44_spill] sm:$0xff]  ;;  %v5486_v59 = vld [vmem:[#allocation45_spill] sm:$0xff] }
 0x5fd   :  { %2008 = vmatpush1.bf16.msra.mxu0 %v5469_v2  ;;  %2049 = vmatpush1.bf16.msra.mxu1 %v5470_v1  ;;  %v5497_v2 = vld [vmem:[#allocation53_spill] sm:$0xff]  ;;  %v5498_v1 = vld [vmem:[#allocation54_spill] sm:$0xff] }
 0x5fe   :  { %2009 = vmatprep.subr.bf16.mxu0 %v5471_v50  ;;  %2050 = vmatprep.subr.bf16.mxu1 %v5472_v58  ;;  %v5499_v50 = vld [vmem:[#allocation55_spill] sm:$0xff]  ;;  %v5500_v58 = vld [vmem:[#allocation56_spill] sm:$0xff] }
 0x601   :  { %2010 = vmatpush1.bf16.msra.mxu0 %v5473_v60  ;;  %2051 = vmatpush1.bf16.msra.mxu1 %v5474_v23  ;;  %v5501_v60 = vld [vmem:[#allocation57_spill] sm:$0xff]  ;;  %v5502_v23 = vld [vmem:[#allocation58_spill] sm:$0xff] }
 0x602   :  { %2011 = vmatprep.subr.bf16.mxu0 %v5475_v62  ;;  %2052 = vmatprep.subr.bf16.mxu1 %v5476_v63  ;;  %v5503_v62 = vld [vmem:[#allocation59_spill] sm:$0xff]  ;;  %v5504_v63 = vld [vmem:[#allocation60_spill] sm:$0xff] }
 0x605   :  { %2012 = vmatpush1.bf16.msra.mxu0 %v5477_v7  ;;  %2053 = vmatpush1.bf16.msra.mxu1 %v5478_v10  ;;  %v5505_v7 = vld [vmem:[#allocation61_spill] sm:$0xff]  ;;  %v5506_v10 = vld [vmem:[#allocation62_spill] sm:$0xff] }
 0x606   :  { %2013 = vmatprep.subr.bf16.mxu0 %v5479_v3  ;;  %2054 = vmatprep.subr.bf16.mxu1 %v5480_v9  ;;  %v5507_v3 = vld [vmem:[#allocation63_spill] sm:$0xff]  ;;  %v5508_v9 = vld [vmem:[#allocation64_spill] sm:$0xff] }
 0x609   :  { %2014 = vmatpush1.bf16.msra.mxu0 %v5481_v19  ;;  %2055 = vmatpush1.bf16.msra.mxu1 %v5482_v52  ;;  %v5509_v19 = vld [vmem:[#allocation65_spill] sm:$0xff]  ;;  %v5510_v52 = vld [vmem:[#allocation66_spill] sm:$0xff] }
 0x60a   :  { %2015 = vmatprep.subr.bf16.mxu0 %v5483_v51  ;;  %2056 = vmatprep.subr.bf16.mxu1 %v5484_v53 }
 0x60d   :  { %2016 = vmatpush1.bf16.msra.mxu0 %v5485_v57  ;;  %2057 = vmatpush1.bf16.msra.mxu1 %v5486_v59 }
 0x60e   :  { %2017 = vmatprep.subr.bf16.mxu0 %v5487_v37  ;;  %2058 = vmatprep.subr.bf16.mxu1 %v5488_v47 }
 0x611   :  { %2018 = vmatpush1.bf16.msra.mxu0 %v5489_v43  ;;  %2059 = vmatpush1.bf16.msra.mxu1 %v5490_v41 }
 0x612   :  { %2019 = vmatprep.subr.bf16.mxu0 %v5491_v25  ;;  %2060 = vmatprep.subr.bf16.mxu1 %v5492_v14 }
 0x615   :  { %2020 = vmatpush1.bf16.msra.mxu0 %v5493_v13  ;;  %2061 = vmatpush1.bf16.msra.mxu1 %v5494_v56 }
 0x616   :  { %2021 = vmatprep.subr.bf16.mxu0 %v5495_v39  ;;  %2062 = vmatprep.subr.bf16.mxu1 %v5496_v44 }
 0x619   :  { %2022 = vmatpush1.bf16.msra.mxu0 %v5497_v2  ;;  %2063 = vmatpush1.bf16.msra.mxu1 %v5498_v1  ;;  %v5518_v2 = vld [vmem:[#allocation9_spill] sm:$0xff] }
 0x61a   :  { %2023 = vmatprep.subr.bf16.mxu0 %v5499_v50  ;;  %2064 = vmatprep.subr.bf16.mxu1 %v5500_v58  ;;  %v5511_v58 = vld [vmem:[#allocation67_spill] sm:$0xff]  ;;  %v5517_v50 = vld [vmem:[#allocation72_spill] sm:$0xff] }
 0x61d   :  { %2024 = vmatpush1.bf16.msra.mxu0 %v5501_v60  ;;  %2065 = vmatpush1.bf16.msra.mxu1 %v5502_v23  ;;  %v5512_v60 = vld [vmem:[#allocation68_spill] sm:$0xff]  ;;  %v5513_v23 = vld [vmem:[#allocation69_spill] sm:$0xff] }
 0x61e   :  { %2025 = vmatprep.subr.bf16.mxu0 %v5503_v62  ;;  %2066 = vmatprep.subr.bf16.mxu1 %v5504_v63  ;;  %v5514_v62 = vld [vmem:[#allocation70_spill] sm:$0xff]  ;;  %v5515_v63 = vld [vmem:[#allocation16_spill] sm:$0xff] }
 0x621   :  { %2026 = vmatpush1.bf16.msra.mxu0 %v5505_v7  ;;  %2067 = vmatpush1.bf16.msra.mxu1 %v5506_v10  ;;  %v5516_v7 = vld [vmem:[#allocation17_spill] sm:$0xff] }
 0x622   :  { %2027 = vmatprep.subr.bf16.mxu0 %v5507_v3  ;;  %2068 = vmatprep.subr.bf16.mxu1 %v5508_v9 }
 0x625   :  { %2028 = vmatpush1.bf16.msra.mxu0 %v5509_v19  ;;  %2069 = vmatpush1.bf16.msra.mxu1 %v5510_v52 }
 0x626   :  { %2029 = vmatprep.subr.bf16.mxu0 %v5511_v58  ;;  %2070 = vmatprep.subr.bf16.mxu1 %v5512_v60 }
 0x629   :  { %2030 = vmatpush1.bf16.msra.mxu0 %v5513_v23  ;;  %2071 = vmatpush1.bf16.msra.mxu1 %v5514_v62  ;;  %v5519_v62 = vld [vmem:[#allocation73_spill] sm:$0xff] }
 0x62a   :  { %2105 = vmatprep.subr.bf16.mxu0 %v5515_v63  ;;  %2146 = vmatprep.subr.bf16.mxu1 %v5516_v7  ;;  %v5520_v7 = vld [vmem:[#allocation74_spill] sm:$0xff] }
 0x69f   :  { %v1791_v10 = vpop.f32.mrb[32].mxu0  ;;  %v1832_v3 = vpop.f32.mrb[40].mxu1 }
 0x6a0   :  { %v1792_v9 = vadd.f32 %v1791_v10, %v5517_v50  ;;  %v1793_v1 = vpop.f32.mrb[33].mxu0  ;;  %v1834_v19 = vpop.f32.mrb[41].mxu1  ;;  %v1833_v14 = vadd.f32 %v1832_v3, %v5520_v7 }
 0x6a1   :  { %v1794_v52 = vadd.f32 %v1793_v1, %v5518_v2  ;;  %v1795_v44 = vpop.f32.mrb[34].mxu0  ;;  %v1836_v58 = vpop.f32.mrb[42].mxu1  ;;  %v1835_v63 = vadd.f32 %v1834_v19, %v5519_v62 }
 0x6a2   :  { %v2820_v39 = vmul.f32 -1.442695, %v1792_v9  ;;  %v1796_v60 = vpop.f32.mrb[35].mxu0  ;;  %v1837_v56 = vpop.f32.mrb[43].mxu1 }
 0x6a3   :  { %v2822_v23 = vmul.f32 -1.442695, %v1794_v52  ;;  %v2821_v13 = vmul.f32 -1.442695, %v1835_v63 }
 0x6a4   :  { %3211 = vpow2.f32 %v2820_v39 }
 0x6a5   :  { %3213 = vpow2.f32 %v2822_v23 }
 0x6a6   :  { %3215 = vpow2.f32 %v2821_v13 }
 0x6a7   :  { %3217 = vtanh.f32 %v1833_v14 }
 0x6ae   :  { %v3212_v25 = vpop.eup %3211 }
 0x6af   :  { %v3214_v41 = vpop.eup %3213  ;;  %v1842_v10 = vadd.f32 1.0, %v3212_v25 }
 0x6b0   :  { %v1856_v50 = vadd.f32 1.0, %v3214_v41  ;;  %v3216_v44 = vpop.eup %3215 }
 0x6b1   :  { %3219 = vrcp.f32 %v1842_v10  ;;  %v3218_v1 = vpop.eup %3217  ;;  %v1849_v39 = vadd.f32 1.0, %v3216_v44 }
 0x6b2   :  { %3221 = vrcp.f32 %v1856_v50  ;;  %v5522_v50 = vld [vmem:[#allocation27_spill] sm:$0xff] }
 0x6b3   :  { %3223 = vrcp.f32 %v1849_v39 }
 0x6bb   :  { %v3220_v58 = vpop.eup %3219 }
 0x6bc   :  { %v3222_v56 = vpop.eup %3221  ;;  %v1852_v60 = vmul.f32 %v3220_v58, %v3218_v1 }
 0x6bd   :  { %v1859_v23 = vmul.f32 %v3222_v56, %v4600_v55  ;;  %v3224_v39 = vpop.eup %3223 }
 0x6bf   :  { %v4714_v9 = vadd.f32 %v1859_v23, %v1852_v60  ;;  %v1897_v19 = vpop.f32.mrb[36].mxu0  ;;  %v1938_v3 = vpop.f32.mrb[44].mxu1 }
 0x6c0   :  { %v1949_v52 = vrot.slane %v1897_v19, 6  ;;  %v1899_v25 = vpop.f32.mrb[37].mxu0  ;;  %v1940_v13 = vpop.f32.mrb[45].mxu1  ;;  %v1951_v23 = vrot.slane %v1938_v3, 6 }
 0x6c1   :  { %5521 = vst [vmem:[#allocation71_spill] sm:$0xff] %v4714_v9  ;;  %v1950_v14 = vrot.slane %v1899_v25, 6  ;;  %v1901_v41 = vpop.f32.mrb[38].mxu0  ;;  %v1942_v63 = vpop.f32.mrb[46].mxu1  ;;  %3225 = vtanh.f32 %v4714_v9  ;;  %v1952_v56 = vrot.slane %v1940_v13, 6 }
 0x6c2   :  { %v1957_v10 = vadd.f32 %v1949_v52, %v5522_v50  ;;  %v1902_v7 = vpop.f32.mrb[39].mxu0  ;;  %v1943_v1 = vpop.f32.mrb[47].mxu1  ;;  %v1959_v63 = vadd.f32 %v1951_v23, %v5460_v46 }
 0x6c3   :  { %v1958_v44 = vadd.f32 %v1950_v14, %v5458_v4  ;;  %v1960_v60 = vadd.f32 %v1952_v56, %v5459_v32 }
 0x6c4   :  { %v2823_v55 = vmul.f32 -1.442695, %v1957_v10 }
 0x6c5   :  { %v2825_v58 = vmul.f32 -1.442695, %v1958_v44  ;;  %v2824_v41 = vmul.f32 -1.442695, %v1960_v60 }
 0x6c6   :  { %3227 = vpow2.f32 %v2823_v55  ;;  %v1982_v55 = vrot.slane %v4608_v35, 6  ;;  %v4823_v35 = vld [vmem:[#allocation5 + $0xa0] ss:$16 sps:$4 sm:$0xff]  }
 0x6c7   :  { %3229 = vpow2.f32 %v2825_v58 }
 0x6c8   :  { %3231 = vpow2.f32 %v2824_v41 }
 0x6c9   :  { %3233 = vtanh.f32 %v1959_v63  ;;  %v4850_v63 = vld [vmem:[#allocation5 + $0xe8] ss:$16 sps:$4 sm:$0xff]  }
 0x6cb   :  { %v3226_v19 = vpop.eup %3225 }
 0x6cc   :  { %v1862_v25 = vmul.f32 %v3226_v19, %v3224_v39 }
 0x6ce   :  { %v1989_v9 = vrot.slane %v1862_v25, 6 }
 0x6d0   :  { %v3228_v52 = vpop.eup %3227  ;;  %v1992_v7 = vpack.c.bf16 %v1989_v9, %v1989_v9 }
 0x6d1   :  { %v3230_v1 = vpop.eup %3229  ;;  %v1964_v50 = vadd.f32 1.0, %v3228_v52  ;;  %v5523_v52 = vld [vmem:[#allocation25_spill] sm:$0xff] }
 0x6d2   :  { %v1978_v14 = vadd.f32 1.0, %v3230_v1  ;;  %v1996_v13 = vrot.slane %v1992_v7, 1  ;;  %v3232_v10 = vpop.eup %3231  ;;  %v5524_v7 = vld [vmem:[#allocation75_spill] sm:$0xff]  ;;  %v5525_v1 = vld [vmem:[#allocation48_spill] sm:$0xff] }
 0x6d3   :  { %3235 = vrcp.f32 %v1964_v50  ;;  %v3234_v3 = vpop.eup %3233  ;;  %v1971_v60 = vadd.f32 1.0, %v3232_v10  ;;  %v5535_v10 = vld [vmem:[#allocation58_spill] sm:$0xff] }
 0x6d4   :  { %3237 = vrcp.f32 %v1978_v14  ;;  %2031 = vmatprep.mubr.bf16.mxu0 %v1996_v13  ;;  %2072 = vmatprep.mubr.bf16.mxu1 %v1996_v13  ;;  %v5526_v14 = vld [vmem:[#allocation49_spill] sm:$0xff] }
 0x6d5   :  { %3239 = vrcp.f32 %v1971_v60  ;;  %v5534_v13 = vld [vmem:[#allocation57_spill] sm:$0xff]  ;;  %v5541_v60 = vld [vmem:[#allocation64_spill] sm:$0xff] }
 0x6dd   :  { %v3236_v44 = vpop.eup %3235 }
 0x6de   :  { %v3238_v58 = vpop.eup %3237  ;;  %v1974_v56 = vmul.f32 %v3236_v44, %v3234_v3  ;;  %v5536_v3 = vld [vmem:[#allocation59_spill] sm:$0xff]  ;;  %v5537_v44 = vld [vmem:[#allocation60_spill] sm:$0xff] }
 0x6df   :  { %v1984_v39 = vmul.f32 %v3238_v58, %v1982_v55  ;;  %v3240_v23 = vpop.eup %3239  ;;  %v5538_v55 = vld [vmem:[#allocation61_spill] sm:$0xff]  ;;  %v5539_v58 = vld [vmem:[#allocation62_spill] sm:$0xff] }
 0x6e1   :  { %v4722_v9 = vadd.f32 %v1984_v39, %v1974_v56  ;;  %v5540_v56 = vld [vmem:[#allocation63_spill] sm:$0xff]  ;;  %v5542_v39 = vld [vmem:[#allocation65_spill] sm:$0xff] }
 0x6e3   :  { %3241 = vtanh.f32 %v4722_v9 }
 0x6ed   :  { %v3242_v19 = vpop.eup %3241 }
 0x6ee   :  { %v1987_v50 = vmul.f32 %v3242_v19, %v3240_v23  ;;  %v5543_v23 = vld [vmem:[#allocation66_spill] sm:$0xff]  ;;  %v5544_v19 = vld [vmem:[#allocation67_spill] sm:$0xff] }
 0x6f0   :  { %v1991_v25 = vpack.c.bf16 %v1987_v50, %v1987_v50  ;;  %v5545_v50 = vld [vmem:[#allocation68_spill] sm:$0xff] }
 0x6f2   :  { %v1995_v41 = vrot.slane %v1991_v25, 1  ;;  %v5546_v25 = vld [vmem:[#allocation69_spill] sm:$0xff] }
 0x6f4   :  { %2032 = vmatmul.mubr.bf16.vlgmr.msra.gmra.mrb[40].mxu0 %v1995_v41  ;;  %2073 = vmatmul.mubr.bf16.vlgmr.msra.gmra.mrb[48].mxu1 %v1995_v41 }
 0x6f5   :  { %2106 = vmatpush1.bf16.msra.mxu0 %v4371_v28  ;;  %2147 = vmatpush1.bf16.msra.mxu1 %v4374_v24  ;;  %v4757_v28 = vld [vmem:[#allocation5 + $0x4] ss:$16 sps:$4 sm:$0xff]   ;;  %v4760_v24 = vld [vmem:[#allocation5 + $0xc] ss:$16 sps:$4 sm:$0xff]  }
 0x6f6   :  { %2107 = vmatprep.subr.bf16.mxu0 %v4377_v12  ;;  %2148 = vmatprep.subr.bf16.mxu1 %v4380_v54  ;;  %v4763_v12 = vld [vmem:[#allocation5] ss:$16 sps:$4 sm:$0xff]   ;;  %v4766_v54 = vld [vmem:[#allocation5 + $0x8] ss:$16 sps:$4 sm:$0xff]  }
 0x6f7   :  { %2137 = vmatprep.mubr.bf16.mxu0 %v5308_v61  ;;  %2178 = vmatprep.mubr.bf16.mxu1 %v5308_v61 }
 0x6f9   :  { %2108 = vmatpush1.bf16.msra.mxu0 %v4385_v48  ;;  %2149 = vmatpush1.bf16.msra.mxu1 %v4388_v17  ;;  %v4769_v48 = vld [vmem:[#allocation5 + $0x24] ss:$16 sps:$4 sm:$0xff]   ;;  %v4772_v17 = vld [vmem:[#allocation5 + $0x2c] ss:$16 sps:$4 sm:$0xff]  }
 0x6fa   :  { %2109 = vmatprep.subr.bf16.mxu0 %v4391_v18  ;;  %2150 = vmatprep.subr.bf16.mxu1 %v4394_v27  ;;  %v4775_v18 = vld [vmem:[#allocation5 + $0x20] ss:$16 sps:$4 sm:$0xff]   ;;  %v4778_v27 = vld [vmem:[#allocation5 + $0x28] ss:$16 sps:$4 sm:$0xff]  }
 0x6fd   :  { %2110 = vmatpush1.bf16.msra.mxu0 %v4397_v34  ;;  %2151 = vmatpush1.bf16.msra.mxu1 %v4400_v45  ;;  %v4781_v34 = vld [vmem:[#allocation5 + $0x44] ss:$16 sps:$4 sm:$0xff]   ;;  %v4784_v45 = vld [vmem:[#allocation5 + $0x4c] ss:$16 sps:$4 sm:$0xff]  }
 0x6fe   :  { %2111 = vmatprep.subr.bf16.mxu0 %v4403_v5  ;;  %2152 = vmatprep.subr.bf16.mxu1 %v4406_v20  ;;  %v4787_v5 = vld [vmem:[#allocation5 + $0x40] ss:$16 sps:$4 sm:$0xff]   ;;  %v4790_v20 = vld [vmem:[#allocation5 + $0x48] ss:$16 sps:$4 sm:$0xff]  }
 0x701   :  { %2112 = vmatpush1.bf16.msra.mxu0 %v4409_v26  ;;  %2153 = vmatpush1.bf16.msra.mxu1 %v4412_v40  ;;  %v4793_v26 = vld [vmem:[#allocation5 + $0x64] ss:$16 sps:$4 sm:$0xff]   ;;  %v4796_v40 = vld [vmem:[#allocation5 + $0x6c] ss:$16 sps:$4 sm:$0xff]  }
 0x702   :  { %2113 = vmatprep.subr.bf16.mxu0 %v4415_v29  ;;  %2154 = vmatprep.subr.bf16.mxu1 %v4418_v11  ;;  %v4799_v29 = vld [vmem:[#allocation5 + $0x60] ss:$16 sps:$4 sm:$0xff]   ;;  %v4802_v11 = vld [vmem:[#allocation5 + $0x68] ss:$16 sps:$4 sm:$0xff]  }
 0x705   :  { %2114 = vmatpush1.bf16.msra.mxu0 %v5461_v30  ;;  %2155 = vmatpush1.bf16.msra.mxu1 %v5462_v6  ;;  %v4826_v30 = vld [vmem:[#allocation5 + $0xa8] ss:$16 sps:$4 sm:$0xff]   ;;  %v4829_v6 = vld [vmem:[#allocation5 + $0xc4] ss:$16 sps:$4 sm:$0xff]  }
 0x706   :  { %2115 = vmatprep.subr.bf16.mxu0 %v5463_v36  ;;  %2156 = vmatprep.subr.bf16.mxu1 %v5464_v15  ;;  %v4832_v36 = vld [vmem:[#allocation5 + $0xcc] ss:$16 sps:$4 sm:$0xff]   ;;  %v4835_v15 = vld [vmem:[#allocation5 + $0xc0] ss:$16 sps:$4 sm:$0xff]  }
 0x709   :  { %2116 = vmatpush1.bf16.msra.mxu0 %v5465_v49  ;;  %2157 = vmatpush1.bf16.msra.mxu1 %v5466_v0  ;;  %v4838_v49 = vld [vmem:[#allocation5 + $0xc8] ss:$16 sps:$4 sm:$0xff]   ;;  %v4841_v0 = vld [vmem:[#allocation5 + $0xe4] ss:$16 sps:$4 sm:$0xff]  }
 0x70a   :  { %2117 = vmatprep.subr.bf16.mxu0 %v5467_v16  ;;  %2158 = vmatprep.subr.bf16.mxu1 %v5468_v42  ;;  %v4844_v16 = vld [vmem:[#allocation5 + $0xec] ss:$16 sps:$4 sm:$0xff]   ;;  %v4847_v42 = vld [vmem:[#allocation5 + $0xe0] ss:$16 sps:$4 sm:$0xff]  }
 0x70d   :  { %2118 = vmatpush1.bf16.msra.mxu0 %v4445_v31  ;;  %2159 = vmatpush1.bf16.msra.mxu1 %v4448_v33  ;;  %v4811_v31 = vld [vmem:[#allocation5 + $0x80] ss:$16 sps:$4 sm:$0xff]   ;;  %v4814_v33 = vld [vmem:[#allocation5 + $0x88] ss:$16 sps:$4 sm:$0xff]  }
 0x70e   :  { %2119 = vmatprep.subr.bf16.mxu0 %v4451_v22  ;;  %2160 = vmatprep.subr.bf16.mxu1 %v4454_v38  ;;  %v4817_v22 = vld [vmem:[#allocation5 + $0xa4] ss:$16 sps:$4 sm:$0xff]   ;;  %v4820_v38 = vld [vmem:[#allocation5 + $0xac] ss:$16 sps:$4 sm:$0xff]  }
 0x711   :  { %2120 = vmatpush1.bf16.msra.mxu0 %v4457_v8  ;;  %2161 = vmatpush1.bf16.msra.mxu1 %v4460_v21  ;;  %v4805_v8 = vld [vmem:[#allocation5 + $0x84] ss:$16 sps:$4 sm:$0xff]   ;;  %v4808_v21 = vld [vmem:[#allocation5 + $0x8c] ss:$16 sps:$4 sm:$0xff]  }
 0x712   :  { %2241 = vmatprep.subr.bf16.mxu0 %v4757_v28  ;;  %2282 = vmatprep.subr.bf16.mxu1 %v4760_v24 }
 0x714   :  { %2138 = vmatmul.mubr.bf16.vlgmr.msra.gmra.mrb[44].mxu0 %v1995_v41  ;;  %2179 = vmatmul.mubr.bf16.vlgmr.msra.gmra.mrb[52].mxu1 %v1995_v41  ;;  %v5547_v41 = vld [vmem:[#allocation70_spill] sm:$0xff] }
 0x715   :  { %2242 = vmatpush1.bf16.msra.mxu0 %v4763_v12  ;;  %2283 = vmatpush1.bf16.msra.mxu1 %v4766_v54 }
 0x716   :  { %2243 = vmatprep.subr.bf16.mxu0 %v4769_v48  ;;  %2284 = vmatprep.subr.bf16.mxu1 %v4772_v17 }
 0x719   :  { %2244 = vmatpush1.bf16.msra.mxu0 %v4775_v18  ;;  %2285 = vmatpush1.bf16.msra.mxu1 %v4778_v27 }
 0x71a   :  { %2245 = vmatprep.subr.bf16.mxu0 %v4781_v34  ;;  %2286 = vmatprep.subr.bf16.mxu1 %v4784_v45 }
 0x71d   :  { %2246 = vmatpush1.bf16.msra.mxu0 %v4787_v5  ;;  %2287 = vmatpush1.bf16.msra.mxu1 %v4790_v20 }
 0x71e   :  { %2247 = vmatprep.subr.bf16.mxu0 %v4793_v26  ;;  %2288 = vmatprep.subr.bf16.mxu1 %v4796_v40 }
 0x721   :  { %2248 = vmatpush1.bf16.msra.mxu0 %v4799_v29  ;;  %2289 = vmatpush1.bf16.msra.mxu1 %v4802_v11 }
 0x722   :  { %2249 = vmatprep.subr.bf16.mxu0 %v4805_v8  ;;  %2290 = vmatprep.subr.bf16.mxu1 %v4808_v21 }
 0x725   :  { %2250 = vmatpush1.bf16.msra.mxu0 %v4811_v31  ;;  %2291 = vmatpush1.bf16.msra.mxu1 %v4814_v33 }
 0x726   :  { %2251 = vmatprep.subr.bf16.mxu0 %v4817_v22  ;;  %2292 = vmatprep.subr.bf16.mxu1 %v4820_v38 }
 0x729   :  { %2252 = vmatpush1.bf16.msra.mxu0 %v4823_v35  ;;  %2293 = vmatpush1.bf16.msra.mxu1 %v4826_v30 }
 0x72a   :  { %2253 = vmatprep.subr.bf16.mxu0 %v4829_v6  ;;  %2294 = vmatprep.subr.bf16.mxu1 %v4832_v36 }
 0x72d   :  { %2254 = vmatpush1.bf16.msra.mxu0 %v4835_v15  ;;  %2295 = vmatpush1.bf16.msra.mxu1 %v4838_v49 }
 0x72e   :  { %2255 = vmatprep.subr.bf16.mxu0 %v4841_v0  ;;  %2296 = vmatprep.subr.bf16.mxu1 %v4844_v16 }
 0x731   :  { %2256 = vmatpush1.bf16.msra.mxu0 %v4847_v42  ;;  %2297 = vmatpush1.bf16.msra.mxu1 %v4850_v63 }
 0x732   :  { %2257 = vmatprep.subr.bf16.mxu0 %v5483_v51  ;;  %2298 = vmatprep.subr.bf16.mxu1 %v5484_v53  ;;  %v5527_v51 = vld [vmem:[#allocation50_spill] sm:$0xff]  ;;  %v5528_v53 = vld [vmem:[#allocation51_spill] sm:$0xff] }
 0x735   :  { %2258 = vmatpush1.bf16.msra.mxu0 %v5485_v57  ;;  %2299 = vmatpush1.bf16.msra.mxu1 %v5486_v59  ;;  %v5529_v57 = vld [vmem:[#allocation52_spill] sm:$0xff]  ;;  %v5530_v59 = vld [vmem:[#allocation53_spill] sm:$0xff] }
 0x736   :  { %2259 = vmatprep.subr.bf16.mxu0 %v5487_v37  ;;  %2300 = vmatprep.subr.bf16.mxu1 %v5488_v47  ;;  %v5531_v37 = vld [vmem:[#allocation54_spill] sm:$0xff]  ;;  %v5532_v47 = vld [vmem:[#allocation55_spill] sm:$0xff] }
 0x739   :  { %2260 = vmatpush1.bf16.msra.mxu0 %v5489_v43  ;;  %2301 = vmatpush1.bf16.msra.mxu1 %v5523_v52  ;;  %v5533_v43 = vld [vmem:[#allocation56_spill] sm:$0xff]  ;;  %v3451_v52 = vld [vmem:[#allocation3 + $0x4] ss:$16 sps:$4 sm:$0xff]  }
 0x73a   :  { %2261 = vmatprep.subr.bf16.mxu0 %v5524_v7  ;;  %2302 = vmatprep.subr.bf16.mxu1 %v5525_v1  ;;  %v3452_v7 = vld [vmem:[#allocation3 + $0xc] ss:$16 sps:$4 sm:$0xff]  }
 0x73d   :  { %2262 = vmatpush1.bf16.msra.mxu0 %v5526_v14  ;;  %2303 = vmatpush1.bf16.msra.mxu1 %v5527_v51  ;;  %v5548_v51 = vld [vmem:[#allocation72_spill] sm:$0xff] }
 0x73e   :  { %2263 = vmatprep.subr.bf16.mxu0 %v5528_v53  ;;  %2304 = vmatprep.subr.bf16.mxu1 %v5529_v57 }
 0x741   :  { %2264 = vmatpush1.bf16.msra.mxu0 %v5530_v59  ;;  %2305 = vmatpush1.bf16.msra.mxu1 %v5531_v37 }
 0x742   :  { %2265 = vmatprep.subr.bf16.mxu0 %v5532_v47  ;;  %2306 = vmatprep.subr.bf16.mxu1 %v5533_v43 }
 0x745   :  { %2266 = vmatpush1.bf16.msra.mxu0 %v5534_v13  ;;  %2307 = vmatpush1.bf16.msra.mxu1 %v5535_v10 }
 0x746   :  { %2267 = vmatprep.subr.bf16.mxu0 %v5536_v3  ;;  %2308 = vmatprep.subr.bf16.mxu1 %v5537_v44 }
 0x749   :  { %2268 = vmatpush1.bf16.msra.mxu0 %v5538_v55  ;;  %2309 = vmatpush1.bf16.msra.mxu1 %v5539_v58 }
 0x74a   :  { %2269 = vmatprep.subr.bf16.mxu0 %v5540_v56  ;;  %2310 = vmatprep.subr.bf16.mxu1 %v5541_v60  ;;  %v5549_v56 = vld [vmem:[#allocation74_spill] sm:$0xff] }
 0x74d   :  { %2270 = vmatpush1.bf16.msra.mxu0 %v5542_v39  ;;  %2311 = vmatpush1.bf16.msra.mxu1 %v5543_v23 }
 0x74e   :  { %2271 = vmatprep.subr.bf16.mxu0 %v5544_v19  ;;  %2312 = vmatprep.subr.bf16.mxu1 %v5545_v50 }
 0x751   :  { %2272 = vmatpush1.bf16.msra.mxu0 %v5546_v25  ;;  %2313 = vmatpush1.bf16.msra.mxu1 %v5547_v41 }
 0x752   :  { %2347 = vmatprep.subr.bf16.mxu0 %v3451_v52  ;;  %2388 = vmatprep.subr.bf16.mxu1 %v3452_v7 }
 0x7c7   :  { %v2033_v1 = vpop.f32.mrb[40].mxu0  ;;  %v2074_v14 = vpop.f32.mrb[48].mxu1 }
 0x7c8   :  { %v2034_v53 = vadd.f32 %v2033_v1, %v5548_v51  ;;  %v2035_v57 = vpop.f32.mrb[41].mxu0  ;;  %v2076_v59 = vpop.f32.mrb[49].mxu1  ;;  %v2075_v60 = vadd.f32 %v2074_v14, %v5549_v56 }
 0x7c9   :  { %v2036_v37 = vadd.f32 %v2035_v57, %v5518_v2  ;;  %v2037_v47 = vpop.f32.mrb[42].mxu0  ;;  %v2078_v43 = vpop.f32.mrb[50].mxu1  ;;  %v2077_v55 = vadd.f32 %v2076_v59, %v5519_v62  ;;  %v5550_v57 = vld [vmem:[#allocation71_spill] sm:$0xff] }
 0x7ca   :  { %v2826_v13 = vmul.f32 -1.442695, %v2034_v53  ;;  %v2038_v10 = vpop.f32.mrb[43].mxu0  ;;  %v2079_v3 = vpop.f32.mrb[51].mxu1 }
 0x7cb   :  { %v2828_v44 = vmul.f32 -1.442695, %v2036_v37  ;;  %v2827_v58 = vmul.f32 -1.442695, %v2077_v55 }
 0x7cc   :  { %3243 = vpow2.f32 %v2826_v13 }
 0x7cd   :  { %3245 = vpow2.f32 %v2828_v44 }
 0x7ce   :  { %3247 = vpow2.f32 %v2827_v58  ;;  %v5551_v58 = vld [vmem:[#allocation27_spill] sm:$0xff] }
 0x7cf   :  { %3249 = vtanh.f32 %v2075_v60 }
 0x7d6   :  { %v3244_v39 = vpop.eup %3243 }
 0x7d7   :  { %v3246_v23 = vpop.eup %3245  ;;  %v2084_v19 = vadd.f32 1.0, %v3244_v39 }
 0x7d8   :  { %v2098_v50 = vadd.f32 1.0, %v3246_v23  ;;  %v3248_v25 = vpop.eup %3247 }
 0x7d9   :  { %3251 = vrcp.f32 %v2084_v19  ;;  %v3250_v41 = vpop.eup %3249  ;;  %v2091_v53 = vadd.f32 1.0, %v3248_v25 }
 0x7da   :  { %3253 = vrcp.f32 %v2098_v50 }
 0x7db   :  { %3255 = vrcp.f32 %v2091_v53 }
 0x7e3   :  { %v3252_v52 = vpop.eup %3251 }
 0x7e4   :  { %v3254_v7 = vpop.eup %3253  ;;  %v2094_v1 = vmul.f32 %v3252_v52, %v3250_v41 }
 0x7e5   :  { %v2101_v37 = vmul.f32 %v3254_v7, %v5550_v57  ;;  %v3256_v7 = vpop.eup %3255 }
 0x7e7   :  { %v4890_v59 = vadd.f32 %v2101_v37, %v2094_v1  ;;  %v2139_v47 = vpop.f32.mrb[44].mxu0  ;;  %v2180_v14 = vpop.f32.mrb[52].mxu1 }
 0x7e8   :  { %v2191_v43 = vrot.slane %v2139_v47, 4  ;;  %v2141_v13 = vpop.f32.mrb[45].mxu0  ;;  %v2182_v10 = vpop.f32.mrb[53].mxu1  ;;  %v2193_v1 = vrot.slane %v2180_v14, 4 }
 0x7e9   :  { %v2192_v3 = vrot.slane %v2141_v13, 4  ;;  %v2143_v44 = vpop.f32.mrb[46].mxu0  ;;  %v2184_v55 = vpop.f32.mrb[54].mxu1  ;;  %3257 = vtanh.f32 %v4890_v59  ;;  %v2194_v41 = vrot.slane %v2182_v10, 4 }
 0x7ea   :  { %v2199_v60 = vadd.f32 %v2191_v43, %v5551_v58  ;;  %v2144_v39 = vpop.f32.mrb[47].mxu0  ;;  %v2185_v23 = vpop.f32.mrb[55].mxu1  ;;  %v2201_v47 = vadd.f32 %v2193_v1, %v5460_v46 }
 0x7eb   :  { %v2200_v19 = vadd.f32 %v2192_v3, %v5458_v4  ;;  %v2202_v52 = vadd.f32 %v2194_v41, %v5459_v32 }
 0x7ec   :  { %v2829_v50 = vmul.f32 -1.442695, %v2199_v60 }
 0x7ed   :  { %v2831_v25 = vmul.f32 -1.442695, %v2200_v19  ;;  %v2830_v37 = vmul.f32 -1.442695, %v2202_v52  ;;  %v2224_v19 = vrot.slane %v4722_v9, 6 }
 0x7ee   :  { %3259 = vpow2.f32 %v2829_v50  ;;  %v3453_v9 = vld [vmem:[#allocation3] ss:$16 sps:$4 sm:$0xff]  }
 0x7ef   :  { %3261 = vpow2.f32 %v2831_v25 }
 0x7f0   :  { %3263 = vpow2.f32 %v2830_v37 }
 0x7f1   :  { %3265 = vtanh.f32 %v2201_v47 }
 0x7f3   :  { %v3258_v53 = vpop.eup %3257 }
 0x7f4   :  { %v2104_v57 = vmul.f32 %v3258_v53, %v3256_v7 }
 0x7f6   :  { %v2231_v13 = vrot.slane %v2104_v57, 4 }
 0x7f8   :  { %v3260_v43 = vpop.eup %3259  ;;  %v2234_v44 = vpack.c.bf16 %v2231_v13, %v2231_v13  ;;  %v3454_v13 = vld [vmem:[#allocation3 + $0x8] ss:$16 sps:$4 sm:$0xff]  }
 0x7f9   :  { %v3262_v55 = vpop.eup %3261  ;;  %v2206_v39 = vadd.f32 1.0, %v3260_v43  ;;  %v3455_v43 = vld [vmem:[#allocation3 + $0x24] ss:$16 sps:$4 sm:$0xff]  }
 0x7fa   :  { %v2220_v3 = vadd.f32 1.0, %v3262_v55  ;;  %v2238_v10 = vrot.slane %v2234_v44, 2  ;;  %v3264_v60 = vpop.eup %3263  ;;  %v3456_v44 = vld [vmem:[#allocation3 + $0x2c] ss:$16 sps:$4 sm:$0xff]   ;;  %v3457_v55 = vld [vmem:[#allocation3 + $0x20] ss:$16 sps:$4 sm:$0xff]  }
 0x7fb   :  { %3267 = vrcp.f32 %v2206_v39  ;;  %v3266_v14 = vpop.eup %3265  ;;  %v2213_v41 = vadd.f32 1.0, %v3264_v60  ;;  %v3458_v39 = vld [vmem:[#allocation3 + $0x28] ss:$16 sps:$4 sm:$0xff]   ;;  %v3461_v60 = vld [vmem:[#allocation3 + $0x40] ss:$16 sps:$4 sm:$0xff]  }
 0x7fc   :  { %3269 = vrcp.f32 %v2220_v3  ;;  %2273 = vmatprep.mubr.bf16.mxu0 %v2238_v10  ;;  %2314 = vmatprep.mubr.bf16.mxu1 %v2238_v10  ;;  %v3459_v3 = vld [vmem:[#allocation3 + $0x44] ss:$16 sps:$4 sm:$0xff]   ;;  %v3460_v10 = vld [vmem:[#allocation3 + $0x4c] ss:$16 sps:$4 sm:$0xff]  }
 0x7fd   :  { %3271 = vrcp.f32 %v2213_v41  ;;  %v3468_v41 = vld [vmem:[#allocation3 + $0x8c] ss:$16 sps:$4 sm:$0xff]  }
 0x805   :  { %v3268_v23 = vpop.eup %3267 }
 0x806   :  { %v3270_v50 = vpop.eup %3269  ;;  %v2216_v25 = vmul.f32 %v3268_v23, %v3266_v14  ;;  %v3462_v14 = vld [vmem:[#allocation3 + $0x48] ss:$16 sps:$4 sm:$0xff]   ;;  %v3463_v23 = vld [vmem:[#allocation3 + $0x64] ss:$16 sps:$4 sm:$0xff]  }
 0x807   :  { %v2226_v52 = vmul.f32 %v3270_v50, %v2224_v19  ;;  %v3272_v1 = vpop.eup %3271  ;;  %v3464_v19 = vld [vmem:[#allocation3 + $0x6c] ss:$16 sps:$4 sm:$0xff]   ;;  %v3465_v50 = vld [vmem:[#allocation3 + $0x60] ss:$16 sps:$4 sm:$0xff]  }
 0x809   :  { %v4898_v7 = vadd.f32 %v2226_v52, %v2216_v25  ;;  %v3466_v25 = vld [vmem:[#allocation3 + $0x68] ss:$16 sps:$4 sm:$0xff]   ;;  %v3469_v52 = vld [vmem:[#allocation3 + $0x80] ss:$16 sps:$4 sm:$0xff]  }
 0x80b   :  { %3273 = vtanh.f32 %v4898_v7 }
 0x815   :  { %v3274_v53 = vpop.eup %3273 }
 0x816   :  { %v2229_v57 = vmul.f32 %v3274_v53, %v3272_v1  ;;  %v3470_v1 = vld [vmem:[#allocation3 + $0x88] ss:$16 sps:$4 sm:$0xff]   ;;  %v3471_v53 = vld [vmem:[#allocation3 + $0xa4] ss:$16 sps:$4 sm:$0xff]  }
 0x818   :  { %v2233_v37 = vpack.c.bf16 %v2229_v57, %v2229_v57  ;;  %v3472_v57 = vld [vmem:[#allocation3 + $0xac] ss:$16 sps:$4 sm:$0xff]  }
 0x81a   :  { %v4901_v47 = vrot.slane %v2233_v37, 2  ;;  %v3473_v37 = vld [vmem:[#allocation3 + $0xa0] ss:$16 sps:$4 sm:$0xff]  }
 0x81c   :  { %2274 = vmatmul.mubr.bf16.vlgmr.msra.gmra.mrb[48].mxu0 %v4901_v47  ;;  %2315 = vmatmul.mubr.bf16.vlgmr.msra.gmra.mrb[56].mxu1 %v4901_v47 }
 0x81d   :  { %2348 = vmatpush1.bf16.msra.mxu0 %v3453_v9  ;;  %2389 = vmatpush1.bf16.msra.mxu1 %v3454_v13  ;;  %v3474_v9 = vld [vmem:[#allocation3 + $0xa8] ss:$16 sps:$4 sm:$0xff]   ;;  %v3475_v13 = vld [vmem:[#allocation3 + $0xc4] ss:$16 sps:$4 sm:$0xff]  }
 0x81e   :  { %2349 = vmatprep.subr.bf16.mxu0 %v3455_v43  ;;  %2390 = vmatprep.subr.bf16.mxu1 %v3456_v44  ;;  %v3476_v43 = vld [vmem:[#allocation3 + $0xcc] ss:$16 sps:$4 sm:$0xff]   ;;  %v3477_v44 = vld [vmem:[#allocation3 + $0xc0] ss:$16 sps:$4 sm:$0xff]  }
 0x81f   :  { %2379 = vmatprep.mubr.bf16.mxu0 %v5308_v61  ;;  %2420 = vmatprep.mubr.bf16.mxu1 %v5308_v61  ;;  %v3467_v61 = vld [vmem:[#allocation3 + $0x84] ss:$16 sps:$4 sm:$0xff]  }
 0x821   :  { %2350 = vmatpush1.bf16.msra.mxu0 %v3457_v55  ;;  %2391 = vmatpush1.bf16.msra.mxu1 %v3458_v39  ;;  %v3478_v55 = vld [vmem:[#allocation3 + $0xc8] ss:$16 sps:$4 sm:$0xff]   ;;  %v3479_v39 = vld [vmem:[#allocation3 + $0xe4] ss:$16 sps:$4 sm:$0xff]  }
 0x822   :  { %2351 = vmatprep.subr.bf16.mxu0 %v3459_v3  ;;  %2392 = vmatprep.subr.bf16.mxu1 %v3460_v10  ;;  %v3480_v3 = vld [vmem:[#allocation3 + $0xec] ss:$16 sps:$4 sm:$0xff]   ;;  %v3481_v10 = vld [vmem:[#allocation3 + $0xe0] ss:$16 sps:$4 sm:$0xff]  }
 0x825   :  { %2352 = vmatpush1.bf16.msra.mxu0 %v3461_v60  ;;  %2393 = vmatpush1.bf16.msra.mxu1 %v3462_v14  ;;  %v3482_v60 = vld [vmem:[#allocation3 + $0xe8] ss:$16 sps:$4 sm:$0xff]  }
 0x826   :  { %2353 = vmatprep.subr.bf16.mxu0 %v3463_v23  ;;  %2394 = vmatprep.subr.bf16.mxu1 %v3464_v19 }
 0x829   :  { %2354 = vmatpush1.bf16.msra.mxu0 %v3465_v50  ;;  %2395 = vmatpush1.bf16.msra.mxu1 %v3466_v25 }
 0x82a   :  { %2355 = vmatprep.subr.bf16.mxu0 %v3467_v61  ;;  %2396 = vmatprep.subr.bf16.mxu1 %v3468_v41 }
 0x82d   :  { %2356 = vmatpush1.bf16.msra.mxu0 %v3469_v52  ;;  %2397 = vmatpush1.bf16.msra.mxu1 %v3470_v1 }
 0x82e   :  { %2357 = vmatprep.subr.bf16.mxu0 %v3471_v53  ;;  %2398 = vmatprep.subr.bf16.mxu1 %v3472_v57 }
 0x831   :  { %2358 = vmatpush1.bf16.msra.mxu0 %v3473_v37  ;;  %2399 = vmatpush1.bf16.msra.mxu1 %v3474_v9 }
 0x832   :  { %2359 = vmatprep.subr.bf16.mxu0 %v3475_v13  ;;  %2400 = vmatprep.subr.bf16.mxu1 %v3476_v43 }
 0x835   :  { %2360 = vmatpush1.bf16.msra.mxu0 %v3477_v44  ;;  %2401 = vmatpush1.bf16.msra.mxu1 %v3478_v55 }
 0x836   :  { %2361 = vmatprep.subr.bf16.mxu0 %v3479_v39  ;;  %2402 = vmatprep.subr.bf16.mxu1 %v3480_v3 }
 0x839   :  { %2362 = vmatpush1.bf16.msra.mxu0 %v3481_v10  ;;  %2403 = vmatpush1.bf16.msra.mxu1 %v3482_v60 }
 0x83a   :  { %2483 = vmatprep.subr.bf16.mxu0 %v4757_v28  ;;  %2524 = vmatprep.subr.bf16.mxu1 %v4760_v24  ;;  %v3483_v28 = vld [vmem:[#allocation5 + $0x104] ss:$16 sps:$4 sm:$0xff]   ;;  %v3484_v24 = vld [vmem:[#allocation5 + $0x10c] ss:$16 sps:$4 sm:$0xff]  }
 0x83c   :  { %2380 = vmatmul.mubr.bf16.vlgmr.msra.gmra.mrb[52].mxu0 %v4901_v47  ;;  %2421 = vmatmul.mubr.bf16.vlgmr.msra.gmra.mrb[60].mxu1 %v4901_v47 }
 0x83d   :  { %2484 = vmatpush1.bf16.msra.mxu0 %v4763_v12  ;;  %2525 = vmatpush1.bf16.msra.mxu1 %v4766_v54  ;;  %v3485_v12 = vld [vmem:[#allocation5 + $0x100] ss:$16 sps:$4 sm:$0xff]   ;;  %v3486_v54 = vld [vmem:[#allocation5 + $0x108] ss:$16 sps:$4 sm:$0xff]  }
 0x83e   :  { %2485 = vmatprep.subr.bf16.mxu0 %v4769_v48  ;;  %2526 = vmatprep.subr.bf16.mxu1 %v4772_v17  ;;  %v3487_v48 = vld [vmem:[#allocation5 + $0x124] ss:$16 sps:$4 sm:$0xff]   ;;  %v3488_v17 = vld [vmem:[#allocation5 + $0x12c] ss:$16 sps:$4 sm:$0xff]  }
 0x841   :  { %2486 = vmatpush1.bf16.msra.mxu0 %v4775_v18  ;;  %2527 = vmatpush1.bf16.msra.mxu1 %v4778_v27  ;;  %v3489_v18 = vld [vmem:[#allocation5 + $0x120] ss:$16 sps:$4 sm:$0xff]   ;;  %v3490_v27 = vld [vmem:[#allocation5 + $0x128] ss:$16 sps:$4 sm:$0xff]  }
 0x842   :  { %2487 = vmatprep.subr.bf16.mxu0 %v4781_v34  ;;  %2528 = vmatprep.subr.bf16.mxu1 %v4784_v45  ;;  %v3491_v34 = vld [vmem:[#allocation5 + $0x144] ss:$16 sps:$4 sm:$0xff]   ;;  %v3492_v45 = vld [vmem:[#allocation5 + $0x14c] ss:$16 sps:$4 sm:$0xff]  }
 0x845   :  { %2488 = vmatpush1.bf16.msra.mxu0 %v4787_v5  ;;  %2529 = vmatpush1.bf16.msra.mxu1 %v4790_v20  ;;  %v3493_v5 = vld [vmem:[#allocation5 + $0x140] ss:$16 sps:$4 sm:$0xff]   ;;  %v3494_v20 = vld [vmem:[#allocation5 + $0x148] ss:$16 sps:$4 sm:$0xff]  }
 0x846   :  { %2489 = vmatprep.subr.bf16.mxu0 %v4793_v26  ;;  %2530 = vmatprep.subr.bf16.mxu1 %v4796_v40  ;;  %v3495_v26 = vld [vmem:[#allocation5 + $0x164] ss:$16 sps:$4 sm:$0xff]   ;;  %v3496_v40 = vld [vmem:[#allocation5 + $0x16c] ss:$16 sps:$4 sm:$0xff]  }
 0x849   :  { %2490 = vmatpush1.bf16.msra.mxu0 %v4799_v29  ;;  %2531 = vmatpush1.bf16.msra.mxu1 %v4802_v11  ;;  %v3497_v29 = vld [vmem:[#allocation5 + $0x160] ss:$16 sps:$4 sm:$0xff]   ;;  %v3498_v11 = vld [vmem:[#allocation5 + $0x168] ss:$16 sps:$4 sm:$0xff]  }
 0x84a   :  { %2491 = vmatprep.subr.bf16.mxu0 %v4805_v8  ;;  %2532 = vmatprep.subr.bf16.mxu1 %v4808_v21  ;;  %v3499_v8 = vld [vmem:[#allocation5 + $0x184] ss:$16 sps:$4 sm:$0xff]   ;;  %v3500_v21 = vld [vmem:[#allocation5 + $0x18c] ss:$16 sps:$4 sm:$0xff]  }
 0x84d   :  { %2492 = vmatpush1.bf16.msra.mxu0 %v4811_v31  ;;  %2533 = vmatpush1.bf16.msra.mxu1 %v4814_v33  ;;  %v3501_v31 = vld [vmem:[#allocation5 + $0x180] ss:$16 sps:$4 sm:$0xff]   ;;  %v3502_v33 = vld [vmem:[#allocation5 + $0x188] ss:$16 sps:$4 sm:$0xff]  }
 0x84e   :  { %2493 = vmatprep.subr.bf16.mxu0 %v4817_v22  ;;  %2534 = vmatprep.subr.bf16.mxu1 %v4820_v38  ;;  %v3503_v22 = vld [vmem:[#allocation5 + $0x1a4] ss:$16 sps:$4 sm:$0xff]   ;;  %v3504_v38 = vld [vmem:[#allocation5 + $0x1ac] ss:$16 sps:$4 sm:$0xff]  }
 0x851   :  { %2494 = vmatpush1.bf16.msra.mxu0 %v4823_v35  ;;  %2535 = vmatpush1.bf16.msra.mxu1 %v4826_v30  ;;  %v3505_v35 = vld [vmem:[#allocation5 + $0x1a0] ss:$16 sps:$4 sm:$0xff]   ;;  %v3506_v30 = vld [vmem:[#allocation5 + $0x1a8] ss:$16 sps:$4 sm:$0xff]  }
 0x852   :  { %2495 = vmatprep.subr.bf16.mxu0 %v4829_v6  ;;  %2536 = vmatprep.subr.bf16.mxu1 %v4832_v36  ;;  %v3507_v6 = vld [vmem:[#allocation5 + $0x1c4] ss:$16 sps:$4 sm:$0xff]   ;;  %v3508_v36 = vld [vmem:[#allocation5 + $0x1cc] ss:$16 sps:$4 sm:$0xff]  }
 0x855   :  { %2496 = vmatpush1.bf16.msra.mxu0 %v4835_v15  ;;  %2537 = vmatpush1.bf16.msra.mxu1 %v4838_v49  ;;  %v3509_v15 = vld [vmem:[#allocation5 + $0x1c0] ss:$16 sps:$4 sm:$0xff]   ;;  %v3510_v49 = vld [vmem:[#allocation5 + $0x1c8] ss:$16 sps:$4 sm:$0xff]  }
 0x856   :  { %2497 = vmatprep.subr.bf16.mxu0 %v4841_v0  ;;  %2538 = vmatprep.subr.bf16.mxu1 %v4844_v16  ;;  %v3511_v0 = vld [vmem:[#allocation5 + $0x1e4] ss:$16 sps:$4 sm:$0xff]   ;;  %v3512_v16 = vld [vmem:[#allocation5 + $0x1ec] ss:$16 sps:$4 sm:$0xff]  }
 0x859   :  { %2498 = vmatpush1.bf16.msra.mxu0 %v4847_v42  ;;  %2539 = vmatpush1.bf16.msra.mxu1 %v4850_v63  ;;  %v3513_v42 = vld [vmem:[#allocation5 + $0x1e0] ss:$16 sps:$4 sm:$0xff]   ;;  %v3514_v63 = vld [vmem:[#allocation5 + $0x1e8] ss:$16 sps:$4 sm:$0xff]  }
 0x85a   :  { %2499 = vmatprep.subr.bf16.mxu0 %v3483_v28  ;;  %2540 = vmatprep.subr.bf16.mxu1 %v3484_v24 }
 0x85d   :  { %2500 = vmatpush1.bf16.msra.mxu0 %v3485_v12  ;;  %2541 = vmatpush1.bf16.msra.mxu1 %v3486_v54 }
 0x85e   :  { %2501 = vmatprep.subr.bf16.mxu0 %v3487_v48  ;;  %2542 = vmatprep.subr.bf16.mxu1 %v3488_v17 }
 0x861   :  { %2502 = vmatpush1.bf16.msra.mxu0 %v3489_v18  ;;  %2543 = vmatpush1.bf16.msra.mxu1 %v3490_v27 }
 0x862   :  { %2503 = vmatprep.subr.bf16.mxu0 %v3491_v34  ;;  %2544 = vmatprep.subr.bf16.mxu1 %v3492_v45 }
 0x865   :  { %2504 = vmatpush1.bf16.msra.mxu0 %v3493_v5  ;;  %2545 = vmatpush1.bf16.msra.mxu1 %v3494_v20 }
 0x866   :  { %2505 = vmatprep.subr.bf16.mxu0 %v3495_v26  ;;  %2546 = vmatprep.subr.bf16.mxu1 %v3496_v40 }
 0x869   :  { %2506 = vmatpush1.bf16.msra.mxu0 %v3497_v29  ;;  %2547 = vmatpush1.bf16.msra.mxu1 %v3498_v11 }
 0x86a   :  { %2507 = vmatprep.subr.bf16.mxu0 %v3499_v8  ;;  %2548 = vmatprep.subr.bf16.mxu1 %v3500_v21 }
 0x86d   :  { %2508 = vmatpush1.bf16.msra.mxu0 %v3501_v31  ;;  %2549 = vmatpush1.bf16.msra.mxu1 %v3502_v33 }
 0x86e   :  { %2509 = vmatprep.subr.bf16.mxu0 %v3503_v22  ;;  %2550 = vmatprep.subr.bf16.mxu1 %v3504_v38 }
 0x871   :  { %2510 = vmatpush1.bf16.msra.mxu0 %v3505_v35  ;;  %2551 = vmatpush1.bf16.msra.mxu1 %v3506_v30 }
 0x872   :  { %2511 = vmatprep.subr.bf16.mxu0 %v3507_v6  ;;  %2552 = vmatprep.subr.bf16.mxu1 %v3508_v36 }
 0x875   :  { %2512 = vmatpush1.bf16.msra.mxu0 %v3509_v15  ;;  %2553 = vmatpush1.bf16.msra.mxu1 %v3510_v49 }
 0x876   :  { %2513 = vmatprep.subr.bf16.mxu0 %v3511_v0  ;;  %2554 = vmatprep.subr.bf16.mxu1 %v3512_v16 }
 0x879   :  { %2514 = vmatpush1.bf16.msra.mxu0 %v3513_v42  ;;  %2555 = vmatpush1.bf16.msra.mxu1 %v3514_v63 }
 0x8ef   :  { %v2275_v47 = vpop.f32.mrb[48].mxu0  ;;  %v2316_v14 = vpop.f32.mrb[56].mxu1 }
 0x8f0   :  { %v2276_v23 = vadd.f32 %v2275_v47, %v5548_v51  ;;  %v2277_v19 = vpop.f32.mrb[49].mxu0  ;;  %v2318_v50 = vpop.f32.mrb[57].mxu1  ;;  %v2317_v13 = vadd.f32 %v2316_v14, %v5549_v56  ;;  %v2466_v14 = vrot.slane %v4898_v7, 6  ;;  %v2590_v7 = vld [vmem:[%s5016_s6 + $0x8] sm:$0xff] }
 0x8f1   :  { %v2278_v25 = vadd.f32 %v2277_v19, %v5518_v2  ;;  %v2279_v61 = vpop.f32.mrb[50].mxu0  ;;  %v2320_v41 = vpop.f32.mrb[58].mxu1  ;;  %v2319_v37 = vadd.f32 %v2318_v50, %v5519_v62 }
 0x8f2   :  { %v2832_v52 = vmul.f32 -1.442695, %v2276_v23  ;;  %v2280_v1 = vpop.f32.mrb[51].mxu0  ;;  %v2321_v53 = vpop.f32.mrb[59].mxu1 }
 0x8f3   :  { %v2834_v57 = vmul.f32 -1.442695, %v2278_v25  ;;  %v2833_v9 = vmul.f32 -1.442695, %v2319_v37 }
 0x8f4   :  { %3275 = vpow2.f32 %v2832_v52 }
 0x8f5   :  { %3277 = vpow2.f32 %v2834_v57  ;;  %v2589_v57 = vld [vmem:[%s5016_s6] sm:$0xff] }
 0x8f6   :  { %3279 = vpow2.f32 %v2833_v9  ;;  %v2895_v37 = vpack.c.bf16 %v2590_v7, %v2589_v57  ;;  %v3568_v9 = vmov 0.0|0.0  }
 0x8f7   :  { %3281 = vtanh.f32 %v2317_v13  ;;  %2894 = vmatprep.subr.bf16.mxu0 %v3568_v9  ;;  %v2591_v13 = vld [vmem:[%s5016_s6 + $0x10] sm:$0xff] }
 0x8fe   :  { %v3276_v43 = vpop.eup %3275 }
 0x8ff   :  { %v3278_v44 = vpop.eup %3277  ;;  %v2326_v55 = vadd.f32 1.0, %v3276_v43  ;;  %v2592_v43 = vld [vmem:[%s5016_s6 + $0x18] sm:$0xff] }
 0x900   :  { %v2340_v39 = vadd.f32 1.0, %v3278_v44  ;;  %v3280_v3 = vpop.eup %3279  ;;  %v2898_v44 = vpack.c.bf16 %v2592_v43, %v2591_v13 }
 0x901   :  { %3283 = vrcp.f32 %v2326_v55  ;;  %v3282_v10 = vpop.eup %3281  ;;  %v2333_v12 = vadd.f32 1.0, %v3280_v3  ;;  %v2593_v55 = vld [vmem:[%s5016_s6 + $0x20] sm:$0xff] }
 0x902   :  { %3285 = vrcp.f32 %v2340_v39  ;;  %v2594_v39 = vld [vmem:[%s5016_s6 + $0x28] sm:$0xff] }
 0x903   :  { %3287 = vrcp.f32 %v2333_v12  ;;  %v2901_v3 = vpack.c.bf16 %v2594_v39, %v2593_v55  ;;  %v2598_v12 = vld [vmem:[%s5016_s6 + $0x48] sm:$0xff] }
 0x90b   :  { %v3284_v60 = vpop.eup %3283 }
 0x90c   :  { %v3286_v28 = vpop.eup %3285  ;;  %v2336_v24 = vmul.f32 %v3284_v60, %v3282_v10  ;;  %v2595_v10 = vld [vmem:[%s5016_s6 + $0x30] sm:$0xff]  ;;  %v2596_v60 = vld [vmem:[%s5016_s6 + $0x38] sm:$0xff] }
 0x90d   :  { %v2343_v54 = vmul.f32 %v3286_v28, %v4890_v59  ;;  %v3288_v22 = vpop.eup %3287  ;;  %v2904_v28 = vpack.c.bf16 %v2596_v60, %v2595_v10 }
 0x90f   :  { %v4946_v48 = vadd.f32 %v2343_v54, %v2336_v24  ;;  %v2381_v17 = vpop.f32.mrb[52].mxu0  ;;  %v2422_v18 = vpop.f32.mrb[60].mxu1  ;;  %v2597_v24 = vld [vmem:[%s5016_s6 + $0x40] sm:$0xff] }
 0x910   :  { %v2433_v27 = vrot.slane %v2381_v17, 2  ;;  %v2383_v34 = vpop.f32.mrb[53].mxu0  ;;  %v2424_v45 = vpop.f32.mrb[61].mxu1  ;;  %v2435_v38 = vrot.slane %v2422_v18, 2  ;;  %v2907_v54 = vpack.c.bf16 %v2598_v12, %v2597_v24  ;;  %v2599_v17 = vld [vmem:[%s5016_s6 + $0x50] sm:$0xff]  ;;  %v2600_v18 = vld [vmem:[%s5016_s6 + $0x58] sm:$0xff] }
 0x911   :  { %v2434_v5 = vrot.slane %v2383_v34, 2  ;;  %v2385_v20 = vpop.f32.mrb[54].mxu0  ;;  %v2426_v26 = vpop.f32.mrb[62].mxu1  ;;  %3289 = vtanh.f32 %v4946_v48  ;;  %v2436_v31 = vrot.slane %v2424_v45, 2  ;;  %v2910_v34 = vpack.c.bf16 %v2600_v18, %v2599_v17  ;;  %v2602_v45 = vld [vmem:[%s5016_s6 + $0x68] sm:$0xff] }
 0x912   :  { %v2441_v40 = vadd.f32 %v2433_v27, %v5551_v58  ;;  %v2386_v29 = vpop.f32.mrb[55].mxu0  ;;  %v2427_v11 = vpop.f32.mrb[63].mxu1  ;;  %v2443_v36 = vadd.f32 %v2435_v38, %v5460_v46  ;;  %v2601_v27 = vld [vmem:[%s5016_s6 + $0x60] sm:$0xff]  ;;  %v2603_v26 = vld [vmem:[%s5016_s6 + $0x70] sm:$0xff] }
 0x913   :  { %v2442_v8 = vadd.f32 %v2434_v5, %v5458_v4  ;;  %v2444_v33 = vadd.f32 %v2436_v31, %v5459_v32  ;;  %v3570_v5 = vmov 0.0   ;;  %v2913_v20 = vpack.c.bf16 %v2602_v45, %v2601_v27 }
 0x914   :  { %v2835_v59 = vmul.f32 -1.442695, %v2441_v40  ;;  %v2604_v40 = vld [vmem:[%s5016_s6 + $0x78] sm:$0xff] }
 0x915   :  { %v2837_v21 = vmul.f32 -1.442695, %v2442_v8  ;;  %v2836_v6 = vmul.f32 -1.442695, %v2444_v33  ;;  %v2916_v29 = vpack.c.bf16 %v2604_v40, %v2603_v26 }
 0x916   :  { %3291 = vpow2.f32 %v2835_v59 }
 0x917   :  { %3293 = vpow2.f32 %v2837_v21 }
 0x918   :  { %3295 = vpow2.f32 %v2836_v6 }
 0x919   :  { %3297 = vtanh.f32 %v2443_v36 }
 0x91b   :  { %v3290_v35 = vpop.eup %3289 }
 0x91c   :  { %v2346_v30 = vmul.f32 %v3290_v35, %v3288_v22 }
 0x91e   :  { %v2473_v15 = vrot.slane %v2346_v30, 2 }
 0x920   :  { %v3292_v58 = vpop.eup %3291  ;;  %v2476_v49 = vpack.c.bf16 %v2473_v15, %v2473_v15 }
 0x921   :  { %v3294_v0 = vpop.eup %3293  ;;  %v2448_v16 = vadd.f32 1.0, %v3292_v58 }
 0x922   :  { %v2462_v4 = vadd.f32 1.0, %v3294_v0  ;;  %v2480_v42 = vrot.slane %v2476_v49, 3  ;;  %v3296_v32 = vpop.eup %3295 }
 0x923   :  { %3299 = vrcp.f32 %v2448_v16  ;;  %v3298_v63 = vpop.eup %3297  ;;  %v2455_v19 = vadd.f32 1.0, %v3296_v32 }
 0x924   :  { %3301 = vrcp.f32 %v2462_v4  ;;  %2515 = vmatprep.mubr.bf16.mxu0 %v2480_v42  ;;  %2556 = vmatprep.mubr.bf16.mxu1 %v2480_v42 }
 0x925   :  { %3303 = vrcp.f32 %v2455_v19 }
 0x92d   :  { %v3300_v47 = vpop.eup %3299 }
 0x92e   :  { %v3302_v23 = vpop.eup %3301  ;;  %v2458_v46 = vmul.f32 %v3300_v47, %v3298_v63 }
 0x92f   :  { %v2468_v50 = vmul.f32 %v3302_v23, %v2466_v14  ;;  %v3304_v61 = vpop.eup %3303 }
 0x931   :  { %v2469_v25 = vadd.f32 %v2468_v50, %v2458_v46  ;;  %v2841_v50 = vld [vmem:[#allocation2] ss:$0 sm:$0xff] }
 0x933   :  { %3305 = vtanh.f32 %v2469_v25 }
 0x93d   :  { %v3306_v41 = vpop.eup %3305 }
 0x93e   :  { %v2471_v52 = vmul.f32 %v3306_v41, %v3304_v61 }
 0x940   :  { %v2475_v1 = vpack.c.bf16 %v2471_v52, %v2471_v52 }
 0x942   :  { %v2479_v53 = vrot.slane %v2475_v1, 3 }
 0x944   :  { %2516 = vmatmul.mubr.bf16.vlgmr.msra.gmra.mrb[56].mxu0 %v2479_v53  ;;  %2557 = vmatmul.mubr.bf16.vlgmr.msra.gmra.mrb[64].mxu1 %v2479_v53 }
 0x945   :  { %2896 = vmatpush3.bf16.msra.mxu0 %v2895_v37  ;;  %2891 = vmatprep.mubr.msk.f32.mxu0 %vm3569_vm2, %v3570_v5 }
 0x946   :  { %2897 = vmatprep.subr.bf16.mxu0 %v3568_v9 }
 0x949   :  { %2899 = vmatpush3.bf16.msra.mxu0 %v2898_v44 }
 0x94a   :  { %2900 = vmatprep.subr.bf16.mxu0 %v3568_v9 }
 0x94d   :  { %2902 = vmatpush3.bf16.msra.mxu0 %v2901_v3 }
 0x94e   :  { %2903 = vmatprep.subr.bf16.mxu0 %v3568_v9 }
 0x951   :  { %2905 = vmatpush3.bf16.msra.mxu0 %v2904_v28 }
 0x952   :  { %2906 = vmatprep.subr.bf16.mxu0 %v3568_v9 }
 0x955   :  { %2908 = vmatpush3.bf16.msra.mxu0 %v2907_v54 }
 0x956   :  { %2909 = vmatprep.subr.bf16.mxu0 %v3568_v9 }
 0x959   :  { %2911 = vmatpush3.bf16.msra.mxu0 %v2910_v34 }
 0x95a   :  { %2912 = vmatprep.subr.bf16.mxu0 %v3568_v9 }
 0x95d   :  { %2914 = vmatpush3.bf16.msra.mxu0 %v2913_v20 }
 0x95e   :  { %2915 = vmatprep.subr.bf16.mxu0 %v3568_v9 }
 0x961   :  { %2917 = vmatpush3.bf16.msra.mxu0 %v2916_v29 }
 0xa17   :  { %v2517_v11 = vpop.f32.mrb[56].mxu0  ;;  %v2558_v8 = vpop.f32.mrb[64].mxu1 }
 0xa18   :  { %v2518_v59 = vadd.f32 %v2517_v11, %v5548_v51  ;;  %v2519_v21 = vpop.f32.mrb[57].mxu0  ;;  %v2560_v31 = vpop.f32.mrb[65].mxu1  ;;  %v2559_v49 = vadd.f32 %v2558_v8, %v5549_v56 }
 0xa19   :  { %v2520_v33 = vadd.f32 %v2519_v21, %v5518_v2  ;;  %v2521_v22 = vpop.f32.mrb[58].mxu0  ;;  %v2562_v38 = vpop.f32.mrb[66].mxu1  ;;  %v2561_v15 = vadd.f32 %v2560_v31, %v5519_v62 }
 0xa1a   :  { %v2838_v35 = vmul.f32 -1.442695, %v2518_v59  ;;  %v2522_v30 = vpop.f32.mrb[59].mxu0  ;;  %v2563_v6 = vpop.f32.mrb[67].mxu1 }
 0xa1b   :  { %v2840_v36 = vmul.f32 -1.442695, %v2520_v33  ;;  %v2839_v58 = vmul.f32 -1.442695, %v2561_v15 }
 0xa1c   :  { %3307 = vpow2.f32 %v2838_v35 }
 0xa1d   :  { %3309 = vpow2.f32 %v2840_v36 }
 0xa1e   :  { %3311 = vpow2.f32 %v2839_v58 }
 0xa1f   :  { %3313 = vtanh.f32 %v2559_v49 }
 0xa26   :  { %v3308_v0 = vpop.eup %3307 }
 0xa27   :  { %v3310_v16 = vpop.eup %3309  ;;  %v2568_v51 = vadd.f32 1.0, %v3308_v0 }
 0xa28   :  { %v2582_v4 = vadd.f32 1.0, %v3310_v16  ;;  %v3312_v2 = vpop.eup %3311 }
 0xa29   :  { %3315 = vrcp.f32 %v2568_v51  ;;  %v3314_v42 = vpop.eup %3313  ;;  %v2575_v14 = vadd.f32 1.0, %v3312_v2 }
 0xa2a   :  { %3317 = vrcp.f32 %v2582_v4 }
 0xa2b   :  { %3319 = vrcp.f32 %v2575_v14 }
 0xa33   :  { %v3316_v32 = vpop.eup %3315 }
 0xa34   :  { %v3318_v63 = vpop.eup %3317  ;;  %v2578_v47 = vmul.f32 %v3316_v32, %v3314_v42 }
 0xa35   :  { %v2585_v23 = vmul.f32 %v3318_v63, %v4946_v48  ;;  %v3320_v56 = vpop.eup %3319 }
 0xa37   :  { %v2586_v62 = vadd.f32 %v2585_v23, %v2578_v47 }
 0xa39   :  { %3321 = vtanh.f32 %v2586_v62 }
 0xa43   :  { %v3322_v46 = vpop.eup %3321 }
 0xa44   :  { %v2588_v19 = vmul.f32 %v3322_v46, %v3320_v56 }
 0xa46   :  { %2892 = vmatmul.mubr.f32.vlgmr.msra.gmra.mrb[60].mxu0 %v2588_v19 }
 0xb19   :  { %v2678_v25 = vpop.f32.mrb[60].mxu0 }
 0xb1a   :  { %v2679_v61 = vadd.f32 %v2841_v50, %v2678_v25  ;;  %v2893_v41 = vpop.f32.mrb[61].mxu0 }
 0xb1c   :  { %2683 = vst.msk [vmem:[%s5018_s8] sm:$0x3] %vm2682_vm3, %v2679_v61 }
 0xb1d   :  { %2688 = vsyncpa [#allocation4], 1 }
 0xb1e   :  { %2689 = vsyncpa [#allocation6], 1 }

</bundles_post_ra>
